<compile_context>
chip_gen: v7x
topology: tpu7x:2x2x1
jax: 0.10.0
libtpu: 0.0.40
codegen_flags: <defaults>
</compile_context>

<pallas_src>
import math

import numpy as np
import jax
import jax.numpy as jnp
from jax.experimental import pallas as pl
from jax.experimental.pallas import tpu as pltpu


def make_diff_kernel(num_steps, coefs_x, coefs_n):
    """Builds the fused CFG-UNet + DDIM kernel with the per-step DDIM
    coefficients baked in as immediates (static unrolled loop)."""

    def kernel(lat_ref, ctx_ref, tproj_ref, w1_ref, w2_ref, out_ref):
        # lat_ref : (Cp, BHW)            initial latents (channel-padded)
        # ctx_ref : (2*HID, BHW)         CFG-stacked pooled-context bias
        # tproj_ref: (num_steps, 2*HID, 1)  per-step temb projection
        # w1_ref  : (2*HID, Cp)          stacked W1^T (zero-padded cols)
        # w2_ref  : (Cp, 2*HID)          CFG-folded W2^T (zero-padded rows)
        x = lat_ref[...]                                       # (Cp, BHW)
        for s in range(num_steps):
            # scale_model_input = identity; both CFG branches share this x.
            h = jnp.dot(w1_ref[...], x,
                        preferred_element_type=jnp.float32)    # (2*HID, BHW)
            h = h + tproj_ref[s] + ctx_ref[...]                 # lane-broadcast + bias
            # SiLU via EUP (exp + approx reciprocal), no VPU divide
            h = h * pl.reciprocal(1.0 + jnp.exp(-h), approx=True)
            # CFG already folded into w2: noise = (1-gs)*W2^T h_u + gs*W2^T h_t
            noise = jnp.dot(w2_ref[...], h,
                            preferred_element_type=jnp.float32)  # (Cp, BHW)
            # DDIM step (eta=0, epsilon prediction), folded scalar coefficients
            x = coefs_x[s] * x + coefs_n[s] * noise
        out_ref[...] = x

    return kernel


def timestep_embedding(t, dim):
    """Sinusoidal timestep embedding -> (dim,). Tiny scalar glue, stays in JAX."""
    half = dim // 2
    freqs = jnp.exp(-math.log(10000.0) *
                    jnp.arange(half, dtype=jnp.float32) / half)
    args = jnp.float32(t) * freqs
    return jnp.concatenate([jnp.sin(args), jnp.cos(args)])


def ddim_schedule_np(num_train_timesteps=1000, num_inference_steps=4,
                     beta_start=0.00085, beta_end=0.012):
    """DDIM 'scaled_linear' schedule (Stable-Diffusion style), set_alpha_to_one=True.
    Computed host-side in numpy so per-step coefficients become Python floats."""
    betas = np.linspace(beta_start ** 0.5, beta_end ** 0.5,
                        num_train_timesteps, dtype=np.float64) ** 2
    alphas_cumprod = np.cumprod(1.0 - betas)
    step_ratio = num_train_timesteps // num_inference_steps
    timesteps = [(num_inference_steps - 1 - i) * step_ratio
                 for i in range(num_inference_steps)]          # descending
    final_alpha_cumprod = 1.0
    return timesteps, alphas_cumprod, final_alpha_cumprod, step_ratio


def diffpipe_forward(latents_nchw, prompt_embeds, weights,
                     guidance_scale=7.5, num_inference_steps=4):
    """Mirrors DiffPipe.forward with CFG and a DDIM (eta=0) scheduler."""
    B, C, H, W = latents_nchw.shape
    HW = H * W
    BHW = B * HW

    w1, wt, wc, w2 = weights
    T_EMB, HID = wt.shape
    H2 = 2 * HID
    CP = 8                      # pad channel dim to a full sublane group

    # ---- DDIM schedule -> per-step folded scalar coefficients (Python floats)
    timesteps, acp, final_acp, step_ratio = ddim_schedule_np(
        num_inference_steps=num_inference_steps)
    coefs_x, coefs_n = [], []
    for t in timesteps:
        a_t = float(acp[t])
        prev_t = t - step_ratio
        a_p = float(acp[prev_t]) if prev_t >= 0 else float(final_acp)
        sa_t, s1_t = math.sqrt(a_t), math.sqrt(1.0 - a_t)
        sa_p, s1_p = math.sqrt(a_p), math.sqrt(1.0 - a_p)
        coefs_x.append(sa_p / sa_t)
        coefs_n.append(s1_p - sa_p * s1_t / sa_t)

    # PyTorch reference skips the uncond branch when gs <= 1.0; folding gs=1
    # into W2cfg makes the uncond half's weight 0, which is equivalent.
    gs = float(guidance_scale) if guidance_scale > 1.0 else 1.0

    # ---- NCHW -> channels-first lane-dense (Cp, B*HW); col b*HW+j = (b, pixel j)
    lat = jnp.transpose(latents_nchw, (1, 0, 2, 3)).reshape(C, BHW)
    lat = lat * 1.0             # latents * scheduler.init_noise_sigma (= 1.0 for DDIM)
    lat = jnp.concatenate(
        [lat, jnp.zeros((CP - C, BHW), jnp.float32)], axis=0)        # (CP, BHW)

    # ---- hoisted, timestep-invariant CFG-stacked context bias (2*HID, BHW) ----
    # prompt_embeds is the CFG-concatenated pair: (2B, S, E) = [negative; positive]
    ctx = jnp.stack([prompt_embeds[:B], prompt_embeds[B:]], axis=0)   # (2, B, S, E)
    ctx_pool = jnp.mean(ctx, axis=2)                                  # (2, B, E)
    c_h = jnp.einsum('rbe,eh->rbh', ctx_pool, wc)                     # (2, B, HID)
    ctx_bias = jnp.transpose(c_h, (0, 2, 1))                          # (2, HID, B)
    ctx_bias = jnp.broadcast_to(ctx_bias[:, :, :, None], (2, HID, B, HW))
    ctx_bias = ctx_bias.reshape(H2, BHW).astype(jnp.float32)          # [uncond; text]

    # ---- per-step timestep projection, stacked to 2*HID, VMEM-resident -------
    tembs = jnp.stack([timestep_embedding(t, T_EMB) for t in timesteps], axis=0)
    tproj = tembs.astype(jnp.float32) @ wt                            # (S, HID)
    tproj = jnp.concatenate([tproj, tproj], axis=1)                   # (S, 2*HID)
    tproj = tproj[:, :, None].astype(jnp.float32)                     # (S, 2*HID, 1)

    # ---- CFG folded weights ---------------------------------------------------
    w1t = jnp.transpose(w1)                                           # (HID, C)
    w1s = jnp.concatenate([w1t, w1t], axis=0)                         # (2*HID, C)
    w1s = jnp.concatenate(
        [w1s, jnp.zeros((H2, CP - C), jnp.float32)], axis=1)          # (2*HID, CP)
    w2t = jnp.transpose(w2)                                           # (C, HID)
    w2cfg = jnp.concatenate([(1.0 - gs) * w2t, gs * w2t], axis=1)     # (C, 2*HID)
    w2cfg = jnp.concatenate(
        [w2cfg, jnp.zeros((CP - C, H2), jnp.float32)], axis=0)        # (CP, 2*HID)

    kernel = make_diff_kernel(num_inference_steps, coefs_x, coefs_n)
    vmem = lambda: pl.BlockSpec(memory_space=pltpu.MemorySpace.VMEM)
    out = pl.pallas_call(
        kernel,
        out_shape=jax.ShapeDtypeStruct((CP, BHW), jnp.float32),
        in_specs=[vmem(), vmem(), vmem(), vmem(), vmem()],
        out_specs=vmem(),
    )(lat, ctx_bias, tproj, w1s, w2cfg)

    # drop channel padding, back to NCHW (matching the PyTorch return layout)
    out = out[:C]
    return jnp.transpose(out.reshape(C, B, H, W), (1, 0, 2, 3))


if __name__ == "__main__":
    key = jax.random.PRNGKey(0)
    kl, kp, k1, k2, k3, k4 = jax.random.split(key, 6)

    B, C, H, W = 2, 4, 16, 16       # latents (NCHW in the reference)
    S, E = 8, 32                    # prompt sequence length, text embedding dim
    T_EMB, HID = 32, 64             # timestep-embedding dim, hidden width

    latents = jax.random.normal(kl, (B, C, H, W), jnp.float32)
    # already CFG-concatenated prompt embeds: [negative(B); positive(B)]
    prompt_embeds = jax.random.normal(kp, (2 * B, S, E), jnp.float32)

    # deterministic synthetic UNet parameters
    w1 = jax.random.normal(k1, (C, HID), jnp.float32) * 0.1
    wt = jax.random.normal(k2, (T_EMB, HID), jnp.float32) * 0.1
    wc = jax.random.normal(k3, (E, HID), jnp.float32) * 0.1
    w2 = jax.random.normal(k4, (HID, C), jnp.float32) * 0.1

    out = diffpipe_forward(latents, prompt_embeds, (w1, wt, wc, w2),
                           guidance_scale=7.5, num_inference_steps=4)
    jax.block_until_ready(out)
    assert out.shape == (B, C, H, W)
    print("KERNEL_OK")
</pallas_src>

<mosaic_0001>
module attributes {stable_mosaic.version = 11 : i64} {
  func.func @kernel(%arg0: memref<8x512xf32, #tpu.memory_space<vmem>>, %arg1: memref<128x512xf32, #tpu.memory_space<vmem>>, %arg2: memref<4x128x1xf32, #tpu.memory_space<vmem>>, %arg3: memref<128x8xf32, #tpu.memory_space<vmem>>, %arg4: memref<8x128xf32, #tpu.memory_space<vmem>>, %arg5: memref<8x512xf32, #tpu.memory_space<vmem>>) attributes {dimension_semantics = [], scalar_prefetch = 0 : i64, scratch_operands = 0 : i64, tpu.core_type = #tpu.core_type<tc>} {
    %c0 = arith.constant 0 : index
    %c0_0 = arith.constant 0 : index
    %0 = vector.load %arg0[%c0, %c0_0] : memref<8x512xf32, #tpu.memory_space<vmem>>, vector<8x512xf32>
    %c0_1 = arith.constant 0 : index
    %c0_2 = arith.constant 0 : index
    %1 = vector.load %arg3[%c0_1, %c0_2] : memref<128x8xf32, #tpu.memory_space<vmem>>, vector<128x8xf32>
    %cst = arith.constant dense<0.000000e+00> : vector<128x512xf32>
    %2 = tpu.matmul %1, %0, %cst {dimension_numbers = #tpu.dot_dimension_numbers<[1], [0], [0], [1], [0, 0, 1, 1], [], []>} : vector<128x8xf32>, vector<8x512xf32>, vector<128x512xf32> -> vector<128x512xf32>
    %c0_3 = arith.constant 0 : index
    %c0_4 = arith.constant 0 : index
    %c0_5 = arith.constant 0 : index
    %3 = vector.load %arg2[%c0_3, %c0_4, %c0_5] : memref<4x128x1xf32, #tpu.memory_space<vmem>>, vector<1x128x1xf32>
    %4 = vector.shape_cast %3 : vector<1x128x1xf32> to vector<128x1xf32>
    %5 = vector.broadcast %4 : vector<128x1xf32> to vector<128x512xf32>
    %6 = arith.addf %2, %5 : vector<128x512xf32>
    %c0_6 = arith.constant 0 : index
    %c0_7 = arith.constant 0 : index
    %7 = vector.load %arg1[%c0_6, %c0_7] : memref<128x512xf32, #tpu.memory_space<vmem>>, vector<128x512xf32>
    %8 = arith.addf %6, %7 : vector<128x512xf32>
    %cst_8 = arith.constant 0.000000e+00 : f32
    %9 = vector.broadcast %cst_8 : f32 to vector<128x512xf32>
    %10 = arith.subf %9, %8 : vector<128x512xf32>
    %11 = math.exp %10 : vector<128x512xf32>
    %cst_9 = arith.constant 1.000000e+00 : f32
    %12 = vector.broadcast %cst_9 : f32 to vector<128x512xf32>
    %13 = arith.addf %12, %11 : vector<128x512xf32>
    %14 = tpu.reciprocal %13 {approx = true} : vector<128x512xf32> -> vector<128x512xf32>
    %15 = arith.mulf %8, %14 : vector<128x512xf32>
    %c0_10 = arith.constant 0 : index
    %c0_11 = arith.constant 0 : index
    %16 = vector.load %arg4[%c0_10, %c0_11] : memref<8x128xf32, #tpu.memory_space<vmem>>, vector<8x128xf32>
    %cst_12 = arith.constant dense<0.000000e+00> : vector<8x512xf32>
    %17 = tpu.matmul %16, %15, %cst_12 {dimension_numbers = #tpu.dot_dimension_numbers<[1], [0], [0], [1], [0, 0, 1, 1], [], []>} : vector<8x128xf32>, vector<128x512xf32>, vector<8x512xf32> -> vector<8x512xf32>
    %cst_13 = arith.constant 2.21801519 : f32
    %18 = vector.broadcast %cst_13 : f32 to vector<8x512xf32>
    %19 = arith.mulf %18, %0 : vector<8x512xf32>
    %cst_14 = arith.constant -1.3041358 : f32
    %20 = vector.broadcast %cst_14 : f32 to vector<8x512xf32>
    %21 = arith.mulf %20, %17 : vector<8x512xf32>
    %22 = arith.addf %19, %21 : vector<8x512xf32>
    %c0_15 = arith.constant 0 : index
    %c0_16 = arith.constant 0 : index
    %23 = vector.load %arg3[%c0_15, %c0_16] : memref<128x8xf32, #tpu.memory_space<vmem>>, vector<128x8xf32>
    %cst_17 = arith.constant dense<0.000000e+00> : vector<128x512xf32>
    %24 = tpu.matmul %23, %22, %cst_17 {dimension_numbers = #tpu.dot_dimension_numbers<[1], [0], [0], [1], [0, 0, 1, 1], [], []>} : vector<128x8xf32>, vector<8x512xf32>, vector<128x512xf32> -> vector<128x512xf32>
    %c1 = arith.constant 1 : index
    %c0_18 = arith.constant 0 : index
    %c0_19 = arith.constant 0 : index
    %25 = vector.load %arg2[%c1, %c0_18, %c0_19] : memref<4x128x1xf32, #tpu.memory_space<vmem>>, vector<1x128x1xf32>
    %26 = vector.shape_cast %25 : vector<1x128x1xf32> to vector<128x1xf32>
    %27 = vector.broadcast %26 : vector<128x1xf32> to vector<128x512xf32>
    %28 = arith.addf %24, %27 : vector<128x512xf32>
    %c0_20 = arith.constant 0 : index
    %c0_21 = arith.constant 0 : index
    %29 = vector.load %arg1[%c0_20, %c0_21] : memref<128x512xf32, #tpu.memory_space<vmem>>, vector<128x512xf32>
    %30 = arith.addf %28, %29 : vector<128x512xf32>
    %cst_22 = arith.constant 0.000000e+00 : f32
    %31 = vector.broadcast %cst_22 : f32 to vector<128x512xf32>
    %32 = arith.subf %31, %30 : vector<128x512xf32>
    %33 = math.exp %32 : vector<128x512xf32>
    %cst_23 = arith.constant 1.000000e+00 : f32
    %34 = vector.broadcast %cst_23 : f32 to vector<128x512xf32>
    %35 = arith.addf %34, %33 : vector<128x512xf32>
    %36 = tpu.reciprocal %35 {approx = true} : vector<128x512xf32> -> vector<128x512xf32>
    %37 = arith.mulf %30, %36 : vector<128x512xf32>
    %c0_24 = arith.constant 0 : index
    %c0_25 = arith.constant 0 : index
    %38 = vector.load %arg4[%c0_24, %c0_25] : memref<8x128xf32, #tpu.memory_space<vmem>>, vector<8x128xf32>
    %cst_26 = arith.constant dense<0.000000e+00> : vector<8x512xf32>
    %39 = tpu.matmul %38, %37, %cst_26 {dimension_numbers = #tpu.dot_dimension_numbers<[1], [0], [0], [1], [0, 0, 1, 1], [], []>} : vector<8x128xf32>, vector<128x512xf32>, vector<8x512xf32> -> vector<8x512xf32>
    %cst_27 = arith.constant 1.56151807 : f32
    %40 = vector.broadcast %cst_27 : f32 to vector<8x512xf32>
    %41 = arith.mulf %40, %22 : vector<8x512xf32>
    %cst_28 = arith.constant -0.757216453 : f32
    %42 = vector.broadcast %cst_28 : f32 to vector<8x512xf32>
    %43 = arith.mulf %42, %39 : vector<8x512xf32>
    %44 = arith.addf %41, %43 : vector<8x512xf32>
    %c0_29 = arith.constant 0 : index
    %c0_30 = arith.constant 0 : index
    %45 = vector.load %arg3[%c0_29, %c0_30] : memref<128x8xf32, #tpu.memory_space<vmem>>, vector<128x8xf32>
    %cst_31 = arith.constant dense<0.000000e+00> : vector<128x512xf32>
    %46 = tpu.matmul %45, %44, %cst_31 {dimension_numbers = #tpu.dot_dimension_numbers<[1], [0], [0], [1], [0, 0, 1, 1], [], []>} : vector<128x8xf32>, vector<8x512xf32>, vector<128x512xf32> -> vector<128x512xf32>
    %c2 = arith.constant 2 : index
    %c0_32 = arith.constant 0 : index
    %c0_33 = arith.constant 0 : index
    %47 = vector.load %arg2[%c2, %c0_32, %c0_33] : memref<4x128x1xf32, #tpu.memory_space<vmem>>, vector<1x128x1xf32>
    %48 = vector.shape_cast %47 : vector<1x128x1xf32> to vector<128x1xf32>
    %49 = vector.broadcast %48 : vector<128x1xf32> to vector<128x512xf32>
    %50 = arith.addf %46, %49 : vector<128x512xf32>
    %c0_34 = arith.constant 0 : index
    %c0_35 = arith.constant 0 : index
    %51 = vector.load %arg1[%c0_34, %c0_35] : memref<128x512xf32, #tpu.memory_space<vmem>>, vector<128x512xf32>
    %52 = arith.addf %50, %51 : vector<128x512xf32>
    %cst_36 = arith.constant 0.000000e+00 : f32
    %53 = vector.broadcast %cst_36 : f32 to vector<128x512xf32>
    %54 = arith.subf %53, %52 : vector<128x512xf32>
    %55 = math.exp %54 : vector<128x512xf32>
    %cst_37 = arith.constant 1.000000e+00 : f32
    %56 = vector.broadcast %cst_37 : f32 to vector<128x512xf32>
    %57 = arith.addf %56, %55 : vector<128x512xf32>
    %58 = tpu.reciprocal %57 {approx = true} : vector<128x512xf32> -> vector<128x512xf32>
    %59 = arith.mulf %52, %58 : vector<128x512xf32>
    %c0_38 = arith.constant 0 : index
    %c0_39 = arith.constant 0 : index
    %60 = vector.load %arg4[%c0_38, %c0_39] : memref<8x128xf32, #tpu.memory_space<vmem>>, vector<8x128xf32>
    %cst_40 = arith.constant dense<0.000000e+00> : vector<8x512xf32>
    %61 = tpu.matmul %60, %59, %cst_40 {dimension_numbers = #tpu.dot_dimension_numbers<[1], [0], [0], [1], [0, 0, 1, 1], [], []>} : vector<8x128xf32>, vector<128x512xf32>, vector<8x512xf32> -> vector<8x512xf32>
    %cst_41 = arith.constant 1.21773338 : f32
    %62 = vector.broadcast %cst_41 : f32 to vector<8x512xf32>
    %63 = arith.mulf %62, %44 : vector<8x512xf32>
    %cst_42 = arith.constant -0.666348397 : f32
    %64 = vector.broadcast %cst_42 : f32 to vector<8x512xf32>
    %65 = arith.mulf %64, %61 : vector<8x512xf32>
    %66 = arith.addf %63, %65 : vector<8x512xf32>
    %c0_43 = arith.constant 0 : index
    %c0_44 = arith.constant 0 : index
    %67 = vector.load %arg3[%c0_43, %c0_44] : memref<128x8xf32, #tpu.memory_space<vmem>>, vector<128x8xf32>
    %cst_45 = arith.constant dense<0.000000e+00> : vector<128x512xf32>
    %68 = tpu.matmul %67, %66, %cst_45 {dimension_numbers = #tpu.dot_dimension_numbers<[1], [0], [0], [1], [0, 0, 1, 1], [], []>} : vector<128x8xf32>, vector<8x512xf32>, vector<128x512xf32> -> vector<128x512xf32>
    %c3 = arith.constant 3 : index
    %c0_46 = arith.constant 0 : index
    %c0_47 = arith.constant 0 : index
    %69 = vector.load %arg2[%c3, %c0_46, %c0_47] : memref<4x128x1xf32, #tpu.memory_space<vmem>>, vector<1x128x1xf32>
    %70 = vector.shape_cast %69 : vector<1x128x1xf32> to vector<128x1xf32>
    %71 = vector.broadcast %70 : vector<128x1xf32> to vector<128x512xf32>
    %72 = arith.addf %68, %71 : vector<128x512xf32>
    %c0_48 = arith.constant 0 : index
    %c0_49 = arith.constant 0 : index
    %73 = vector.load %arg1[%c0_48, %c0_49] : memref<128x512xf32, #tpu.memory_space<vmem>>, vector<128x512xf32>
    %74 = arith.addf %72, %73 : vector<128x512xf32>
    %cst_50 = arith.constant 0.000000e+00 : f32
    %75 = vector.broadcast %cst_50 : f32 to vector<128x512xf32>
    %76 = arith.subf %75, %74 : vector<128x512xf32>
    %77 = math.exp %76 : vector<128x512xf32>
    %cst_51 = arith.constant 1.000000e+00 : f32
    %78 = vector.broadcast %cst_51 : f32 to vector<128x512xf32>
    %79 = arith.addf %78, %77 : vector<128x512xf32>
    %80 = tpu.reciprocal %79 {approx = true} : vector<128x512xf32> -> vector<128x512xf32>
    %81 = arith.mulf %74, %80 : vector<128x512xf32>
    %c0_52 = arith.constant 0 : index
    %c0_53 = arith.constant 0 : index
    %82 = vector.load %arg4[%c0_52, %c0_53] : memref<8x128xf32, #tpu.memory_space<vmem>>, vector<8x128xf32>
    %cst_54 = arith.constant dense<0.000000e+00> : vector<8x512xf32>
    %83 = tpu.matmul %82, %81, %cst_54 {dimension_numbers = #tpu.dot_dimension_numbers<[1], [0], [0], [1], [0, 0, 1, 1], [], []>} : vector<8x128xf32>, vector<128x512xf32>, vector<8x512xf32> -> vector<8x512xf32>
    %cst_55 = arith.constant 1.00042522 : f32
    %84 = vector.broadcast %cst_55 : f32 to vector<8x512xf32>
    %85 = arith.mulf %84, %66 : vector<8x512xf32>
    %cst_56 = arith.constant -0.0291671585 : f32
    %86 = vector.broadcast %cst_56 : f32 to vector<8x512xf32>
    %87 = arith.mulf %86, %83 : vector<8x512xf32>
    %88 = arith.addf %85, %87 : vector<8x512xf32>
    %c0_57 = arith.constant 0 : index
    %c0_58 = arith.constant 0 : index
    %89 = vector.load %arg5[%c0_57, %c0_58] : memref<8x512xf32, #tpu.memory_space<vmem>>, vector<8x512xf32>
    tpu.vector_store %arg5[%c0_57, %c0_58], %88 {strides = array<i32>} : memref<8x512xf32, #tpu.memory_space<vmem>>, vector<8x512xf32>,
    return
  }
}

</mosaic_0001>

<bundles_post_ra>
// kernel: tpu_custom_call.1
= control target key start
LH: loop header
LB: loop body
LE: loop exit
PB: predicated region body
PF: predicated region fallthrough
CT: control target
= control target key end

     0   :  { %v5988_v2 = vmov 0   ;;  %v9787_v7 = vmov 0.0   ;;  %vm137_vm0 = vcmask 64512   ;;  %s9781_s0 = inlined_call_operand.vmem [shape: f32[8,512], index: 0, kind: input, shape index: {}]   ;;  %s9782_s1 = inlined_call_operand.vmem [shape: f32[128,512], index: 1, kind: input, shape index: {}]   ;;  %s9783_s2 = inlined_call_operand.vmem [shape: f32[4,128,1], index: 2, kind: input, shape index: {}]   ;;  %s9784_s3 = inlined_call_operand.vmem [shape: f32[128,8], index: 3, kind: input, shape index: {}]   ;;  %s9785_s4 = inlined_call_operand.vmem [shape: f32[8,128], index: 4, kind: input, shape index: {}]   ;;  %s9786_s5 = inlined_call_operand.hbm [shape: f32[8,512], index: 5, kind: output, shape index: {}]  }
   0x1   :  { %v22_v0 = vld [vmem:[%s9781_s0 + $0x8] sm:$0xff]  ;;  %v24_v1 = vld [vmem:[%s9781_s0 + $0x18] sm:$0xff]  ;;  %4692 = vset.pattern.permute.xlu1 %v5988_v2  ;;  %4691 = vset.pattern.permute.xlu0 %v5988_v2  ;;  %v43_v3 = vld [vmem:[%s9783_s2 + $0x10] sm:$0xff] }
   0x2   :  { %v41_v4 = vld [vmem:[%s9783_s2] sm:$0xff]  ;;  %186 = vmatprep.subr.mxu0 %v22_v0  ;;  %347 = vmatprep.subr.mxu1 %v24_v1  ;;  %v23_v6 = vld [vmem:[%s9781_s0 + $0x10] sm:$0xff]  ;;  %v44_v9 = vld [vmem:[%s9783_s2 + $0x18] sm:$0xff] }
   0x3   :  { %v21_v5 = vld [vmem:[%s9781_s0] sm:$0xff]  ;;  %250 = vmatprep.mubr.f32.mxu0 %v9787_v7  ;;  %411 = vmatprep.mubr.f32.mxu1 %v9787_v7  ;;  %v42_v10 = vld [vmem:[%s9783_s2 + $0x8] sm:$0xff]  ;;  %v27_v14 = vld [vmem:[%s9784_s3 + $0x10] sm:$0xff] }
   0x4   :  { %v25_v8 = vld [vmem:[%s9784_s3] sm:$0xff]  ;;  %69 = vperm.xlu1 %4692, %v43_v3   ;;  %59 = vperm.xlu0 %4691, %v41_v4   ;;  %v26_v11 = vld [vmem:[%s9784_s3 + $0x8] sm:$0xff]  ;;  %v48_v15 = vld [vmem:[%s9783_s2 + $0x38] sm:$0xff] }
   0x5   :  { %187 = vmatpush1.msra.mxu0 %v21_v5  ;;  %348 = vmatpush1.msra.mxu1 %v23_v6  ;;  %v46_v12 = vld [vmem:[%s9783_s2 + $0x28] sm:$0xff]  ;;  %v45_v13 = vld [vmem:[%s9783_s2 + $0x20] sm:$0xff]  ;;  %v47_v16 = vld [vmem:[%s9783_s2 + $0x30] sm:$0xff] }
   0x6   :  { %4256 = vmatmul.mubr.msk.f32.vlgmr.msra.gmra.mrb[0].mxu0 %vm137_vm0, %v25_v8  ;;  %4272 = vmatmul.mubr.msk.f32.vlgmr.msra.gmra.mrb[0].mxu1 %vm137_vm0, %v25_v8  ;;  %v28_v17 = vld [vmem:[%s9784_s3 + $0x18] sm:$0xff]  ;;  %v50_v18 = vld [vmem:[%s9783_s2 + $0x48] sm:$0xff]  ;;  %v49_v19 = vld [vmem:[%s9783_s2 + $0x40] sm:$0xff] }
   0x7   :  { %256 = vmatprep.mubr.f32.mxu0 %v9787_v7  ;;  %417 = vmatprep.mubr.f32.mxu1 %v9787_v7  ;;  %v29_v20 = vld [vmem:[%s9784_s3 + $0x20] sm:$0xff]  ;;  %v52_v21 = vld [vmem:[%s9783_s2 + $0x58] sm:$0xff]  ;;  %v51_v22 = vld [vmem:[%s9783_s2 + $0x50] sm:$0xff] }
   0x8   :  { %74 = vperm.xlu1 %4692, %v44_v9   ;;  %64 = vperm.xlu0 %4691, %v42_v10   ;;  %v30_v23 = vld [vmem:[%s9784_s3 + $0x28] sm:$0xff]  ;;  %v53_v25 = vld [vmem:[%s9783_s2 + $0x60] sm:$0xff]  ;;  %v31_v26 = vld [vmem:[%s9784_s3 + $0x30] sm:$0xff] }
   0x9   :  { %v54_v24 = vld [vmem:[%s9783_s2 + $0x68] sm:$0xff] }
   0xa   :  { %4257 = vmatmul.mubr.msk.f32.gmra.mrb[2].mxu0 %vm137_vm0, %v26_v11  ;;  %4273 = vmatmul.mubr.msk.f32.gmra.mrb[2].mxu1 %vm137_vm0, %v26_v11 }
   0xb   :  { %262 = vmatprep.mubr.f32.mxu0 %v9787_v7  ;;  %423 = vmatprep.mubr.f32.mxu1 %v9787_v7 }
   0xc   :  { %84 = vperm.xlu1 %4692, %v46_v12   ;;  %79 = vperm.xlu0 %4691, %v45_v13  }
   0xe   :  { %4258 = vmatmul.mubr.msk.f32.gmra.mrb[4].mxu0 %vm137_vm0, %v27_v14  ;;  %4274 = vmatmul.mubr.msk.f32.gmra.mrb[4].mxu1 %vm137_vm0, %v27_v14 }
   0xf   :  { %268 = vmatprep.mubr.f32.mxu0 %v9787_v7  ;;  %429 = vmatprep.mubr.f32.mxu1 %v9787_v7 }
  0x10   :  { %94 = vperm.xlu1 %4692, %v48_v15   ;;  %89 = vperm.xlu0 %4691, %v47_v16  }
  0x12   :  { %4259 = vmatmul.mubr.msk.f32.gmra.mrb[6].mxu0 %vm137_vm0, %v28_v17  ;;  %4275 = vmatmul.mubr.msk.f32.gmra.mrb[6].mxu1 %vm137_vm0, %v28_v17 }
  0x13   :  { %274 = vmatprep.mubr.f32.mxu0 %v9787_v7  ;;  %435 = vmatprep.mubr.f32.mxu1 %v9787_v7 }
  0x14   :  { %104 = vperm.xlu1 %4692, %v50_v18   ;;  %99 = vperm.xlu0 %4691, %v49_v19  }
  0x16   :  { %4260 = vmatmul.mubr.msk.f32.gmra.mrb[8].mxu0 %vm137_vm0, %v29_v20  ;;  %4276 = vmatmul.mubr.msk.f32.gmra.mrb[8].mxu1 %vm137_vm0, %v29_v20 }
  0x17   :  { %280 = vmatprep.mubr.f32.mxu0 %v9787_v7  ;;  %441 = vmatprep.mubr.f32.mxu1 %v9787_v7 }
  0x18   :  { %114 = vperm.xlu1 %4692, %v52_v21   ;;  %109 = vperm.xlu0 %4691, %v51_v22  }
  0x1a   :  { %4261 = vmatmul.mubr.msk.f32.gmra.mrb[10].mxu0 %vm137_vm0, %v30_v23  ;;  %4277 = vmatmul.mubr.msk.f32.gmra.mrb[10].mxu1 %vm137_vm0, %v30_v23 }
  0x1b   :  { %286 = vmatprep.mubr.f32.mxu0 %v9787_v7  ;;  %447 = vmatprep.mubr.f32.mxu1 %v9787_v7 }
  0x1c   :  { %124 = vperm.xlu1 %4692, %v54_v24   ;;  %119 = vperm.xlu0 %4691, %v53_v25  }
  0x1d   :  { %10 = vsyncpa [#allocation3], 0  ;;  %v56_v27 = vld [vmem:[%s9783_s2 + $0x78] sm:$0xff]  ;;  %v55_v28 = vld [vmem:[%s9783_s2 + $0x70] sm:$0xff]  ;;  %s5990_s13 = smov [#allocation2]  }
  0x1e   :  { %4262 = vmatmul.mubr.msk.f32.gmra.mrb[12].mxu0 %vm137_vm0, %v31_v26  ;;  %4278 = vmatmul.mubr.msk.f32.gmra.mrb[12].mxu1 %vm137_vm0, %v31_v26  ;;  %v32_v29 = vld [vmem:[%s9784_s3 + $0x38] sm:$0xff]  ;;  %v4289_v30 = vld [vmem:[%s9783_s2 + $0x88] sm:$0xff]  ;;  %v4288_v31 = vld [vmem:[%s9783_s2 + $0x80] sm:$0xff]  ;;  %s4248_s14 = sshll.u32 %s5990_s13, 4  ;;  %s4249_s14 = int_to_ptr.vmem [resolvable:$true] %s4248_s14 }
  0x1f   :  { %292 = vmatprep.mubr.f32.mxu0 %v9787_v7  ;;  %453 = vmatprep.mubr.f32.mxu1 %v9787_v7  ;;  %v33_v32 = vld [vmem:[%s9784_s3 + $0x40] sm:$0xff]  ;;  %v4291_v33 = vld [vmem:[%s9783_s2 + $0x98] sm:$0xff]  ;;  %v4290_v34 = vld [vmem:[%s9783_s2 + $0x90] sm:$0xff]  ;;  %p5969_p1 = scmp.lt.s32.totalorder %s4249_s14, %s4249_s14 }
  0x20   :  { %134 = vperm.xlu1 %4692, %v56_v27   ;;  %129 = vperm.xlu0 %4691, %v55_v28   ;;  %v34_v35 = vld [vmem:[%s9784_s3 + $0x48] sm:$0xff]  ;;  %v4292_v37 = vld [vmem:[%s9783_s2 + $0xa0] sm:$0xff]  ;;  %v35_v38 = vld [vmem:[%s9784_s3 + $0x50] sm:$0xff] }
  0x21   :  { %v4293_v36 = vld [vmem:[%s9783_s2 + $0xa8] sm:$0xff]  ;;  %v4295_v39 = vld [vmem:[%s9783_s2 + $0xb8] sm:$0xff]  ;;  %v4294_v40 = vld [vmem:[%s9783_s2 + $0xb0] sm:$0xff] }
  0x22   :  { %4263 = vmatmul.mubr.msk.f32.gmra.mrb[14].mxu0 %vm137_vm0, %v32_v29  ;;  %4279 = vmatmul.mubr.msk.f32.gmra.mrb[14].mxu1 %vm137_vm0, %v32_v29  ;;  %v36_v41 = vld [vmem:[%s9784_s3 + $0x58] sm:$0xff]  ;;  %v4297_v42 = vld [vmem:[%s9783_s2 + $0xc8] sm:$0xff]  ;;  %v4296_v43 = vld [vmem:[%s9783_s2 + $0xc0] sm:$0xff] }
  0x23   :  { %298 = vmatprep.mubr.f32.mxu0 %v9787_v7  ;;  %459 = vmatprep.mubr.f32.mxu1 %v9787_v7  ;;  %v37_v44 = vld [vmem:[%s9784_s3 + $0x60] sm:$0xff]  ;;  %v4299_v45 = vld [vmem:[%s9783_s2 + $0xd8] sm:$0xff]  ;;  %v4298_v46 = vld [vmem:[%s9783_s2 + $0xd0] sm:$0xff] }
  0x24   :  { %1199 = vperm.xlu1 %4692, %v4289_v30   ;;  %1194 = vperm.xlu0 %4691, %v4288_v31   ;;  %v38_v47 = vld [vmem:[%s9784_s3 + $0x68] sm:$0xff]  ;;  %v4300_v49 = vld [vmem:[%s9783_s2 + $0xe0] sm:$0xff]  ;;  %v39_v50 = vld [vmem:[%s9784_s3 + $0x70] sm:$0xff] }
  0x25   :  { %v4301_v48 = vld [vmem:[%s9783_s2 + $0xe8] sm:$0xff]  ;;  %v4303_v51 = vld [vmem:[%s9783_s2 + $0xf8] sm:$0xff]  ;;  %v4302_v52 = vld [vmem:[%s9783_s2 + $0xf0] sm:$0xff] }
  0x26   :  { %4264 = vmatmul.mubr.msk.f32.gmra.mrb[16].mxu0 %vm137_vm0, %v33_v32  ;;  %4280 = vmatmul.mubr.msk.f32.gmra.mrb[16].mxu1 %vm137_vm0, %v33_v32  ;;  %v40_v53 = vld [vmem:[%s9784_s3 + $0x78] sm:$0xff]  ;;  %v4337_v54 = vld [vmem:[%s9783_s2 + $0x108] sm:$0xff]  ;;  %v4336_v55 = vld [vmem:[%s9783_s2 + $0x100] sm:$0xff] }
  0x27   :  { %304 = vmatprep.mubr.f32.mxu0 %v9787_v7  ;;  %465 = vmatprep.mubr.f32.mxu1 %v9787_v7  ;;  %v4339_v56 = vld [vmem:[%s9783_s2 + $0x118] sm:$0xff]  ;;  %v4338_v57 = vld [vmem:[%s9783_s2 + $0x110] sm:$0xff]  ;;  %v4341_v58 = vld [vmem:[%s9783_s2 + $0x128] sm:$0xff] }
  0x28   :  { %1209 = vperm.xlu1 %4692, %v4291_v33   ;;  %1204 = vperm.xlu0 %4691, %v4290_v34   ;;  %v4340_v59 = vld [vmem:[%s9783_s2 + $0x120] sm:$0xff]  ;;  %v4343_v60 = vld [vmem:[%s9783_s2 + $0x138] sm:$0xff]  ;;  %v4342_v61 = vld [vmem:[%s9783_s2 + $0x130] sm:$0xff] }
  0x29   :  { %v4345_v62 = vld [vmem:[%s9783_s2 + $0x148] sm:$0xff]  ;;  %v4344_v63 = vld [vmem:[%s9783_s2 + $0x140] sm:$0xff]  ;;  %v4347_v0 = vld [vmem:[%s9783_s2 + $0x158] sm:$0xff] }
  0x2a   :  { %4265 = vmatmul.mubr.msk.f32.gmra.mrb[18].mxu0 %vm137_vm0, %v34_v35  ;;  %4281 = vmatmul.mubr.msk.f32.gmra.mrb[18].mxu1 %vm137_vm0, %v34_v35  ;;  %v4346_v1 = vld [vmem:[%s9783_s2 + $0x150] sm:$0xff]  ;;  %v4349_v2 = vld [vmem:[%s9783_s2 + $0x168] sm:$0xff]  ;;  %v4348_v3 = vld [vmem:[%s9783_s2 + $0x160] sm:$0xff] }
  0x2b   :  { %310 = vmatprep.mubr.f32.mxu0 %v9787_v7  ;;  %471 = vmatprep.mubr.f32.mxu1 %v9787_v7  ;;  %v4351_v4 = vld [vmem:[%s9783_s2 + $0x178] sm:$0xff]  ;;  %v4350_v5 = vld [vmem:[%s9783_s2 + $0x170] sm:$0xff]  ;;  %v4385_v6 = vld [vmem:[%s9783_s2 + $0x188] sm:$0xff] }
  0x2c   :  { %1219 = vperm.xlu1 %4692, %v4293_v36   ;;  %1214 = vperm.xlu0 %4691, %v4292_v37   ;;  %v4384_v8 = vld [vmem:[%s9783_s2 + $0x180] sm:$0xff]  ;;  %v4387_v9 = vld [vmem:[%s9783_s2 + $0x198] sm:$0xff]  ;;  %v4386_v10 = vld [vmem:[%s9783_s2 + $0x190] sm:$0xff] }
  0x2d   :  { %v4389_v11 = vld [vmem:[%s9783_s2 + $0x1a8] sm:$0xff]  ;;  %v4388_v12 = vld [vmem:[%s9783_s2 + $0x1a0] sm:$0xff]  ;;  %v4391_v13 = vld [vmem:[%s9783_s2 + $0x1b8] sm:$0xff] }
  0x2e   :  { %4266 = vmatmul.mubr.msk.f32.gmra.mrb[20].mxu0 %vm137_vm0, %v35_v38  ;;  %4282 = vmatmul.mubr.msk.f32.gmra.mrb[20].mxu1 %vm137_vm0, %v35_v38  ;;  %v4390_v14 = vld [vmem:[%s9783_s2 + $0x1b0] sm:$0xff]  ;;  %v4393_v15 = vld [vmem:[%s9783_s2 + $0x1c8] sm:$0xff]  ;;  %v4392_v16 = vld [vmem:[%s9783_s2 + $0x1c0] sm:$0xff] }
  0x2f   :  { %316 = vmatprep.mubr.f32.mxu0 %v9787_v7  ;;  %477 = vmatprep.mubr.f32.mxu1 %v9787_v7  ;;  %v4395_v17 = vld [vmem:[%s9783_s2 + $0x1d8] sm:$0xff]  ;;  %v4394_v18 = vld [vmem:[%s9783_s2 + $0x1d0] sm:$0xff]  ;;  %v4397_v19 = vld [vmem:[%s9783_s2 + $0x1e8] sm:$0xff] }
  0x30   :  { %1229 = vperm.xlu1 %4692, %v4295_v39   ;;  %1224 = vperm.xlu0 %4691, %v4294_v40   ;;  %v4396_v20 = vld [vmem:[%s9783_s2 + $0x1e0] sm:$0xff]  ;;  %v4399_v21 = vld [vmem:[%s9783_s2 + $0x1f8] sm:$0xff]  ;;  %v4398_v22 = vld [vmem:[%s9783_s2 + $0x1f0] sm:$0xff] }
  0x31   :  { %v508_v25 = vld [vmem:[%s9782_s1] sm:$0xff]  ;;  %v510_v27 = vld [vmem:[%s9782_s1 + $0x10] sm:$0xff]  ;;  %v509_v31 = vld [vmem:[%s9782_s1 + $0x8] sm:$0xff] }
  0x32   :  { %4267 = vmatmul.mubr.msk.f32.gmra.mrb[22].mxu0 %vm137_vm0, %v36_v41  ;;  %4283 = vmatmul.mubr.msk.f32.gmra.mrb[22].mxu1 %vm137_vm0, %v36_v41  ;;  %v511_v33 = vld [vmem:[%s9782_s1 + $0x18] sm:$0xff] }
  0x33   :  { %322 = vmatprep.mubr.f32.mxu0 %v9787_v7  ;;  %483 = vmatprep.mubr.f32.mxu1 %v9787_v7 }
  0x34   :  { %1239 = vperm.xlu1 %4692, %v4297_v42   ;;  %1234 = vperm.xlu0 %4691, %v4296_v43   ;;  %v512_v43 = vld [vmem:[%s9782_s1 + $0x20] sm:$0xff] }
  0x36   :  { %4268 = vmatmul.mubr.msk.f32.gmra.mrb[24].mxu0 %vm137_vm0, %v37_v44  ;;  %4284 = vmatmul.mubr.msk.f32.gmra.mrb[24].mxu1 %vm137_vm0, %v37_v44 }
  0x37   :  { %328 = vmatprep.mubr.f32.mxu0 %v9787_v7  ;;  %489 = vmatprep.mubr.f32.mxu1 %v9787_v7 }
  0x38   :  { %1249 = vperm.xlu1 %4692, %v4299_v45   ;;  %1244 = vperm.xlu0 %4691, %v4298_v46   ;;  %v514_v45 = vld [vmem:[%s9782_s1 + $0x30] sm:$0xff] }
  0x3a   :  { %4269 = vmatmul.mubr.msk.f32.gmra.mrb[26].mxu0 %vm137_vm0, %v38_v47  ;;  %4285 = vmatmul.mubr.msk.f32.gmra.mrb[26].mxu1 %vm137_vm0, %v38_v47 }
  0x3b   :  { %334 = vmatprep.mubr.f32.mxu0 %v9787_v7  ;;  %495 = vmatprep.mubr.f32.mxu1 %v9787_v7 }
  0x3c   :  { %1259 = vperm.xlu1 %4692, %v4301_v48   ;;  %1254 = vperm.xlu0 %4691, %v4300_v49  }
  0x3e   :  { %4270 = vmatmul.mubr.msk.f32.gmra.mrb[28].mxu0 %vm137_vm0, %v39_v50  ;;  %4286 = vmatmul.mubr.msk.f32.gmra.mrb[28].mxu1 %vm137_vm0, %v39_v50 }
  0x3f   :  { %340 = vmatprep.mubr.f32.mxu0 %v9787_v7  ;;  %501 = vmatprep.mubr.f32.mxu1 %v9787_v7 }
  0x40   :  { %1269 = vperm.xlu1 %4692, %v4303_v51   ;;  %1264 = vperm.xlu0 %4691, %v4302_v52   ;;  %v513_v51 = vld [vmem:[%s9782_s1 + $0x28] sm:$0xff] }
  0x42   :  { %4271 = vmatmul.mubr.msk.f32.gmra.mrb[30].mxu0 %vm137_vm0, %v40_v53  ;;  %4287 = vmatmul.mubr.msk.f32.gmra.mrb[30].mxu1 %vm137_vm0, %v40_v53  ;;  %v515_v53 = vld [vmem:[%s9782_s1 + $0x38] sm:$0xff] }
  0x43   :  { %1085 = vmatprep.mubr.f32.mxu0 %v9787_v7  ;;  %1156 = vmatprep.mubr.f32.mxu1 %v9787_v7 }
  0x44   :  { %2220 = vperm.xlu1 %4692, %v4337_v54   ;;  %2215 = vperm.xlu0 %4691, %v4336_v55  }
  0x48   :  { %2230 = vperm.xlu1 %4692, %v4339_v56   ;;  %2225 = vperm.xlu0 %4691, %v4338_v57  }
  0x4c   :  { %2240 = vperm.xlu1 %4692, %v4341_v58   ;;  %2235 = vperm.xlu0 %4691, %v4340_v59  }
  0x50   :  { %2250 = vperm.xlu1 %4692, %v4343_v60   ;;  %2245 = vperm.xlu0 %4691, %v4342_v61  }
  0x54   :  { %2260 = vperm.xlu1 %4692, %v4345_v62   ;;  %2255 = vperm.xlu0 %4691, %v4344_v63   ;;  %v516_v62 = vld [vmem:[%s9782_s1 + $0x40] sm:$0xff] }
  0x58   :  { %2270 = vperm.xlu1 %4692, %v4347_v0   ;;  %2265 = vperm.xlu0 %4691, %v4346_v1  }
  0x5c   :  { %2280 = vperm.xlu1 %4692, %v4349_v2   ;;  %2275 = vperm.xlu0 %4691, %v4348_v3  }
  0x60   :  { %2290 = vperm.xlu1 %4692, %v4351_v4   ;;  %2285 = vperm.xlu0 %4691, %v4350_v5  }
  0x64   :  { %3241 = vperm.xlu1 %4692, %v4385_v6   ;;  %3236 = vperm.xlu0 %4691, %v4384_v8  }
  0x68   :  { %3251 = vperm.xlu1 %4692, %v4387_v9   ;;  %3246 = vperm.xlu0 %4691, %v4386_v10   ;;  %v518_v9 = vld [vmem:[%s9782_s1 + $0x50] sm:$0xff] }
  0x6c   :  { %3261 = vperm.xlu1 %4692, %v4389_v11   ;;  %3256 = vperm.xlu0 %4691, %v4388_v12  }
  0x70   :  { %3271 = vperm.xlu1 %4692, %v4391_v13   ;;  %3266 = vperm.xlu0 %4691, %v4390_v14  }
  0x74   :  { %3281 = vperm.xlu1 %4692, %v4393_v15   ;;  %3276 = vperm.xlu0 %4691, %v4392_v16  }
  0x78   :  { %3291 = vperm.xlu1 %4692, %v4395_v17   ;;  %3286 = vperm.xlu0 %4691, %v4394_v18  }
  0x7c   :  { %3301 = vperm.xlu1 %4692, %v4397_v19   ;;  %3296 = vperm.xlu0 %4691, %v4396_v20   ;;  %v517_v19 = vld [vmem:[%s9782_s1 + $0x48] sm:$0xff]  ;;  %v519_v20 = vld [vmem:[%s9782_s1 + $0x58] sm:$0xff] }
  0x80   :  { %3311 = vperm.xlu1 %4692, %v4399_v21   ;;  %3306 = vperm.xlu0 %4691, %v4398_v22  }
  0x83   :  { %v60_v23 = vpop.permute.xlu0 %59  ;;  %v70_v36 = vpop.permute.xlu1 %69 }
  0x87   :  { %v65_v37 = vpop.permute.xlu0 %64  ;;  %v75_v15 = vpop.permute.xlu1 %74 }
  0xd9   :  { %v252_v24 = vpop.f32.mrb[0].mxu0  ;;  %v413_v26 = vpop.f32.mrb[0].mxu1 }
  0xda   :  { %v253_v28 = vadd.f32 %v252_v24, %v60_v23  ;;  %v414_v29 = vadd.f32 %v413_v26, %v60_v23  ;;  %v254_v30 = vpop.f32.mrb[1].mxu0  ;;  %v415_v32 = vpop.f32.mrb[1].mxu1 }
  0xdb   :  { %v255_v34 = vadd.f32 %v254_v30, %v60_v23  ;;  %v416_v35 = vadd.f32 %v415_v32, %v60_v23  ;;  %v522_v30 = vld [vmem:[%s9782_s1 + $0x70] sm:$0xff] }
  0xdc   :  { %v6351_v38 = vadd.f32 %v508_v25, %v253_v28  ;;  %v6353_v39 = vadd.f32 %v510_v27, %v414_v29  ;;  %v520_v29 = vld [vmem:[%s9782_s1 + $0x60] sm:$0xff] }
  0xdd   :  { %v6355_v40 = vadd.f32 %v509_v31, %v255_v34  ;;  %v6357_v41 = vadd.f32 %v511_v33, %v416_v35  ;;  %v258_v42 = vpop.f32.mrb[2].mxu0  ;;  %v419_v44 = vpop.f32.mrb[2].mxu1 }
  0xde   :  { %v636_v46 = vsub.f32 0.0, %v6351_v38  ;;  %v638_v47 = vsub.f32 0.0, %v6353_v39  ;;  %v259_v48 = vadd.f32 %v258_v42, %v65_v37  ;;  %v420_v49 = vadd.f32 %v419_v44, %v65_v37  ;;  %v260_v50 = vpop.f32.mrb[3].mxu0  ;;  %v421_v52 = vpop.f32.mrb[3].mxu1 }
  0xdf   :  { %v637_v54 = vsub.f32 0.0, %v6355_v40  ;;  %v639_v55 = vsub.f32 0.0, %v6357_v41  ;;  %v261_v56 = vadd.f32 %v260_v50, %v65_v37  ;;  %v422_v57 = vadd.f32 %v421_v52, %v65_v37 }
  0xe0   :  { %v700_v58 = vmul.f32 1.442695, %v636_v46  ;;  %v704_v59 = vmul.f32 1.442695, %v638_v47  ;;  %v6375_v60 = vadd.f32 %v512_v43, %v259_v48  ;;  %v6377_v61 = vadd.f32 %v514_v45, %v420_v49 }
  0xe1   :  { %v702_v63 = vmul.f32 1.442695, %v637_v54  ;;  %v706_v0 = vmul.f32 1.442695, %v639_v55  ;;  %v6382_v1 = vadd.f32 %v513_v51, %v261_v56  ;;  %v6384_v2 = vadd.f32 %v515_v53, %v422_v57  ;;  %v264_v3 = vpop.f32.mrb[4].mxu0  ;;  %v425_v4 = vpop.f32.mrb[4].mxu1 }
  0xe2   :  { %4693 = vpow2.f32 %v700_v58  ;;  %v640_v5 = vsub.f32 0.0, %v6375_v60  ;;  %v642_v6 = vsub.f32 0.0, %v6377_v61  ;;  %v265_v8 = vadd.f32 %v264_v3, %v70_v36  ;;  %v266_v10 = vpop.f32.mrb[5].mxu0  ;;  %v427_v11 = vpop.f32.mrb[5].mxu1  ;;  %v521_v51 = vld [vmem:[%s9782_s1 + $0x68] sm:$0xff] }
  0xe3   :  { %4695 = vpow2.f32 %v704_v59  ;;  %v641_v12 = vsub.f32 0.0, %v6382_v1  ;;  %v643_v13 = vsub.f32 0.0, %v6384_v2  ;;  %v426_v14 = vadd.f32 %v425_v4, %v70_v36  ;;  %v80_v56 = vpop.permute.xlu0 %79 }
  0xe4   :  { %4697 = vpow2.f32 %v702_v63  ;;  %v708_v16 = vmul.f32 1.442695, %v640_v5  ;;  %v712_v17 = vmul.f32 1.442695, %v642_v6  ;;  %v6393_v18 = vadd.f32 %v516_v62, %v265_v8  ;;  %v523_v62 = vld [vmem:[%s9782_s1 + $0x78] sm:$0xff] }
  0xe5   :  { %4699 = vpow2.f32 %v706_v0  ;;  %v710_v21 = vmul.f32 1.442695, %v641_v12  ;;  %v714_v22 = vmul.f32 1.442695, %v643_v13  ;;  %v6401_v23 = vadd.f32 %v518_v9, %v426_v14  ;;  %v270_v24 = vpop.f32.mrb[6].mxu0  ;;  %v431_v25 = vpop.f32.mrb[6].mxu1 }
  0xe6   :  { %4701 = vpow2.f32 %v708_v16  ;;  %v644_v26 = vsub.f32 0.0, %v6393_v18  ;;  %v267_v27 = vadd.f32 %v266_v10, %v70_v36  ;;  %v428_v28 = vadd.f32 %v427_v11, %v70_v36  ;;  %v272_v31 = vpop.f32.mrb[7].mxu0  ;;  %v433_v32 = vpop.f32.mrb[7].mxu1  ;;  %v524_v10 = vld [vmem:[%s9782_s1 + $0x80] sm:$0xff] }
  0xe7   :  { %4703 = vpow2.f32 %v712_v17  ;;  %v646_v33 = vsub.f32 0.0, %v6401_v23  ;;  %v271_v34 = vadd.f32 %v270_v24, %v75_v15  ;;  %v432_v35 = vadd.f32 %v431_v25, %v75_v15  ;;  %v526_v17 = vld [vmem:[%s9782_s1 + $0x90] sm:$0xff] }
  0xe8   :  { %4705 = vpow2.f32 %v710_v21  ;;  %v716_v37 = vmul.f32 1.442695, %v644_v26  ;;  %v6411_v42 = vadd.f32 %v517_v19, %v267_v27  ;;  %v6413_v36 = vadd.f32 %v519_v20, %v428_v28 }
  0xe9   :  { %4707 = vpow2.f32 %v714_v22  ;;  %v720_v43 = vmul.f32 1.442695, %v646_v33  ;;  %v6415_v44 = vadd.f32 %v520_v29, %v271_v34  ;;  %v6417_v45 = vadd.f32 %v522_v30, %v432_v35  ;;  %v276_v46 = vpop.f32.mrb[8].mxu0  ;;  %v437_v47 = vpop.f32.mrb[8].mxu1  ;;  %v525_v29 = vld [vmem:[%s9782_s1 + $0x88] sm:$0xff] }
  0xea   :  { %4709 = vpow2.f32 %v716_v37  ;;  %v645_v48 = vsub.f32 0.0, %v6411_v42  ;;  %v647_v49 = vsub.f32 0.0, %v6413_v36  ;;  %v273_v50 = vadd.f32 %v272_v31, %v75_v15  ;;  %v278_v52 = vpop.f32.mrb[9].mxu0  ;;  %v439_v53 = vpop.f32.mrb[9].mxu1  ;;  %v527_v37 = vld [vmem:[%s9782_s1 + $0x98] sm:$0xff] }
  0xeb   :  { %4711 = vpow2.f32 %v720_v43  ;;  %v434_v54 = vadd.f32 %v433_v32, %v75_v15  ;;  %v648_v58 = vsub.f32 0.0, %v6415_v44  ;;  %v650_v59 = vsub.f32 0.0, %v6417_v45 }
  0xec   :  { %v4694_v55 = vpop.eup %4693  ;;  %v718_v57 = vmul.f32 1.442695, %v645_v48  ;;  %v6429_v3 = vadd.f32 %v521_v51, %v273_v50  ;;  %v277_v4 = vadd.f32 %v276_v46, %v80_v56  ;;  %v6431_v9 = vmul.f32 1.442695, %v647_v49  ;;  %v85_v48 = vpop.permute.xlu1 %84 }
  0xed   :  { %v4696_v63 = vpop.eup %4695  ;;  %v828_v0 = vadd.f32 1.0, %v4694_v55  ;;  %v282_v5 = vpop.f32.mrb[10].mxu0  ;;  %v6436_v15 = vadd.f32 %v523_v62, %v434_v54  ;;  %v438_v16 = vadd.f32 %v437_v47, %v80_v56  ;;  %v724_v22 = vmul.f32 1.442695, %v648_v58  ;;  %v528_v54 = vld [vmem:[%s9782_s1 + $0xa0] sm:$0xff] }
  0xee   :  { %v4698_v6 = vpop.eup %4697  ;;  %v830_v8 = vadd.f32 1.0, %v4696_v63  ;;  %4713 = vpow2.f32 %v718_v57  ;;  %v443_v11 = vpop.f32.mrb[10].mxu1  ;;  %v6441_v24 = vmul.f32 1.442695, %v650_v59  ;;  %v649_v27 = vsub.f32 0.0, %v6429_v3 }
  0xef   :  { %v284_v12 = vpop.f32.mrb[11].mxu0  ;;  %v4700_v13 = vpop.eup %4699  ;;  %4715 = vrcp.f32 %v828_v0  ;;  %v829_v14 = vadd.f32 1.0, %v4698_v6  ;;  %v6444_v28 = vadd.f32 %v524_v10, %v277_v4  ;;  %v6453_v34 = vadd.f32 %v526_v17, %v438_v16 }
  0xf0   :  { %v445_v19 = vpop.f32.mrb[11].mxu1  ;;  %v4702_v20 = vpop.eup %4701  ;;  %4717 = vrcp.f32 %v830_v8  ;;  %v831_v21 = vadd.f32 1.0, %v4700_v13  ;;  %v279_v35 = vadd.f32 %v278_v52, %v80_v56  ;;  %v651_v50 = vsub.f32 0.0, %v6436_v15 }
  0xf1   :  { %v4704_v25 = vpop.eup %4703  ;;  %4719 = vrcp.f32 %v829_v14  ;;  %v832_v26 = vadd.f32 1.0, %v4702_v20  ;;  %v6449_v30 = vpop.f32.mrb[12].mxu0  ;;  %v440_v51 = vadd.f32 %v439_v53, %v80_v56  ;;  %v283_v58 = vadd.f32 %v282_v5, %v85_v48  ;;  %v530_v5 = vld [vmem:[%s9782_s1 + $0xb0] sm:$0xff]  ;;  %v529_v20 = vld [vmem:[%s9782_s1 + $0xa8] sm:$0xff] }
  0xf2   :  { %v6451_v31 = vpop.f32.mrb[12].mxu1  ;;  %v4706_v32 = vpop.eup %4705  ;;  %4721 = vrcp.f32 %v831_v21  ;;  %v834_v33 = vadd.f32 1.0, %v4704_v25  ;;  %v6466_v57 = vadd.f32 %v525_v29, %v279_v35  ;;  %v652_v63 = vsub.f32 0.0, %v6444_v28 }
  0xf3   :  { %v6458_v43 = vpop.f32.mrb[13].mxu0  ;;  %v6460_v46 = vpop.f32.mrb[13].mxu1  ;;  %4723 = vrcp.f32 %v832_v26  ;;  %v833_v49 = vadd.f32 1.0, %v4706_v32  ;;  %v6469_v0 = vadd.f32 %v527_v37, %v440_v51  ;;  %v654_v6 = vsub.f32 0.0, %v6453_v34  ;;  %v531_v32 = vld [vmem:[%s9782_s1 + $0xb8] sm:$0xff] }
  0xf4   :  { %v4708_v47 = vpop.eup %4707  ;;  %4725 = vrcp.f32 %v834_v33  ;;  %v6476_v8 = vadd.f32 %v528_v54, %v283_v58  ;;  %v653_v14 = vsub.f32 0.0, %v6466_v57  ;;  %v444_v16 = vadd.f32 %v443_v11, %v85_v48 }
  0xf5   :  { %v4710_v52 = vpop.eup %4709  ;;  %v835_v55 = vadd.f32 1.0, %v4708_v47  ;;  %4727 = vrcp.f32 %v833_v49  ;;  %v6471_v4 = vpop.f32.mrb[14].mxu0  ;;  %v285_v17 = vadd.f32 %v284_v12, %v85_v48  ;;  %v726_v25 = vmul.f32 1.442695, %v649_v27 }
  0xf6   :  { %v4712_v59 = vpop.eup %4711  ;;  %v836_v62 = vadd.f32 1.0, %v4710_v52  ;;  %v6473_v53 = vpop.f32.mrb[14].mxu1  ;;  %v655_v26 = vsub.f32 0.0, %v6469_v0  ;;  %v446_v29 = vadd.f32 %v445_v19, %v85_v48  ;;  %v656_v11 = vsub.f32 0.0, %v6476_v8 }
  0xf7   :  { %4729 = vrcp.f32 %v835_v55  ;;  %v838_v56 = vadd.f32 1.0, %v4712_v59  ;;  %v6481_v10 = vpop.f32.mrb[15].mxu0  ;;  %v6483_v13 = vpop.f32.mrb[15].mxu1  ;;  %v6495_v12 = vadd.f32 %v530_v5, %v444_v16  ;;  %v730_v49 = vmul.f32 1.442695, %v651_v50 }
  0xf8   :  { %4731 = vrcp.f32 %v836_v62  ;;  %v4714_v21 = vpop.eup %4713  ;;  %v732_v19 = vmul.f32 1.442695, %v652_v63  ;;  %v6501_v48 = vadd.f32 %v529_v20, %v285_v17  ;;  %v736_v55 = vmul.f32 1.442695, %v654_v6  ;;  %v532_v62 = vld [vmem:[%s9782_s1 + $0xc0] sm:$0xff] }
  0xf9   :  { %4733 = vrcp.f32 %v838_v56  ;;  %v4716_v33 = vpop.eup %4715  ;;  %v837_v35 = vadd.f32 1.0, %v4714_v21  ;;  %v6497_v37 = vpop.f32.mrb[16].mxu0  ;;  %v734_v58 = vmul.f32 1.442695, %v653_v14  ;;  %v6507_v59 = vadd.f32 %v531_v32, %v446_v29 }
  0xfa   :  { %4735 = vpow2.f32 %v6431_v9  ;;  %v6499_v47 = vpop.f32.mrb[16].mxu1  ;;  %v4718_v27 = vpop.eup %4717  ;;  %v738_v50 = vmul.f32 1.442695, %v655_v26  ;;  %v658_v63 = vsub.f32 0.0, %v6495_v12  ;;  %v6516_v16 = vmul.f32 %v4716_v33, %v6351_v38  ;;  %v534_v38 = vld [vmem:[%s9782_s1 + $0xd0] sm:$0xff] }
  0xfb   :  { %4737 = vpow2.f32 %v724_v22  ;;  %v6503_v51 = vpop.f32.mrb[17].mxu0  ;;  %v6505_v54 = vpop.f32.mrb[17].mxu1  ;;  %9846 = vst [vmem:[#allocation5_spill] sm:$0xff] %v6507_v59  ;;  %v740_v6 = vmul.f32 1.442695, %v656_v11  ;;  %v657_v14 = vsub.f32 0.0, %v6501_v48 }
  0xfc   :  { %v4720_v52 = vpop.eup %4719  ;;  %v90_v9 = vpop.permute.xlu0 %89  ;;  %4739 = vrcp.f32 %v837_v35 }
  0xfd   :  { %v4722_v22 = vpop.eup %4721  ;;  %4741 = vpow2.f32 %v6441_v24  ;;  %v289_v56 = vadd.f32 %v6449_v30, %v90_v9  ;;  %v6519_v17 = vpop.f32.mrb[18].mxu0  ;;  %v6524_v24 = vmul.f32 %v4718_v27, %v6353_v39  ;;  %v659_v39 = vsub.f32 0.0, %v6507_v59  ;;  %v535_v27 = vld [vmem:[%s9782_s1 + $0xd8] sm:$0xff] }
  0xfe   :  { %v4724_v5 = vpop.eup %4723  ;;  %4743 = vpow2.f32 %v726_v25  ;;  %v6521_v20 = vpop.f32.mrb[18].mxu1  ;;  %v6544_v11 = vmul.f32 %v4720_v52, %v6355_v40  ;;  %v6557_v40 = vmul.f32 %v4722_v22, %v6357_v41  ;;  %v533_v41 = vld [vmem:[%s9782_s1 + $0xc8] sm:$0xff]  ;;  %v452_v22 = vadd.f32 %v6460_v46, %v90_v9  ;;  %v536_v46 = vld [vmem:[%s9782_s1 + $0xe0] sm:$0xff] }
  0xff   :  { %v4726_v21 = vpop.eup %4725  ;;  %9847 = vst [vmem:[#allocation6_spill] sm:$0xff] %v6524_v24  ;;  %v6527_v26 = vmul.f32 %v4724_v5, %v6375_v60  ;;  %4745 = vpow2.f32 %v730_v49  ;;  %v6529_v30 = vadd.f32 %v532_v62, %v289_v56  ;;  %v6534_v25 = vpop.f32.mrb[19].mxu0  ;;  %v450_v60 = vadd.f32 %v6451_v31, %v90_v9 }
 0x100   :  { %v6536_v29 = vpop.f32.mrb[19].mxu1  ;;  %v4728_v32 = vpop.eup %4727  ;;  %v6539_v33 = vmul.f32 %v4726_v21, %v6377_v61  ;;  %4747 = vpow2.f32 %v732_v19  ;;  %v744_v49 = vmul.f32 1.442695, %v658_v63  ;;  %v742_v61 = vmul.f32 1.442695, %v657_v14 }
 0x101   :  { %9848 = vst [vmem:[#allocation7_spill] sm:$0xff] %v6529_v30  ;;  %v4730_v35 = vpop.eup %4729  ;;  %4749 = vpow2.f32 %v736_v55  ;;  %v6550_v19 = vadd.f32 %v534_v38, %v450_v60  ;;  %v6552_v5 = vpop.f32.mrb[20].mxu0  ;;  %v660_v52 = vsub.f32 0.0, %v6529_v30  ;;  %v291_v55 = vadd.f32 %v6458_v43, %v90_v9 }
 0x102   :  { %v4732_v62 = vpop.eup %4731  ;;  %4751 = vpow2.f32 %v734_v58  ;;  %v6554_v31 = vpop.f32.mrb[20].mxu1  ;;  %v6566_v38 = vmul.f32 %v4728_v32, %v6382_v1  ;;  %v746_v60 = vmul.f32 1.442695, %v659_v39  ;;  %v6604_v30 = vadd.f32 %v535_v27, %v452_v22 }
 0x103   :  { %9849 = vst [vmem:[#allocation8_spill] sm:$0xff] %v6550_v19  ;;  %v4734_v21 = vpop.eup %4733  ;;  %4753 = vpow2.f32 %v738_v50  ;;  %v6561_v63 = vpop.f32.mrb[21].mxu0  ;;  %v662_v43 = vsub.f32 0.0, %v6550_v19  ;;  %v6581_v39 = vmul.f32 %v4732_v62, %v6393_v18  ;;  %v538_v18 = vld [vmem:[%s9782_s1 + $0xf0] sm:$0xff] }
 0x104   :  { %v6563_v7 = vpop.f32.mrb[21].mxu1  ;;  %v4736_v58 = vpop.eup %4735  ;;  %4755 = vpow2.f32 %v740_v6  ;;  %v6578_v6 = vmul.f32 %v4730_v35, %v6384_v2  ;;  %v6593_v2 = vmul.f32 1.442695, %v660_v52  ;;  %v6595_v35 = vadd.f32 %v533_v41, %v291_v55  ;;  %9853 = vst [vmem:[#allocation12_spill] sm:$0xff] %v6604_v30 }
 0x105   :  { %v95_v14 = vpop.permute.xlu1 %94  ;;  %v4738_v50 = vpop.eup %4737  ;;  %v839_v56 = vadd.f32 1.0, %v4736_v58  ;;  %4757 = vpow2.f32 %v744_v49  ;;  %v6607_v52 = vmul.f32 1.442695, %v662_v43 }
 0x106   :  { %v295_v1 = vadd.f32 %v6471_v4, %v95_v14  ;;  %v4740_v32 = vpop.eup %4739  ;;  %v840_v59 = vadd.f32 1.0, %v4738_v50  ;;  %4759 = vpow2.f32 %v742_v61  ;;  %v6586_v9 = vpop.f32.mrb[22].mxu0  ;;  %v6591_v4 = vmul.f32 %v4734_v21, %v6401_v23  ;;  %9850 = vst [vmem:[#allocation9_spill] sm:$0xff] %v6595_v35 }
 0x107   :  { %v6588_v49 = vpop.f32.mrb[22].mxu1  ;;  %v4742_v58 = vpop.eup %4741  ;;  %4761 = vrcp.f32 %v839_v56  ;;  %v456_v23 = vadd.f32 %v6473_v53, %v95_v14  ;;  %v6612_v24 = vmul.f32 %v4740_v32, %v6411_v42  ;;  %v297_v43 = vadd.f32 %v6481_v10, %v95_v14  ;;  %v537_v42 = vld [vmem:[%s9782_s1 + $0xe8] sm:$0xff]  ;;  %v539_v10 = vld [vmem:[%s9782_s1 + $0xf8] sm:$0xff] }
 0x108   :  { %v6600_v62 = vpop.f32.mrb[23].mxu0  ;;  %v6602_v61 = vpop.f32.mrb[23].mxu1  ;;  %4763 = vrcp.f32 %v840_v59  ;;  %v842_v19 = vadd.f32 1.0, %v4742_v58  ;;  %v6609_v55 = vadd.f32 %v536_v46, %v295_v1 }
 0x109   :  { %9851 = vst [vmem:[#allocation10_spill] sm:$0xff] %v6600_v62  ;;  %9852 = vst [vmem:[#allocation11_spill] sm:$0xff] %v6602_v61  ;;  %v4744_v50 = vpop.eup %4743  ;;  %4765 = vpow2.f32 %v746_v60  ;;  %v6614_v62 = vadd.f32 %v538_v18, %v456_v23  ;;  %v6616_v59 = vpop.f32.mrb[24].mxu0  ;;  %v661_v60 = vsub.f32 0.0, %v6595_v35  ;;  %v663_v18 = vsub.f32 0.0, %v6604_v30  ;;  %v542_v35 = vld [vmem:[%s9782_s1 + $0x110] sm:$0xff] }
 0x10a   :  { %v4746_v56 = vpop.eup %4745  ;;  %v841_v21 = vadd.f32 1.0, %v4744_v50  ;;  %9854 = vst [vmem:[#allocation13_spill] sm:$0xff] %v6612_v24  ;;  %4767 = vrcp.f32 %v842_v19  ;;  %9855 = vst [vmem:[#allocation14_spill] sm:$0xff] %v6616_v59  ;;  %v6618_v27 = vpop.f32.mrb[24].mxu1  ;;  %v458_v50 = vadd.f32 %v6483_v13, %v95_v14  ;;  %v6640_v14 = vadd.f32 %v537_v42, %v297_v43 }
 0x10b   :  { %v4748_v41 = vpop.eup %4747  ;;  %v843_v61 = vadd.f32 1.0, %v4746_v56  ;;  %9856 = vst [vmem:[#allocation15_spill] sm:$0xff] %v6618_v27  ;;  %v6625_v1 = vpop.f32.mrb[25].mxu0  ;;  %v666_v13 = vsub.f32 0.0, %v6614_v62 }
 0x10c   :  { %v4750_v53 = vpop.eup %4749  ;;  %4769 = vrcp.f32 %v841_v21  ;;  %v844_v22 = vadd.f32 1.0, %v4748_v41  ;;  %9857 = vst [vmem:[#allocation16_spill] sm:$0xff] %v6625_v1  ;;  %v6627_v19 = vpop.f32.mrb[25].mxu1  ;;  %v664_v21 = vsub.f32 0.0, %v6609_v55  ;;  %v750_v1 = vmul.f32 1.442695, %v661_v60 }
 0x10d   :  { %9858 = vst [vmem:[#allocation17_spill] sm:$0xff] %v6627_v19  ;;  %v4752_v32 = vpop.eup %4751  ;;  %v100_v46 = vpop.permute.xlu0 %99  ;;  %4771 = vrcp.f32 %v843_v61  ;;  %v846_v58 = vadd.f32 1.0, %v4750_v53  ;;  %v540_v61 = vld [vmem:[%s9782_s1 + $0x100] sm:$0xff]  ;;  %v760_v27 = vmul.f32 1.442695, %v666_v13  ;;  %v665_v59 = vsub.f32 0.0, %v6640_v14 }
 0x10e   :  { %v4754_v23 = vpop.eup %4753  ;;  %4773 = vrcp.f32 %v844_v22  ;;  %v845_v56 = vadd.f32 1.0, %v4752_v32  ;;  %v301_v41 = vadd.f32 %v6497_v37, %v100_v46  ;;  %v6642_v30 = vpop.f32.mrb[26].mxu0  ;;  %v6646_v37 = vadd.f32 %v539_v10, %v458_v50 }
 0x10f   :  { %v4756_v53 = vpop.eup %4755  ;;  %4775 = vrcp.f32 %v846_v58  ;;  %v847_v24 = vadd.f32 1.0, %v4754_v23  ;;  %9859 = vst [vmem:[#allocation18_spill] sm:$0xff] %v6642_v30  ;;  %v6644_v19 = vpop.f32.mrb[26].mxu1  ;;  %v754_v50 = vmul.f32 1.442695, %v663_v18 }
 0x110   :  { %9860 = vst [vmem:[#allocation19_spill] sm:$0xff] %v6644_v19  ;;  %v4758_v22 = vpop.eup %4757  ;;  %4777 = vrcp.f32 %v845_v56  ;;  %v848_v32 = vadd.f32 1.0, %v4756_v53  ;;  %v6651_v58 = vpop.f32.mrb[27].mxu0  ;;  %v6655_v30 = vadd.f32 %v540_v61, %v301_v41  ;;  %v462_v19 = vadd.f32 %v6499_v47, %v100_v46 }
 0x111   :  { %9861 = vst [vmem:[#allocation20_spill] sm:$0xff] %v6651_v58  ;;  %v6653_v23 = vpop.f32.mrb[27].mxu1  ;;  %v4760_v43 = vpop.eup %4759  ;;  %4779 = vrcp.f32 %v847_v24  ;;  %v850_v42 = vadd.f32 1.0, %v4758_v22  ;;  %v756_v10 = vmul.f32 1.442695, %v664_v21  ;;  %v541_v24 = vld [vmem:[%s9782_s1 + $0x108] sm:$0xff]  ;;  %v303_v21 = vadd.f32 %v6503_v51, %v100_v46 }
 0x112   :  { %9862 = vst [vmem:[#allocation21_spill] sm:$0xff] %v6653_v23  ;;  %v4762_v56 = vpop.eup %4761  ;;  %4781 = vrcp.f32 %v848_v32  ;;  %v849_v60 = vadd.f32 1.0, %v4760_v43  ;;  %v6659_v58 = vadd.f32 %v542_v35, %v462_v19  ;;  %v6664_v41 = vpop.f32.mrb[28].mxu0  ;;  %v667_v18 = vsub.f32 0.0, %v6646_v37  ;;  %v543_v35 = vld [vmem:[%s9782_s1 + $0x118] sm:$0xff] }
 0x113   :  { %v4764_v53 = vpop.eup %4763  ;;  %4783 = vrcp.f32 %v850_v42  ;;  %9863 = vst [vmem:[#allocation22_spill] sm:$0xff] %v6664_v41  ;;  %v6666_v61 = vpop.f32.mrb[28].mxu1  ;;  %v464_v42 = vadd.f32 %v6505_v54, %v100_v46  ;;  %v6699_v51 = vmul.f32 %v4762_v56, %v6413_v36 }
 0x114   :  { %9864 = vst [vmem:[#allocation23_spill] sm:$0xff] %v6666_v61  ;;  %v4766_v47 = vpop.eup %4765  ;;  %v6669_v22 = vmul.f32 %v4764_v53, %v6415_v44  ;;  %4785 = vrcp.f32 %v849_v60  ;;  %v6676_v19 = vpop.f32.mrb[29].mxu0  ;;  %v668_v44 = vsub.f32 0.0, %v6655_v30 }
 0x115   :  { %9865 = vst [vmem:[#allocation24_spill] sm:$0xff] %v6676_v19  ;;  %v6678_v13 = vpop.f32.mrb[29].mxu1  ;;  %v4768_v32 = vpop.eup %4767  ;;  %v851_v43 = vadd.f32 1.0, %v4766_v47  ;;  %4787 = vpow2.f32 %v6593_v2  ;;  %v6689_v19 = vadd.f32 %v541_v24, %v303_v21  ;;  %v758_v47 = vmul.f32 1.442695, %v665_v59  ;;  %v544_v59 = vld [vmem:[%s9782_s1 + $0x120] sm:$0xff] }
 0x116   :  { %9866 = vst [vmem:[#allocation25_spill] sm:$0xff] %v6678_v13  ;;  %v4770_v60 = vpop.eup %4769  ;;  %v105_v53 = vpop.permute.xlu1 %104  ;;  %v6686_v61 = vmul.f32 %v4768_v32, %v6417_v45  ;;  %4789 = vpow2.f32 %v6607_v52  ;;  %v670_v2 = vsub.f32 0.0, %v6659_v58  ;;  %v6692_v41 = vadd.f32 %v543_v35, %v464_v42 }
 0x117   :  { %v4772_v13 = vpop.eup %4771  ;;  %4791 = vrcp.f32 %v851_v43  ;;  %v6694_v54 = vpop.f32.mrb[30].mxu0  ;;  %v669_v52 = vsub.f32 0.0, %v6689_v19  ;;  %v762_v32 = vmul.f32 1.442695, %v667_v18  ;;  %v307_v56 = vadd.f32 %v6519_v17, %v105_v53 }
 0x118   :  { %9867 = vst [vmem:[#allocation26_spill] sm:$0xff] %v6694_v54  ;;  %v6696_v46 = vpop.f32.mrb[30].mxu1  ;;  %v4774_v23 = vpop.eup %4773  ;;  %4793 = vpow2.f32 %v750_v1  ;;  %v671_v36 = vsub.f32 0.0, %v6692_v41  ;;  %v6714_v1 = vmul.f32 %v4770_v60, %v6429_v3  ;;  %v764_v42 = vmul.f32 1.442695, %v668_v44 }
 0x119   :  { %9868 = vst [vmem:[#allocation27_spill] sm:$0xff] %v6696_v46  ;;  %v6707_v24 = vpop.f32.mrb[31].mxu0  ;;  %v6709_v21 = vpop.f32.mrb[31].mxu1  ;;  %4795 = vpow2.f32 %v754_v50  ;;  %v468_v45 = vadd.f32 %v6521_v20, %v105_v53  ;;  %v6721_v50 = vmul.f32 %v4774_v23, %v6444_v28  ;;  %v768_v18 = vmul.f32 1.442695, %v670_v2  ;;  %v545_v20 = vld [vmem:[%s9782_s1 + $0x128] sm:$0xff] }
 0x11a   :  { %9869 = vst [vmem:[#allocation28_spill] sm:$0xff] %v6707_v24  ;;  %9870 = vst [vmem:[#allocation29_spill] sm:$0xff] %v6709_v21  ;;  %v4776_v35 = vpop.eup %4775  ;;  %4797 = vpow2.f32 %v756_v10  ;;  %v546_v24 = vld [vmem:[%s9782_s1 + $0x130] sm:$0xff]  ;;  %v6723_v46 = vadd.f32 %v544_v59, %v307_v56  ;;  %v766_v3 = vmul.f32 1.442695, %v669_v52  ;;  %v309_v10 = vadd.f32 %v6534_v25, %v105_v53  ;;  %v548_v56 = vld [vmem:[%s9782_s1 + $0x140] sm:$0xff] }
 0x11b   :  { %v4778_v43 = vpop.eup %4777  ;;  %4799 = vpow2.f32 %v760_v27  ;;  %v770_v60 = vmul.f32 1.442695, %v671_v36  ;;  %v6733_v27 = vadd.f32 %v546_v24, %v468_v45  ;;  %v470_v25 = vadd.f32 %v6536_v29, %v105_v53 }
 0x11c   :  { %v4780_v21 = vpop.eup %4779  ;;  %4801 = vpow2.f32 %v758_v47  ;;  %v672_v28 = vsub.f32 0.0, %v6723_v46  ;;  %v6736_v47 = vmul.f32 %v4776_v35, %v6453_v34  ;;  %v6743_v59 = vmul.f32 %v4772_v13, %v6436_v15  ;;  %v547_v34 = vld [vmem:[%s9782_s1 + $0x138] sm:$0xff]  ;;  %v110_v15 = vpop.permute.xlu0 %109 }
 0x11d   :  { %v4782_v17 = vpop.eup %4781  ;;  %4803 = vpow2.f32 %v762_v32  ;;  %v6747_v45 = vadd.f32 %v545_v20, %v309_v10  ;;  %v6757_v13 = vmul.f32 %v4778_v43, %v6466_v57  ;;  %v674_v36 = vsub.f32 0.0, %v6733_v27  ;;  %v550_v57 = vld [vmem:[%s9782_s1 + $0x150] sm:$0xff] }
 0x11e   :  { %v4784_v44 = vpop.eup %4783  ;;  %v6730_v54 = vmul.f32 %v4782_v17, %v6476_v8  ;;  %4805 = vpow2.f32 %v764_v42  ;;  %v772_v29 = vmul.f32 1.442695, %v672_v28  ;;  %v313_v17 = vadd.f32 %v6552_v5, %v110_v15 }
 0x11f   :  { %v4786_v23 = vpop.eup %4785  ;;  %v6739_v2 = vmul.f32 %v4784_v44, %v6495_v12  ;;  %4807 = vpow2.f32 %v768_v18  ;;  %v6763_v18 = vadd.f32 %v547_v34, %v470_v25  ;;  %v673_v5 = vsub.f32 0.0, %v6747_v45 }
 0x120   :  { %v4788_v52 = vpop.eup %4787  ;;  %4809 = vpow2.f32 %v766_v3  ;;  %v474_v3 = vadd.f32 %v6554_v31, %v110_v15  ;;  %v6774_v10 = vmul.f32 %v4786_v23, %v6501_v48  ;;  %v6777_v25 = vadd.f32 %v548_v56, %v313_v17  ;;  %v549_v31 = vld [vmem:[%s9782_s1 + $0x148] sm:$0xff] }
 0x121   :  { %v4790_v24 = vpop.eup %4789  ;;  %v852_v35 = vadd.f32 1.0, %v4788_v52  ;;  %4811 = vpow2.f32 %v770_v60  ;;  %v6771_v60 = vmul.f32 %v4780_v21, %v6469_v0  ;;  %v315_v48 = vadd.f32 %v6561_v63, %v110_v15 }
 0x122   :  { %v6754_v53 = vpop.eup %4791  ;;  %v854_v32 = vadd.f32 1.0, %v4790_v24  ;;  %v6782_v21 = vadd.f32 %v550_v57, %v474_v3  ;;  %v776_v24 = vmul.f32 1.442695, %v674_v36  ;;  %v476_v17 = vadd.f32 %v6563_v7, %v110_v15 }
 0x123   :  { %v4794_v42 = vpop.eup %4793  ;;  %4813 = vrcp.f32 %v852_v35  ;;  %v675_v35 = vsub.f32 0.0, %v6763_v18  ;;  %v774_v57 = vmul.f32 1.442695, %v673_v5  ;;  %v4464_v7 = vpack.c.bf16 %v6578_v6, %v6557_v40  ;;  %v115_v5 = vpop.permute.xlu1 %114  ;;  %v553_v6 = vld [vmem:[%s9782_s1 + $0x168] sm:$0xff] }
 0x124   :  { %v4796_v43 = vpop.eup %4795  ;;  %4815 = vrcp.f32 %v854_v32  ;;  %v853_v20 = vadd.f32 1.0, %v4794_v42  ;;  %v6789_v42 = vadd.f32 %v549_v31, %v315_v48  ;;  %v4432_v31 = vpack.c.bf16 %v6566_v38, %v6544_v11 }
 0x125   :  { %v4798_v44 = vpop.eup %4797  ;;  %v855_v28 = vadd.f32 1.0, %v4796_v43  ;;  %4817 = vpow2.f32 %v772_v29  ;;  %v551_v29 = vld [vmem:[%s9782_s1 + $0x158] sm:$0xff]  ;;  %v676_v43 = vsub.f32 0.0, %v6777_v25  ;;  %4465 = vmatprep.subr.bf16.mxu1 %v4464_v7  ;;  %v319_v40 = vadd.f32 %v6586_v9, %v115_v5 }
 0x126   :  { %v4800_v52 = vpop.eup %4799  ;;  %4819 = vrcp.f32 %v853_v20  ;;  %v856_v0 = vadd.f32 1.0, %v4798_v44  ;;  %v678_v44 = vsub.f32 0.0, %v6782_v21  ;;  %4433 = vmatprep.subr.bf16.mxu0 %v4432_v31  ;;  %v480_v38 = vadd.f32 %v6588_v49, %v115_v5 }
 0x127   :  { %v4802_v23 = vpop.eup %4801  ;;  %4821 = vrcp.f32 %v855_v28  ;;  %v858_v34 = vadd.f32 1.0, %v4800_v52  ;;  %v6794_v28 = vadd.f32 %v551_v29, %v476_v17  ;;  %v552_v29 = vld [vmem:[%s9782_s1 + $0x160] sm:$0xff]  ;;  %v780_v17 = vmul.f32 1.442695, %v676_v43  ;;  %v555_v43 = vld [vmem:[%s9782_s1 + $0x178] sm:$0xff] }
 0x128   :  { %v4804_v32 = vpop.eup %4803  ;;  %4823 = vrcp.f32 %v856_v0  ;;  %v857_v56 = vadd.f32 1.0, %v4802_v23  ;;  %v778_v23 = vmul.f32 1.442695, %v675_v35  ;;  %v6820_v31 = vadd.f32 %v552_v29, %v319_v40  ;;  %v9876_v40 = vld [vmem:[#allocation7_spill] sm:$0xff] }
 0x129   :  { %v4806_v3 = vpop.eup %4805  ;;  %4825 = vrcp.f32 %v858_v34  ;;  %v859_v63 = vadd.f32 1.0, %v4804_v32  ;;  %v677_v34 = vsub.f32 0.0, %v6789_v42  ;;  %v554_v32 = vld [vmem:[%s9782_s1 + $0x170] sm:$0xff]  ;;  %v679_v49 = vsub.f32 0.0, %v6794_v28 }
 0x12a   :  { %v4808_v36 = vpop.eup %4807  ;;  %4827 = vrcp.f32 %v857_v56  ;;  %v860_v20 = vadd.f32 1.0, %v4806_v3  ;;  %v784_v3 = vmul.f32 1.442695, %v678_v44  ;;  %v6822_v7 = vadd.f32 %v554_v32, %v480_v38 }
 0x12b   :  { %v4810_v52 = vpop.eup %4809  ;;  %4829 = vrcp.f32 %v859_v63  ;;  %v862_v0 = vadd.f32 1.0, %v4808_v36  ;;  %v9871_v63 = vpack.c.bf16 %v6527_v26, %v6516_v16  ;;  %v9872_v36 = vld [vmem:[#allocation6_spill] sm:$0xff] }
 0x12c   :  { %v4812_v15 = vpop.eup %4811  ;;  %4831 = vrcp.f32 %v860_v20  ;;  %v861_v48 = vadd.f32 1.0, %v4810_v52  ;;  %v9873_v20 = vpack.c.bf16 %v6539_v33, %v9872_v36  ;;  %v9874_v52 = vld [vmem:[#allocation10_spill] sm:$0xff]  ;;  %v9875_v33 = vld [vmem:[#allocation11_spill] sm:$0xff]  ;;  %v682_v29 = vsub.f32 0.0, %v6822_v7 }
 0x12d   :  { %v4814_v56 = vpop.eup %4813  ;;  %4833 = vrcp.f32 %v862_v0  ;;  %v863_v11 = vadd.f32 1.0, %v4812_v15  ;;  %4435 = vmatpush1.bf16.msra.mxu0 %v9871_v63  ;;  %v321_v9 = vadd.f32 %v9874_v52, %v115_v5  ;;  %v482_v15 = vadd.f32 %v9875_v33, %v115_v5 }
 0x12e   :  { %v4816_v35 = vpop.eup %4815  ;;  %4835 = vrcp.f32 %v861_v48  ;;  %4467 = vmatpush1.bf16.msra.mxu1 %v9873_v20  ;;  %v680_v63 = vsub.f32 0.0, %v6820_v31  ;;  %v6833_v38 = vmul.f32 %v4814_v56, %v9876_v40  ;;  %v786_v5 = vmul.f32 1.442695, %v679_v49  ;;  %v9881_v49 = vld [vmem:[#allocation14_spill] sm:$0xff]  ;;  %v558_v40 = vld [vmem:[%s9782_s1 + $0x190] sm:$0xff] }
 0x12f   :  { %v4818_v0 = vpop.eup %4817  ;;  %4837 = vrcp.f32 %v863_v11  ;;  %v6827_v44 = vadd.f32 %v553_v6, %v321_v9  ;;  %v782_v11 = vmul.f32 1.442695, %v677_v34  ;;  %v6836_v20 = vadd.f32 %v555_v43, %v482_v15  ;;  %v9878_v6 = vld [vmem:[#allocation8_spill] sm:$0xff]  ;;  %v120_v9 = vpop.permute.xlu0 %119  ;;  %v556_v43 = vld [vmem:[%s9782_s1 + $0x180] sm:$0xff] }
 0x130   :  { %v4820_v16 = vpop.eup %4819  ;;  %v864_v26 = vadd.f32 1.0, %v4818_v0  ;;  %4839 = vpow2.f32 %v776_v24  ;;  %9877 = vst [vmem:[#allocation6_spill] sm:$0xff] %v6833_v38  ;;  %v6839_v52 = vmul.f32 %v4816_v35, %v9878_v6  ;;  %v788_v56 = vmul.f32 1.442695, %v680_v63  ;;  %v9883_v6 = vld [vmem:[#allocation15_spill] sm:$0xff] }
 0x131   :  { %v4822_v48 = vpop.eup %4821  ;;  %4841 = vpow2.f32 %v774_v57  ;;  %v681_v36 = vsub.f32 0.0, %v6827_v44  ;;  %v325_v33 = vadd.f32 %v9881_v49, %v120_v9  ;;  %v486_v49 = vadd.f32 %v9883_v6, %v120_v9  ;;  %v9887_v6 = vld [vmem:[#allocation12_spill] sm:$0xff] }
 0x132   :  { %v4824_v32 = vpop.eup %4823  ;;  %4843 = vrcp.f32 %v864_v26  ;;  %9879 = vst [vmem:[#allocation10_spill] sm:$0xff] %v6839_v52  ;;  %v683_v26 = vsub.f32 0.0, %v6836_v20  ;;  %v6882_v12 = vmul.f32 %v4822_v48, %v9887_v6 }
 0x133   :  { %v4826_v24 = vpop.eup %4825  ;;  %v6842_v57 = vmul.f32 %v4824_v32, %v6609_v55  ;;  %4845 = vpow2.f32 %v778_v23  ;;  %v792_v23 = vmul.f32 1.442695, %v682_v29  ;;  %v9882_v32 = vld [vmem:[#allocation5_spill] sm:$0xff]  ;;  %v790_v63 = vmul.f32 1.442695, %v681_v36 }
 0x134   :  { %v4828_v34 = vpop.eup %4827  ;;  %v6845_v0 = vmul.f32 %v4826_v24, %v6614_v62  ;;  %4847 = vpow2.f32 %v780_v17  ;;  %v6856_v62 = vmul.f32 %v6754_v53, %v9882_v32  ;;  %v6863_v29 = vadd.f32 %v556_v43, %v325_v33  ;;  %v557_v53 = vld [vmem:[%s9782_s1 + $0x188] sm:$0xff]  ;;  %v9884_v32 = vld [vmem:[#allocation9_spill] sm:$0xff] }
 0x135   :  { %v4830_v35 = vpop.eup %4829  ;;  %4849 = vpow2.f32 %v784_v3  ;;  %v794_v3 = vmul.f32 1.442695, %v683_v26  ;;  %v6875_v17 = vmul.f32 %v4820_v16, %v9884_v32  ;;  %v9886_v43 = vld [vmem:[#allocation17_spill] sm:$0xff]  ;;  %v6885_v52 = vadd.f32 %v558_v40, %v486_v49 }
 0x136   :  { %9880 = vst [vmem:[#allocation11_spill] sm:$0xff] %v6845_v0  ;;  %v4832_v15 = vpop.eup %4831  ;;  %4851 = vpow2.f32 %v782_v11  ;;  %v559_v11 = vld [vmem:[%s9782_s1 + $0x198] sm:$0xff]  ;;  %v488_v33 = vadd.f32 %v9886_v43, %v120_v9  ;;  %v684_v8 = vsub.f32 0.0, %v6863_v29  ;;  %v6888_v38 = vmul.f32 %v4828_v34, %v6640_v14  ;;  %v9888_v34 = vld [vmem:[#allocation13_spill] sm:$0xff]  ;;  %v562_v43 = vld [vmem:[%s9782_s1 + $0x1b0] sm:$0xff] }
 0x137   :  { %v4834_v24 = vpop.eup %4833  ;;  %4853 = vpow2.f32 %v786_v5  ;;  %v9885_v5 = vld [vmem:[#allocation16_spill] sm:$0xff]  ;;  %v6895_v32 = vmul.f32 %v4830_v35, %v6646_v37  ;;  %v6898_v40 = vmul.f32 %v4832_v15, %v6655_v30  ;;  %v686_v37 = vsub.f32 0.0, %v6885_v52  ;;  %v125_v30 = vpop.permute.xlu1 %124 }
 0x138   :  { %v6872_v36 = vpop.eup %4835  ;;  %4855 = vpow2.f32 %v788_v56  ;;  %v327_v26 = vadd.f32 %v9885_v5, %v120_v9  ;;  %v6892_v56 = vadd.f32 %v559_v11, %v488_v33  ;;  %v6901_v49 = vmul.f32 %v4834_v24, %v6659_v58  ;;  %v561_v33 = vld [vmem:[%s9782_s1 + $0x1a8] sm:$0xff] }
 0x139   :  { %v6879_v55 = vpop.eup %4837  ;;  %4857 = vpow2.f32 %v792_v23  ;;  %v796_v23 = vmul.f32 1.442695, %v684_v8  ;;  %v4468_v8 = vpack.c.bf16 %v6743_v59, %v6699_v51  ;;  %v9889_v51 = vpack.c.bf16 %v6669_v22, %v6581_v39  ;;  %v9890_v59 = vld [vmem:[#allocation18_spill] sm:$0xff]  ;;  %v9893_v22 = vld [vmem:[#allocation20_spill] sm:$0xff] }
 0x13a   :  { %v4840_v0 = vpop.eup %4839  ;;  %4859 = vpow2.f32 %v790_v63  ;;  %v6890_v16 = vadd.f32 %v557_v53, %v327_v26  ;;  %v4436_v63 = vpack.c.bf16 %v6714_v1, %v9888_v34  ;;  %v687_v15 = vsub.f32 0.0, %v6892_v56 }
 0x13b   :  { %v4842_v9 = vpop.eup %4841  ;;  %v866_v48 = vadd.f32 1.0, %v4840_v0  ;;  %4861 = vpow2.f32 %v794_v3  ;;  %4469 = vmatprep.subr.bf16.mxu1 %v4468_v8  ;;  %v331_v26 = vadd.f32 %v9890_v59, %v125_v30  ;;  %v9894_v8 = vld [vmem:[#allocation21_spill] sm:$0xff]  ;;  %v6945_v59 = vmul.f32 %v6872_v36, %v6689_v19 }
 0x13c   :  { %v4844_v5 = vpop.eup %4843  ;;  %v865_v14 = vadd.f32 1.0, %v4842_v9  ;;  %v685_v58 = vsub.f32 0.0, %v6890_v16  ;;  %4437 = vmatprep.subr.bf16.mxu0 %v4436_v63 }
 0x13d   :  { %v4846_v53 = vpop.eup %4845  ;;  %v6906_v11 = vmul.f32 %v4844_v5, %v6723_v46  ;;  %4863 = vrcp.f32 %v866_v48  ;;  %v560_v46 = vld [vmem:[%s9782_s1 + $0x1a0] sm:$0xff]  ;;  %4439 = vmatpush1.bf16.msra.mxu0 %v9889_v51  ;;  %v9891_v48 = vpack.c.bf16 %v6686_v61, %v6591_v4  ;;  %v333_v5 = vadd.f32 %v9893_v22, %v125_v30 }
 0x13e   :  { %v4848_v0 = vpop.eup %4847  ;;  %4865 = vrcp.f32 %v865_v14  ;;  %v867_v35 = vadd.f32 1.0, %v4846_v53  ;;  %v563_v14 = vld [vmem:[%s9782_s1 + $0x1b8] sm:$0xff]  ;;  %v6936_v53 = vadd.f32 %v560_v46, %v331_v26 }
 0x13f   :  { %v4850_v1 = vpop.eup %4849  ;;  %v868_v3 = vadd.f32 1.0, %v4848_v0  ;;  %4867 = vpow2.f32 %v796_v23  ;;  %4471 = vmatpush1.bf16.msra.mxu1 %v9891_v48  ;;  %v9892_v23 = vld [vmem:[#allocation19_spill] sm:$0xff]  ;;  %v494_v0 = vadd.f32 %v9894_v8, %v125_v30  ;;  %v6941_v61 = vadd.f32 %v561_v33, %v333_v5  ;;  %v564_v5 = vld [vmem:[%s9782_s1 + $0x1c0] sm:$0xff] }
 0x140   :  { %v4852_v6 = vpop.eup %4851  ;;  %4869 = vrcp.f32 %v867_v35  ;;  %v870_v9 = vadd.f32 1.0, %v4850_v1  ;;  %v492_v39 = vadd.f32 %v9892_v23, %v125_v30  ;;  %v800_v30 = vmul.f32 1.442695, %v686_v37  ;;  %v566_v37 = vld [vmem:[%s9782_s1 + $0x1d0] sm:$0xff] }
 0x141   :  { %v4854_v34 = vpop.eup %4853  ;;  %4871 = vrcp.f32 %v868_v3  ;;  %v869_v63 = vadd.f32 1.0, %v4852_v6  ;;  %v6947_v3 = vadd.f32 %v563_v14, %v494_v0  ;;  %v798_v6 = vmul.f32 1.442695, %v685_v58  ;;  %v9896_v14 = vld [vmem:[#allocation22_spill] sm:$0xff] }
 0x142   :  { %v4856_v35 = vpop.eup %4855  ;;  %4873 = vrcp.f32 %v870_v9  ;;  %v871_v1 = vadd.f32 1.0, %v4854_v34  ;;  %v6939_v4 = vadd.f32 %v562_v43, %v492_v39  ;;  %v802_v23 = vmul.f32 1.442695, %v687_v15  ;;  %v130_v39 = vpop.permute.xlu0 %129  ;;  %v565_v0 = vld [vmem:[%s9782_s1 + $0x1c8] sm:$0xff] }
 0x143   :  { %v4858_v51 = vpop.eup %4857  ;;  %4875 = vrcp.f32 %v869_v63  ;;  %v872_v48 = vadd.f32 1.0, %v4856_v35  ;;  %9895 = vst [vmem:[#allocation7_spill] sm:$0xff] %v6947_v3  ;;  %v688_v33 = vsub.f32 0.0, %v6936_v53  ;;  %v689_v36 = vsub.f32 0.0, %v6941_v61  ;;  %v9897_v63 = vld [vmem:[#allocation23_spill] sm:$0xff] }
 0x144   :  { %v4860_v46 = vpop.eup %4859  ;;  %4877 = vrcp.f32 %v871_v1  ;;  %v874_v26 = vadd.f32 1.0, %v4858_v51  ;;  %v690_v19 = vsub.f32 0.0, %v6939_v4  ;;  %v691_v15 = vsub.f32 0.0, %v6947_v3  ;;  %v9898_v51 = vld [vmem:[#allocation24_spill] sm:$0xff] }
 0x145   :  { %v4862_v9 = vpop.eup %4861  ;;  %4879 = vrcp.f32 %v872_v48  ;;  %v873_v43 = vadd.f32 1.0, %v4860_v46  ;;  %v337_v34 = vadd.f32 %v9896_v14, %v130_v39  ;;  %v498_v8 = vadd.f32 %v9897_v63, %v130_v39  ;;  %v9899_v46 = vld [vmem:[#allocation25_spill] sm:$0xff]  ;;  %v567_v63 = vld [vmem:[%s9782_s1 + $0x1d8] sm:$0xff] }
 0x146   :  { %4881 = vrcp.f32 %v874_v26  ;;  %v875_v22 = vadd.f32 1.0, %v4862_v9  ;;  %v339_v48 = vadd.f32 %v9898_v51, %v130_v39  ;;  %v500_v26 = vadd.f32 %v9899_v46, %v130_v39 }
 0x147   :  { %v4864_v58 = vpop.eup %4863  ;;  %4883 = vrcp.f32 %v873_v43  ;;  %v804_v43 = vmul.f32 1.442695, %v688_v33  ;;  %v6969_v24 = vadd.f32 %v564_v5, %v337_v34  ;;  %v6971_v14 = vadd.f32 %v566_v37, %v498_v8 }
 0x148   :  { %v4866_v35 = vpop.eup %4865  ;;  %v6965_v1 = vmul.f32 %v4864_v58, %v6733_v27  ;;  %4885 = vrcp.f32 %v875_v22  ;;  %v808_v22 = vmul.f32 1.442695, %v690_v19  ;;  %v6978_v58 = vadd.f32 %v565_v0, %v339_v48 }
 0x149   :  { %v4868_v9 = vpop.eup %4867  ;;  %4887 = vpow2.f32 %v800_v30  ;;  %v806_v30 = vmul.f32 1.442695, %v689_v36  ;;  %v692_v33 = vsub.f32 0.0, %v6969_v24  ;;  %v694_v5 = vsub.f32 0.0, %v6971_v14 }
 0x14a   :  { %v4870_v3 = vpop.eup %4869  ;;  %4889 = vpow2.f32 %v798_v6  ;;  %v6984_v34 = vmul.f32 %v6879_v55, %v6692_v41  ;;  %v810_v8 = vmul.f32 1.442695, %v691_v15  ;;  %v693_v51 = vsub.f32 0.0, %v6978_v58  ;;  %v135_v15 = vpop.permute.xlu1 %134 }
 0x14b   :  { %v4872_v39 = vpop.eup %4871  ;;  %4891 = vpow2.f32 %v802_v23  ;;  %v6987_v46 = vadd.f32 %v567_v63, %v500_v26  ;;  %v6990_v19 = vmul.f32 %v4866_v35, %v6747_v45  ;;  %v876_v23 = vadd.f32 1.0, %v4868_v9  ;;  %v9900_v63 = vld [vmem:[#allocation26_spill] sm:$0xff] }
 0x14c   :  { %v4874_v37 = vpop.eup %4873  ;;  %4893 = vpow2.f32 %v804_v43  ;;  %v812_v36 = vmul.f32 1.442695, %v692_v33  ;;  %v6993_v48 = vmul.f32 %v4872_v39, %v6777_v25  ;;  %v816_v26 = vmul.f32 1.442695, %v694_v5  ;;  %v568_v25 = vld [vmem:[%s9782_s1 + $0x1e0] sm:$0xff] }
 0x14d   :  { %v4876_v6 = vpop.eup %4875  ;;  %v6996_v27 = vmul.f32 %v4874_v37, %v6782_v21  ;;  %4895 = vpow2.f32 %v808_v22  ;;  %v695_v41 = vsub.f32 0.0, %v6987_v46  ;;  %v4440_v45 = vpack.c.bf16 %v6774_v10, %v6757_v13 }
 0x14e   :  { %v4878_v0 = vpop.eup %4877  ;;  %4897 = vpow2.f32 %v806_v30  ;;  %v4472_v35 = vpack.c.bf16 %v6856_v62, %v6771_v60  ;;  %v814_v43 = vmul.f32 1.442695, %v693_v51  ;;  %v343_v22 = vadd.f32 %v9900_v63, %v135_v15  ;;  %v9901_v60 = vld [vmem:[#allocation27_spill] sm:$0xff] }
 0x14f   :  { %v4880_v55 = vpop.eup %4879  ;;  %4899 = vpow2.f32 %v810_v8  ;;  %v818_v13 = vmul.f32 1.442695, %v695_v41  ;;  %4441 = vmatprep.subr.bf16.mxu0 %v4440_v45  ;;  %v504_v10 = vadd.f32 %v9901_v60, %v135_v15  ;;  %v570_v62 = vld [vmem:[%s9782_s1 + $0x1f0] sm:$0xff]  ;;  %v995_v33 = vmul.f32 %v4870_v3, %v6763_v18  ;;  %v9904_v3 = vld [vmem:[#allocation28_spill] sm:$0xff] }
 0x150   :  { %v4882_v9 = vpop.eup %4881  ;;  %v7007_v21 = vmul.f32 %v4880_v55, %v6820_v31  ;;  %4901 = vpow2.f32 %v812_v36  ;;  %4473 = vmatprep.subr.bf16.mxu1 %v4472_v35  ;;  %v9903_v37 = vpack.c.bf16 %v6739_v2, %v6736_v47  ;;  %v7026_v8 = vadd.f32 %v568_v25, %v343_v22  ;;  %v569_v47 = vld [vmem:[%s9782_s1 + $0x1e8] sm:$0xff] }
 0x151   :  { %v4884_v39 = vpop.eup %4883  ;;  %v7011_v30 = vmul.f32 %v4882_v9, %v6822_v7  ;;  %4903 = vrcp.f32 %v876_v23  ;;  %v9902_v7 = vpack.c.bf16 %v6730_v54, %v6721_v50  ;;  %v997_v36 = vmul.f32 %v4876_v6, %v6789_v42  ;;  %v9905_v42 = vld [vmem:[#allocation29_spill] sm:$0xff] }
 0x152   :  { %v4886_v31 = vpop.eup %4885  ;;  %v4454_v5 = vpack.c.bf16 %v7007_v21, %v6993_v48  ;;  %4475 = vmatpush1.bf16.msra.mxu1 %v9903_v37  ;;  %4905 = vpow2.f32 %v816_v26  ;;  %v345_v41 = vadd.f32 %v9904_v3, %v135_v15  ;;  %v696_v54 = vsub.f32 0.0, %v7026_v8  ;;  %v571_v26 = vld [vmem:[%s9782_s1 + $0x1f8] sm:$0xff]  ;;  %v9908_v3 = vld [vmem:[#allocation11_spill] sm:$0xff] }
 0x153   :  { %4443 = vmatpush1.bf16.msra.mxu0 %v9902_v7  ;;  %v4888_v51 = vpop.eup %4887  ;;  %v4486_v18 = vpack.c.bf16 %v7011_v30, %v6996_v27  ;;  %4907 = vpow2.f32 %v814_v43  ;;  %v7033_v50 = vadd.f32 %v570_v62, %v504_v10  ;;  %v506_v6 = vadd.f32 %v9905_v42, %v135_v15 }
 0x154   :  { %v4890_v23 = vpop.eup %4889  ;;  %v878_v55 = vadd.f32 1.0, %v4888_v51  ;;  %4909 = vpow2.f32 %v818_v13  ;;  %v4444_v35 = vpack.c.bf16 %v6888_v38, %v6875_v17  ;;  %v1001_v25 = vmul.f32 %v4884_v39, %v6827_v44  ;;  %v9906_v38 = vld [vmem:[#allocation6_spill] sm:$0xff] }
 0x155   :  { %v4892_v2 = vpop.eup %4891  ;;  %v877_v45 = vadd.f32 1.0, %v4890_v23  ;;  %v820_v43 = vmul.f32 1.442695, %v696_v54  ;;  %v999_v22 = vmul.f32 %v4878_v0, %v6794_v28  ;;  %v1003_v60 = vmul.f32 %v4886_v31, %v6836_v20 }
 0x156   :  { %4911 = vrcp.f32 %v878_v55  ;;  %v879_v9 = vadd.f32 1.0, %v4892_v2  ;;  %v4894_v63 = vpop.eup %4893  ;;  %v7047_v13 = vadd.f32 %v569_v47, %v345_v41  ;;  %4445 = vmatprep.subr.bf16.mxu0 %v4444_v35  ;;  %v7049_v62 = vadd.f32 %v571_v26, %v506_v6  ;;  %v9909_v41 = vld [vmem:[#allocation10_spill] sm:$0xff] }
 0x157   :  { %4913 = vrcp.f32 %v877_v45  ;;  %v4896_v15 = vpop.eup %4895  ;;  %v880_v10 = vadd.f32 1.0, %v4894_v63  ;;  %v4476_v44 = vpack.c.bf16 %v6895_v32, %v6882_v12  ;;  %v9907_v17 = vpack.c.bf16 %v6842_v57, %v9906_v38 }
 0x158   :  { %4915 = vrcp.f32 %v879_v9  ;;  %v4898_v39 = vpop.eup %4897  ;;  %v882_v28 = vadd.f32 1.0, %v4896_v15  ;;  %v698_v20 = vsub.f32 0.0, %v7033_v50  ;;  %v4448_v0 = vpack.c.bf16 %v6990_v19, %v6945_v59  ;;  %v9913_v15 = vld [vmem:[#allocation7_spill] sm:$0xff] }
 0x159   :  { %4447 = vmatpush1.bf16.msra.mxu0 %v9907_v17  ;;  %4917 = vpow2.f32 %v820_v43  ;;  %v4900_v31 = vpop.eup %4899  ;;  %v881_v7 = vadd.f32 1.0, %v4898_v39  ;;  %4477 = vmatprep.subr.bf16.mxu1 %v4476_v44  ;;  %v4480_v37 = vpack.c.bf16 %v995_v33, %v6984_v34  ;;  %v4452_v51 = vpack.c.bf16 %v1001_v25, %v997_v36 }
 0x15a   :  { %4919 = vrcp.f32 %v880_v10  ;;  %v4902_v12 = vpop.eup %4901  ;;  %v883_v32 = vadd.f32 1.0, %v4900_v31  ;;  %v697_v57 = vsub.f32 0.0, %v7047_v13  ;;  %v9910_v23 = vpack.c.bf16 %v9908_v3, %v9909_v41  ;;  %4449 = vmatprep.subr.bf16.mxu0 %v4448_v0 }
 0x15b   :  { %4921 = vrcp.f32 %v882_v28  ;;  %v4484_v55 = vpack.c.bf16 %v1003_v60, %v999_v22  ;;  %v4904_v54 = vpop.eup %4903  ;;  %v699_v59 = vsub.f32 0.0, %v7049_v62  ;;  %v9911_v34 = vpack.c.bf16 %v6906_v11, %v6898_v40 }
 0x15c   :  { %4479 = vmatpush1.bf16.msra.mxu1 %v9910_v23  ;;  %4923 = vrcp.f32 %v881_v7  ;;  %v4906_v19 = vpop.eup %4905  ;;  %v884_v33 = vadd.f32 1.0, %v4902_v12  ;;  %v824_v47 = vmul.f32 1.442695, %v698_v20  ;;  %v822_v45 = vmul.f32 1.442695, %v697_v57 }
 0x15d   :  { %4481 = vmatprep.subr.bf16.mxu1 %v4480_v37  ;;  %4451 = vmatpush1.bf16.msra.mxu0 %v9911_v34  ;;  %4925 = vrcp.f32 %v883_v32  ;;  %v4908_v36 = vpop.eup %4907  ;;  %v9912_v42 = vpack.c.bf16 %v6965_v1, %v6901_v49  ;;  %v826_v26 = vmul.f32 1.442695, %v699_v59  ;;  %v1004_v9 = vmul.f32 %v4904_v54, %v6863_v29 }
 0x15e   :  { %4453 = vmatprep.subr.bf16.mxu0 %v4452_v51  ;;  %v4910_v2 = vpop.eup %4909  ;;  %4927 = vrcp.f32 %v884_v33  ;;  %v886_v29 = vadd.f32 1.0, %v4906_v19  ;;  %v885_v44 = vadd.f32 1.0, %v4908_v36  ;;  %v5719_v33 = vld [vmem:[%s9781_s0 + $0x10] sm:$0xff] }
 0x15f   :  { %4929 = vpow2.f32 %v824_v47  ;;  %v887_v38 = vadd.f32 1.0, %v4910_v2  ;;  %v1165_v36 = vmul.f32 2.2180152, %v5719_v33  ;;  %v5720_v2 = vld [vmem:[%s9781_s0 + $0x18] sm:$0xff] }
 0x160   :  { %4483 = vmatpush1.bf16.msra.mxu1 %v9912_v42  ;;  %v4912_v6 = vpop.eup %4911  ;;  %4931 = vpow2.f32 %v822_v45  ;;  %v1166_v45 = vmul.f32 2.2180152, %v5720_v2 }
 0x161   :  { %4485 = vmatprep.subr.bf16.mxu1 %v4484_v55  ;;  %4455 = vmatpush1.bf16.msra.mxu0 %v4454_v5  ;;  %v4914_v40 = vpop.eup %4913  ;;  %4933 = vpow2.f32 %v826_v26  ;;  %v1006_v21 = vmul.f32 %v4912_v6, %v6885_v52 }
 0x162   :  { %v4916_v11 = vpop.eup %4915  ;;  %v1005_v22 = vmul.f32 %v4914_v40, %v6890_v16 }
 0x163   :  { %v4918_v35 = vpop.eup %4917  ;;  %v1007_v30 = vmul.f32 %v4916_v11, %v6892_v56 }
 0x164   :  { %4487 = vmatpush1.bf16.msra.mxu1 %v4486_v18  ;;  %v4920_v25 = vpop.eup %4919  ;;  %v888_v49 = vadd.f32 1.0, %v4918_v35 }
 0x165   :  { %v4922_v1 = vpop.eup %4921  ;;  %v1008_v43 = vmul.f32 %v4920_v25, %v6936_v53 }
 0x166   :  { %v4924_v48 = vpop.eup %4923  ;;  %v1010_v5 = vmul.f32 %v4922_v1, %v6939_v4  ;;  %4935 = vrcp.f32 %v888_v49 }
 0x167   :  { %v4926_v63 = vpop.eup %4925  ;;  %v4458_v60 = vpack.c.bf16 %v1008_v43, %v1004_v9  ;;  %v1009_v27 = vmul.f32 %v4924_v48, %v6941_v61  ;;  %4937 = vrcp.f32 %v886_v29  ;;  %v5721_v48 = vld [vmem:[%s9784_s3] sm:$0xff]  ;;  %v5732_v29 = vld [vmem:[%s9784_s3 + $0x58] sm:$0xff] }
 0x168   :  { %v4490_v18 = vpack.c.bf16 %v1010_v5, %v1006_v21  ;;  %v1011_v10 = vmul.f32 %v4926_v63, %v9913_v15  ;;  %v4928_v52 = vpop.eup %4927  ;;  %4939 = vrcp.f32 %v885_v44  ;;  %v5722_v21 = vld [vmem:[%s9784_s3 + $0x8] sm:$0xff]  ;;  %v5723_v5 = vld [vmem:[%s9784_s3 + $0x10] sm:$0xff]  ;;  %v5724_v63 = vld [vmem:[%s9784_s3 + $0x18] sm:$0xff] }
 0x169   :  { %v4456_v53 = vpack.c.bf16 %v1009_v27, %v1005_v22  ;;  %v4930_v4 = vpop.eup %4929  ;;  %4941 = vrcp.f32 %v887_v38  ;;  %v1012_v0 = vmul.f32 %v4928_v52, %v6969_v24  ;;  %v5725_v22 = vld [vmem:[%s9784_s3 + $0x20] sm:$0xff]  ;;  %v5727_v27 = vld [vmem:[%s9784_s3 + $0x30] sm:$0xff]  ;;  %v5730_v15 = vld [vmem:[%s9784_s3 + $0x48] sm:$0xff]  ;;  %v1195_v52 = vpop.permute.xlu0 %1194 }
 0x16a   :  { %v4488_v17 = vpack.c.bf16 %v1011_v10, %v1007_v30  ;;  %v4932_v16 = vpop.eup %4931  ;;  %v890_v39 = vadd.f32 1.0, %v4930_v4  ;;  %v5728_v30 = vld [vmem:[%s9784_s3 + $0x38] sm:$0xff]  ;;  %v5731_v10 = vld [vmem:[%s9784_s3 + $0x50] sm:$0xff]  ;;  %v5733_v44 = vld [vmem:[%s9784_s3 + $0x60] sm:$0xff] }
 0x16b   :  { %4457 = vmatprep.subr.bf16.mxu0 %v4456_v53  ;;  %v4934_v61 = vpop.eup %4933  ;;  %v889_v56 = vadd.f32 1.0, %v4932_v16  ;;  %v5734_v53 = vld [vmem:[%s9784_s3 + $0x68] sm:$0xff]  ;;  %v5735_v38 = vld [vmem:[%s9784_s3 + $0x70] sm:$0xff] }
 0x16c   :  { %4489 = vmatprep.subr.bf16.mxu1 %v4488_v17  ;;  %4459 = vmatpush1.bf16.msra.mxu0 %v4458_v60  ;;  %4943 = vrcp.f32 %v890_v39  ;;  %v891_v28 = vadd.f32 1.0, %v4934_v61  ;;  %v5726_v60 = vld [vmem:[%s9784_s3 + $0x28] sm:$0xff]  ;;  %v5736_v17 = vld [vmem:[%s9784_s3 + $0x78] sm:$0xff] }
 0x16d   :  { %4491 = vmatpush1.bf16.msra.mxu1 %v4490_v18  ;;  %4945 = vrcp.f32 %v889_v56  ;;  %v5729_v18 = vld [vmem:[%s9784_s3 + $0x40] sm:$0xff] }
 0x16e   :  { %4947 = vrcp.f32 %v891_v28 }
 0x170   :  { %v4936_v20 = vpop.eup %4935 }
 0x171   :  { %v1016_v31 = vmul.f32 %v4936_v20, %v7026_v8  ;;  %v4938_v37 = vpop.eup %4937 }
 0x172   :  { %v4940_v51 = vpop.eup %4939  ;;  %v1014_v3 = vmul.f32 %v4938_v37, %v6971_v14  ;;  %v1020_v14 = vld [vmem:[%s9785_s4] sm:$0xff]  ;;  %v1200_v37 = vpop.permute.xlu1 %1199 }
 0x173   :  { %v4462_v7 = vpack.c.bf16 %v1016_v31, %v1012_v0  ;;  %v4942_v12 = vpop.eup %4941  ;;  %v1013_v55 = vmul.f32 %v4940_v51, %v6978_v58  ;;  %v9914_v58 = vmov 0.0   ;;  %v5737_v0 = vld [vmem:[%s9782_s1] sm:$0xff]  ;;  %v5738_v51 = vld [vmem:[%s9782_s1 + $0x10] sm:$0xff] }
 0x174   :  { %v1015_v24 = vmul.f32 %v4942_v12, %v6987_v46  ;;  %v5717_v46 = vld [vmem:[%s9781_s0] sm:$0xff] }
 0x176   :  { %v4944_v32 = vpop.eup %4943 }
 0x177   :  { %v4946_v57 = vpop.eup %4945  ;;  %v1018_v41 = vmul.f32 %v4944_v32, %v7033_v50  ;;  %v1163_v50 = vmul.f32 2.2180152, %v5717_v46  ;;  %v5739_v32 = vld [vmem:[%s9782_s1 + $0x8] sm:$0xff] }
 0x178   :  { %v4948_v23 = vpop.eup %4947  ;;  %v1017_v54 = vmul.f32 %v4946_v57, %v7047_v13  ;;  %v5718_v13 = vld [vmem:[%s9781_s0 + $0x8] sm:$0xff] }
 0x179   :  { %v4494_v59 = vpack.c.bf16 %v1018_v41, %v1014_v3  ;;  %v1019_v8 = vmul.f32 %v4948_v23, %v7049_v62  ;;  %v1164_v62 = vmul.f32 2.2180152, %v5718_v13  ;;  %v5740_v23 = vld [vmem:[%s9782_s1 + $0x18] sm:$0xff] }
 0x17a   :  { %v4460_v34 = vpack.c.bf16 %v1017_v54, %v1013_v55 }
 0x17b   :  { %v4492_v19 = vpack.c.bf16 %v1019_v8, %v1015_v24 }
 0x17c   :  { %4461 = vmatprep.subr.bf16.mxu0 %v4460_v34 }
 0x17d   :  { %4493 = vmatprep.subr.bf16.mxu1 %v4492_v19  ;;  %4463 = vmatpush1.bf16.msra.mxu0 %v4462_v7 }
 0x17e   :  { %4495 = vmatpush1.bf16.msra.mxu1 %v4494_v59 }
 0x180   :  { %1086 = vmatmul.mubr.f32.vlgmr.msra.gmra.mrb[32].mxu0 %v1020_v14 }
 0x181   :  { %1157 = vmatmul.mubr.f32.vlgmr.msra.gmra.mrb[32].mxu1 %v1020_v14  ;;  %1336 = vmatprep.mubr.f32.mxu0 %v9914_v58 }
 0x182   :  { %1497 = vmatprep.mubr.f32.mxu1 %v9914_v58 }
 0x253   :  { %v1087_v47 = vpop.f32.mrb[32].mxu0 }
 0x254   :  { %v1167_v42 = vmul.f32 -1.3041358, %v1087_v47  ;;  %v1158_v6 = vpop.f32.mrb[32].mxu1  ;;  %v1089_v26 = vpop.f32.mrb[33].mxu0 }
 0x255   :  { %v1169_v40 = vmul.f32 -1.3041358, %v1158_v6  ;;  %v1168_v11 = vmul.f32 -1.3041358, %v1089_v26  ;;  %v1160_v35 = vpop.f32.mrb[33].mxu1  ;;  %v1205_v47 = vpop.permute.xlu0 %1204  ;;  %v5743_v26 = vld [vmem:[%s9782_s1 + $0x28] sm:$0xff] }
 0x256   :  { %v7110_v25 = vadd.f32 %v1167_v42, %v1163_v50  ;;  %v1170_v49 = vmul.f32 -1.3041358, %v1160_v35  ;;  %v5742_v42 = vld [vmem:[%s9782_s1 + $0x30] sm:$0xff] }
 0x257   :  { %v7112_v1 = vadd.f32 %v1169_v40, %v1165_v36  ;;  %v7114_v9 = vadd.f32 %v1168_v11, %v1164_v62  ;;  %v5741_v62 = vld [vmem:[%s9782_s1 + $0x20] sm:$0xff] }
 0x258   :  { %9915 = vst [vmem:[#allocation8_spill] sm:$0xff] %v7110_v25  ;;  %v7116_v43 = vadd.f32 %v1170_v49, %v1166_v45 }
 0x259   :  { %9916 = vst [vmem:[#allocation14_spill] sm:$0xff] %v7112_v1  ;;  %9917 = vst [vmem:[#allocation5_spill] sm:$0xff] %v7114_v9  ;;  %1272 = vmatprep.subr.mxu0 %v7114_v9 }
 0x25a   :  { %9918 = vst [vmem:[#allocation15_spill] sm:$0xff] %v7116_v43  ;;  %1433 = vmatprep.subr.mxu1 %v7116_v43  ;;  %1273 = vmatpush1.msra.mxu0 %v7110_v25 }
 0x25b   :  { %1434 = vmatpush1.msra.mxu1 %v7112_v1  ;;  %4304 = vmatmul.mubr.msk.f32.vlgmr.msra.gmra.mrb[34].mxu0 %vm137_vm0, %v5721_v48 }
 0x25c   :  { %4320 = vmatmul.mubr.msk.f32.vlgmr.msra.gmra.mrb[34].mxu1 %vm137_vm0, %v5721_v48  ;;  %1342 = vmatprep.mubr.f32.mxu0 %v9914_v58  ;;  %v5744_v48 = vld [vmem:[%s9782_s1 + $0x38] sm:$0xff] }
 0x25d   :  { %1503 = vmatprep.mubr.f32.mxu1 %v9914_v58 }
 0x25f   :  { %4305 = vmatmul.mubr.msk.f32.gmra.mrb[36].mxu0 %vm137_vm0, %v5722_v21 }
 0x260   :  { %4321 = vmatmul.mubr.msk.f32.gmra.mrb[36].mxu1 %vm137_vm0, %v5722_v21  ;;  %1348 = vmatprep.mubr.f32.mxu0 %v9914_v58 }
 0x261   :  { %1509 = vmatprep.mubr.f32.mxu1 %v9914_v58 }
 0x263   :  { %4306 = vmatmul.mubr.msk.f32.gmra.mrb[38].mxu0 %vm137_vm0, %v5723_v5 }
 0x264   :  { %4322 = vmatmul.mubr.msk.f32.gmra.mrb[38].mxu1 %vm137_vm0, %v5723_v5  ;;  %1354 = vmatprep.mubr.f32.mxu0 %v9914_v58 }
 0x265   :  { %1515 = vmatprep.mubr.f32.mxu1 %v9914_v58 }
 0x267   :  { %4307 = vmatmul.mubr.msk.f32.gmra.mrb[40].mxu0 %vm137_vm0, %v5724_v63 }
 0x268   :  { %4323 = vmatmul.mubr.msk.f32.gmra.mrb[40].mxu1 %vm137_vm0, %v5724_v63  ;;  %1360 = vmatprep.mubr.f32.mxu0 %v9914_v58 }
 0x269   :  { %1521 = vmatprep.mubr.f32.mxu1 %v9914_v58 }
 0x26b   :  { %4308 = vmatmul.mubr.msk.f32.gmra.mrb[42].mxu0 %vm137_vm0, %v5725_v22 }
 0x26c   :  { %4324 = vmatmul.mubr.msk.f32.gmra.mrb[42].mxu1 %vm137_vm0, %v5725_v22  ;;  %1366 = vmatprep.mubr.f32.mxu0 %v9914_v58 }
 0x26d   :  { %1527 = vmatprep.mubr.f32.mxu1 %v9914_v58 }
 0x26f   :  { %4309 = vmatmul.mubr.msk.f32.gmra.mrb[44].mxu0 %vm137_vm0, %v5726_v60 }
 0x270   :  { %4325 = vmatmul.mubr.msk.f32.gmra.mrb[44].mxu1 %vm137_vm0, %v5726_v60  ;;  %1372 = vmatprep.mubr.f32.mxu0 %v9914_v58 }
 0x271   :  { %1533 = vmatprep.mubr.f32.mxu1 %v9914_v58 }
 0x273   :  { %4310 = vmatmul.mubr.msk.f32.gmra.mrb[46].mxu0 %vm137_vm0, %v5727_v27 }
 0x274   :  { %4326 = vmatmul.mubr.msk.f32.gmra.mrb[46].mxu1 %vm137_vm0, %v5727_v27  ;;  %1378 = vmatprep.mubr.f32.mxu0 %v9914_v58 }
 0x275   :  { %1539 = vmatprep.mubr.f32.mxu1 %v9914_v58 }
 0x277   :  { %4311 = vmatmul.mubr.msk.f32.gmra.mrb[48].mxu0 %vm137_vm0, %v5728_v30 }
 0x278   :  { %4327 = vmatmul.mubr.msk.f32.gmra.mrb[48].mxu1 %vm137_vm0, %v5728_v30  ;;  %1384 = vmatprep.mubr.f32.mxu0 %v9914_v58 }
 0x279   :  { %1545 = vmatprep.mubr.f32.mxu1 %v9914_v58 }
 0x27b   :  { %4312 = vmatmul.mubr.msk.f32.gmra.mrb[50].mxu0 %vm137_vm0, %v5729_v18 }
 0x27c   :  { %4328 = vmatmul.mubr.msk.f32.gmra.mrb[50].mxu1 %vm137_vm0, %v5729_v18  ;;  %1390 = vmatprep.mubr.f32.mxu0 %v9914_v58 }
 0x27d   :  { %1551 = vmatprep.mubr.f32.mxu1 %v9914_v58 }
 0x27f   :  { %4313 = vmatmul.mubr.msk.f32.gmra.mrb[52].mxu0 %vm137_vm0, %v5730_v15 }
 0x280   :  { %4329 = vmatmul.mubr.msk.f32.gmra.mrb[52].mxu1 %vm137_vm0, %v5730_v15  ;;  %1396 = vmatprep.mubr.f32.mxu0 %v9914_v58 }
 0x281   :  { %1557 = vmatprep.mubr.f32.mxu1 %v9914_v58 }
 0x283   :  { %4314 = vmatmul.mubr.msk.f32.gmra.mrb[54].mxu0 %vm137_vm0, %v5731_v10 }
 0x284   :  { %4330 = vmatmul.mubr.msk.f32.gmra.mrb[54].mxu1 %vm137_vm0, %v5731_v10  ;;  %1402 = vmatprep.mubr.f32.mxu0 %v9914_v58 }
 0x285   :  { %1563 = vmatprep.mubr.f32.mxu1 %v9914_v58 }
 0x287   :  { %4315 = vmatmul.mubr.msk.f32.gmra.mrb[56].mxu0 %vm137_vm0, %v5732_v29 }
 0x288   :  { %4331 = vmatmul.mubr.msk.f32.gmra.mrb[56].mxu1 %vm137_vm0, %v5732_v29  ;;  %1408 = vmatprep.mubr.f32.mxu0 %v9914_v58  ;;  %v1210_v29 = vpop.permute.xlu1 %1209 }
 0x289   :  { %1569 = vmatprep.mubr.f32.mxu1 %v9914_v58 }
 0x28b   :  { %4316 = vmatmul.mubr.msk.f32.gmra.mrb[58].mxu0 %vm137_vm0, %v5733_v44 }
 0x28c   :  { %4332 = vmatmul.mubr.msk.f32.gmra.mrb[58].mxu1 %vm137_vm0, %v5733_v44  ;;  %1414 = vmatprep.mubr.f32.mxu0 %v9914_v58 }
 0x28d   :  { %1575 = vmatprep.mubr.f32.mxu1 %v9914_v58 }
 0x28f   :  { %4317 = vmatmul.mubr.msk.f32.gmra.mrb[60].mxu0 %vm137_vm0, %v5734_v53 }
 0x290   :  { %4333 = vmatmul.mubr.msk.f32.gmra.mrb[60].mxu1 %vm137_vm0, %v5734_v53  ;;  %1420 = vmatprep.mubr.f32.mxu0 %v9914_v58 }
 0x291   :  { %1581 = vmatprep.mubr.f32.mxu1 %v9914_v58 }
 0x293   :  { %4318 = vmatmul.mubr.msk.f32.gmra.mrb[62].mxu0 %vm137_vm0, %v5735_v38 }
 0x294   :  { %4334 = vmatmul.mubr.msk.f32.gmra.mrb[62].mxu1 %vm137_vm0, %v5735_v38  ;;  %1426 = vmatprep.mubr.f32.mxu0 %v9914_v58  ;;  %v5745_v38 = vld [vmem:[%s9782_s1 + $0x40] sm:$0xff] }
 0x295   :  { %1587 = vmatprep.mubr.f32.mxu1 %v9914_v58 }
 0x297   :  { %4319 = vmatmul.mubr.msk.f32.gmra.mrb[64].mxu0 %vm137_vm0, %v5736_v17 }
 0x298   :  { %4335 = vmatmul.mubr.msk.f32.gmra.mrb[64].mxu1 %vm137_vm0, %v5736_v17  ;;  %2106 = vmatprep.mubr.f32.mxu0 %v9914_v58 }
 0x299   :  { %2177 = vmatprep.mubr.f32.mxu1 %v9914_v58 }
 0x32e   :  { %v1338_v4 = vpop.f32.mrb[34].mxu0 }
 0x32f   :  { %v1339_v16 = vadd.f32 %v1338_v4, %v1195_v52  ;;  %v1499_v39 = vpop.f32.mrb[34].mxu1  ;;  %v1340_v61 = vpop.f32.mrb[35].mxu0 }
 0x330   :  { %v1500_v56 = vadd.f32 %v1499_v39, %v1195_v52  ;;  %v1341_v28 = vadd.f32 %v1340_v61, %v1195_v52  ;;  %v1501_v20 = vpop.f32.mrb[35].mxu1 }
 0x331   :  { %v7237_v31 = vadd.f32 %v5737_v0, %v1339_v16  ;;  %v1502_v7 = vadd.f32 %v1501_v20, %v1195_v52  ;;  %v5746_v16 = vld [vmem:[%s9782_s1 + $0x50] sm:$0xff] }
 0x332   :  { %v7242_v12 = vadd.f32 %v5738_v51, %v1500_v56  ;;  %v7247_v57 = vadd.f32 %v5739_v32, %v1341_v28  ;;  %v1344_v3 = vpop.f32.mrb[36].mxu0  ;;  %v5747_v32 = vld [vmem:[%s9782_s1 + $0x48] sm:$0xff] }
 0x333   :  { %v1658_v41 = vsub.f32 0.0, %v7237_v31  ;;  %v7253_v55 = vadd.f32 %v5740_v23, %v1502_v7  ;;  %v1345_v54 = vadd.f32 %v1344_v3, %v1200_v37  ;;  %v1505_v24 = vpop.f32.mrb[36].mxu1  ;;  %v1346_v59 = vpop.f32.mrb[37].mxu0 }
 0x334   :  { %v1660_v8 = vsub.f32 0.0, %v7242_v12  ;;  %v1659_v34 = vsub.f32 0.0, %v7247_v57  ;;  %v1506_v19 = vadd.f32 %v1505_v24, %v1200_v37  ;;  %v1347_v14 = vadd.f32 %v1346_v59, %v1200_v37  ;;  %v1507_v46 = vpop.f32.mrb[37].mxu1  ;;  %v5749_v59 = vld [vmem:[%s9782_s1 + $0x60] sm:$0xff] }
 0x335   :  { %v1722_v50 = vmul.f32 1.442695, %v1658_v41  ;;  %v1661_v13 = vsub.f32 0.0, %v7253_v55  ;;  %v7261_v33 = vadd.f32 %v5741_v62, %v1345_v54  ;;  %v1508_v36 = vadd.f32 %v1507_v46, %v1200_v37  ;;  %v5748_v54 = vld [vmem:[%s9782_s1 + $0x58] sm:$0xff]  ;;  %v5750_v46 = vld [vmem:[%s9782_s1 + $0x70] sm:$0xff] }
 0x336   :  { %v1726_v2 = vmul.f32 1.442695, %v1660_v8  ;;  %v1724_v45 = vmul.f32 1.442695, %v1659_v34  ;;  %v7266_v6 = vadd.f32 %v5742_v42, %v1506_v19  ;;  %v7271_v40 = vadd.f32 %v5743_v26, %v1347_v14  ;;  %v1350_v11 = vpop.f32.mrb[38].mxu0 }
 0x337   :  { %4949 = vpow2.f32 %v1722_v50  ;;  %v1728_v35 = vmul.f32 1.442695, %v1661_v13  ;;  %v1662_v49 = vsub.f32 0.0, %v7261_v33  ;;  %v7277_v21 = vadd.f32 %v5744_v48, %v1508_v36  ;;  %v1511_v5 = vpop.f32.mrb[38].mxu1  ;;  %v1352_v63 = vpop.f32.mrb[39].mxu0 }
 0x338   :  { %4951 = vpow2.f32 %v1726_v2  ;;  %v1664_v22 = vsub.f32 0.0, %v7266_v6  ;;  %v1663_v60 = vsub.f32 0.0, %v7271_v40  ;;  %v1351_v27 = vadd.f32 %v1350_v11, %v1205_v47  ;;  %v1513_v30 = vpop.f32.mrb[39].mxu1 }
 0x339   :  { %4953 = vpow2.f32 %v1724_v45  ;;  %v1730_v18 = vmul.f32 1.442695, %v1662_v49  ;;  %v1665_v15 = vsub.f32 0.0, %v7277_v21  ;;  %v1512_v10 = vadd.f32 %v1511_v5, %v1205_v47 }
 0x33a   :  { %4955 = vpow2.f32 %v1728_v35  ;;  %v1734_v44 = vmul.f32 1.442695, %v1664_v22  ;;  %v1732_v53 = vmul.f32 1.442695, %v1663_v60  ;;  %v7285_v17 = vadd.f32 %v5745_v38, %v1351_v27  ;;  %v1356_v52 = vpop.f32.mrb[40].mxu0  ;;  %v1215_v35 = vpop.permute.xlu0 %1214  ;;  %v5751_v27 = vld [vmem:[%s9782_s1 + $0x68] sm:$0xff] }
 0x33b   :  { %4957 = vpow2.f32 %v1730_v18  ;;  %v1736_v4 = vmul.f32 1.442695, %v1665_v15  ;;  %v7290_v39 = vadd.f32 %v5746_v16, %v1512_v10  ;;  %v1353_v61 = vadd.f32 %v1352_v63, %v1205_v47  ;;  %v1517_v56 = vpop.f32.mrb[40].mxu1  ;;  %v1358_v28 = vpop.f32.mrb[41].mxu0 }
 0x33c   :  { %4959 = vpow2.f32 %v1734_v44  ;;  %v1666_v20 = vsub.f32 0.0, %v7285_v17  ;;  %v1514_v0 = vadd.f32 %v1513_v30, %v1205_v47  ;;  %v1357_v7 = vadd.f32 %v1356_v52, %v1210_v29  ;;  %v1519_v37 = vpop.f32.mrb[41].mxu1 }
 0x33d   :  { %4961 = vpow2.f32 %v1732_v53  ;;  %v1668_v51 = vsub.f32 0.0, %v7290_v39  ;;  %v7297_v3 = vadd.f32 %v5747_v32, %v1353_v61  ;;  %v1518_v41 = vadd.f32 %v1517_v56, %v1210_v29 }
 0x33e   :  { %4963 = vpow2.f32 %v1736_v4  ;;  %v1738_v23 = vmul.f32 1.442695, %v1666_v20  ;;  %v7302_v24 = vadd.f32 %v5748_v54, %v1514_v0  ;;  %v7307_v8 = vadd.f32 %v5749_v59, %v1357_v7  ;;  %v1362_v34 = vpop.f32.mrb[42].mxu0  ;;  %v5752_v20 = vld [vmem:[%s9782_s1 + $0x78] sm:$0xff]  ;;  %v5753_v7 = vld [vmem:[%s9782_s1 + $0x80] sm:$0xff] }
 0x33f   :  { %v1742_v19 = vmul.f32 1.442695, %v1668_v51  ;;  %v1667_v14 = vsub.f32 0.0, %v7297_v3  ;;  %v7313_v50 = vadd.f32 %v5750_v46, %v1518_v41  ;;  %v1359_v13 = vadd.f32 %v1358_v28, %v1210_v29  ;;  %v1523_v62 = vpop.f32.mrb[42].mxu1  ;;  %v1364_v36 = vpop.f32.mrb[43].mxu0 }
 0x340   :  { %4965 = vpow2.f32 %v1738_v23  ;;  %v1669_v47 = vsub.f32 0.0, %v7302_v24  ;;  %v1525_v2 = vpop.f32.mrb[43].mxu1  ;;  %v1670_v26 = vsub.f32 0.0, %v7307_v8  ;;  %v1520_v48 = vadd.f32 %v1519_v37, %v1210_v29  ;;  %v5754_v23 = vld [vmem:[%s9782_s1 + $0x90] sm:$0xff] }
 0x341   :  { %v4950_v45 = vpop.eup %4949  ;;  %4967 = vpow2.f32 %v1742_v19  ;;  %v1740_v42 = vmul.f32 1.442695, %v1667_v14  ;;  %v1672_v60 = vsub.f32 0.0, %v7313_v50  ;;  %v7321_v30 = vadd.f32 %v5751_v27, %v1359_v13 }
 0x342   :  { %v4952_v11 = vpop.eup %4951  ;;  %v1850_v49 = vadd.f32 1.0, %v4950_v45  ;;  %v1368_v5 = vpop.f32.mrb[44].mxu0  ;;  %v1744_v29 = vmul.f32 1.442695, %v1669_v47  ;;  %v1363_v53 = vadd.f32 %v1362_v34, %v1215_v35  ;;  %v1746_v16 = vmul.f32 1.442695, %v1670_v26 }
 0x343   :  { %v4954_v63 = vpop.eup %4953  ;;  %v1852_v22 = vadd.f32 1.0, %v4952_v11  ;;  %4969 = vpow2.f32 %v1740_v42  ;;  %v7323_v18 = vpop.f32.mrb[44].mxu1  ;;  %v1524_v61 = vadd.f32 %v1523_v62, %v1215_v35  ;;  %v7332_v0 = vadd.f32 %v5752_v20, %v1520_v48 }
 0x344   :  { %v7325_v15 = vpop.f32.mrb[45].mxu0  ;;  %v4956_v10 = vpop.eup %4955  ;;  %4971 = vrcp.f32 %v1850_v49  ;;  %v1851_v44 = vadd.f32 1.0, %v4954_v63  ;;  %v7337_v37 = vadd.f32 %v5753_v7, %v1363_v53  ;;  %v1365_v59 = vadd.f32 %v1364_v36, %v1215_v35  ;;  %v5755_v36 = vld [vmem:[%s9782_s1 + $0x88] sm:$0xff] }
 0x345   :  { %v7327_v38 = vpop.f32.mrb[45].mxu1  ;;  %v4958_v52 = vpop.eup %4957  ;;  %4973 = vrcp.f32 %v1852_v22  ;;  %v1853_v4 = vadd.f32 1.0, %v4956_v10  ;;  %v7344_v54 = vadd.f32 %v5754_v23, %v1524_v61  ;;  %v1750_v13 = vmul.f32 1.442695, %v1672_v60 }
 0x346   :  { %v4960_v56 = vpop.eup %4959  ;;  %4975 = vrcp.f32 %v1851_v44  ;;  %v1854_v28 = vadd.f32 1.0, %v4958_v52  ;;  %v7339_v51 = vpop.f32.mrb[46].mxu0  ;;  %v1526_v62 = vadd.f32 %v1525_v2, %v1215_v35  ;;  %v1671_v26 = vsub.f32 0.0, %v7321_v30  ;;  %v5756_v2 = vld [vmem:[%s9782_s1 + $0x98] sm:$0xff] }
 0x347   :  { %v4962_v32 = vpop.eup %4961  ;;  %4977 = vrcp.f32 %v1853_v4  ;;  %v1856_v41 = vadd.f32 1.0, %v4960_v56  ;;  %v7346_v34 = vpop.f32.mrb[46].mxu1  ;;  %v7356_v11 = vadd.f32 %v5755_v36, %v1365_v59  ;;  %v1673_v48 = vsub.f32 0.0, %v7332_v0  ;;  %v5758_v36 = vld [vmem:[%s9782_s1 + $0xb0] sm:$0xff] }
 0x348   :  { %v7348_v19 = vpop.f32.mrb[47].mxu0  ;;  %v4964_v14 = vpop.eup %4963  ;;  %4979 = vrcp.f32 %v1854_v28  ;;  %v1855_v46 = vadd.f32 1.0, %v4962_v32  ;;  %v7362_v35 = vadd.f32 %v5756_v2, %v1526_v62  ;;  %v1674_v10 = vsub.f32 0.0, %v7337_v37 }
 0x349   :  { %v7350_v47 = vpop.f32.mrb[47].mxu1  ;;  %v1220_v45 = vpop.permute.xlu1 %1219  ;;  %4981 = vrcp.f32 %v1856_v41  ;;  %v1857_v42 = vadd.f32 1.0, %v4964_v14  ;;  %v1676_v44 = vsub.f32 0.0, %v7344_v54  ;;  %v1675_v61 = vsub.f32 0.0, %v7356_v11 }
 0x34a   :  { %v4966_v49 = vpop.eup %4965  ;;  %4983 = vrcp.f32 %v1855_v46  ;;  %v1369_v63 = vadd.f32 %v1368_v5, %v1220_v45  ;;  %v7364_v22 = vpop.f32.mrb[48].mxu0  ;;  %v5757_v5 = vld [vmem:[%s9782_s1 + $0xa0] sm:$0xff]  ;;  %v1677_v7 = vsub.f32 0.0, %v7362_v35  ;;  %v1530_v32 = vadd.f32 %v7323_v18, %v1220_v45  ;;  %v5759_v18 = vld [vmem:[%s9782_s1 + $0xa8] sm:$0xff] }
 0x34b   :  { %v4968_v60 = vpop.eup %4967  ;;  %4985 = vrcp.f32 %v1857_v42  ;;  %v1858_v27 = vadd.f32 1.0, %v4966_v49  ;;  %v7368_v53 = vpop.f32.mrb[48].mxu1  ;;  %v1371_v41 = vadd.f32 %v7325_v15, %v1220_v45  ;;  %v1748_v59 = vmul.f32 1.442695, %v1671_v26 }
 0x34c   :  { %v7370_v52 = vpop.f32.mrb[49].mxu0  ;;  %v1860_v4 = vadd.f32 1.0, %v4968_v60  ;;  %4987 = vpow2.f32 %v1744_v29  ;;  %v7376_v56 = vadd.f32 %v5757_v5, %v1369_v63  ;;  %v7378_v28 = vpop.f32.mrb[49].mxu1  ;;  %v1752_v14 = vmul.f32 1.442695, %v1673_v48 }
 0x34d   :  { %v4970_v20 = vpop.eup %4969  ;;  %4989 = vrcp.f32 %v1858_v27  ;;  %v1754_v42 = vmul.f32 1.442695, %v1674_v10  ;;  %v7388_v49 = vadd.f32 %v5758_v36, %v1530_v32  ;;  %v7393_v15 = vadd.f32 %v5759_v18, %v1371_v41  ;;  %v1230_v25 = vpop.permute.xlu1 %1229 }
 0x34e   :  { %v4972_v23 = vpop.eup %4971  ;;  %4991 = vrcp.f32 %v1860_v4  ;;  %v1859_v29 = vadd.f32 1.0, %v4970_v20  ;;  %v7383_v46 = vpop.f32.mrb[50].mxu0  ;;  %v1678_v63 = vsub.f32 0.0, %v7376_v56  ;;  %v1532_v60 = vadd.f32 %v7327_v38, %v1220_v45 }
 0x34f   :  { %v4974_v62 = vpop.eup %4973  ;;  %4993 = vpow2.f32 %v1746_v16  ;;  %9919 = vst [vmem:[#allocation9_spill] sm:$0xff] %v7393_v15  ;;  %v7395_v2 = vpop.f32.mrb[50].mxu1  ;;  %v1758_v16 = vmul.f32 1.442695, %v1676_v44  ;;  %v7404_v5 = vmul.f32 %v4972_v23, %v7237_v31  ;;  %v1756_v20 = vmul.f32 1.442695, %v1675_v61 }
 0x350   :  { %v7397_v26 = vpop.f32.mrb[51].mxu0  ;;  %v4976_v48 = vpop.eup %4975  ;;  %4995 = vrcp.f32 %v1859_v29  ;;  %v1760_v32 = vmul.f32 1.442695, %v1677_v7  ;;  %v1680_v36 = vsub.f32 0.0, %v7388_v49  ;;  %v5760_v44 = vld [vmem:[%s9782_s1 + $0xb8] sm:$0xff]  ;;  %v7416_v31 = vmul.f32 %v4974_v62, %v7242_v12 }
 0x351   :  { %v7401_v27 = vpop.f32.mrb[51].mxu1  ;;  %v4978_v10 = vpop.eup %4977  ;;  %4997 = vpow2.f32 %v1750_v13  ;;  %v7410_v29 = vadd.f32 %v5760_v44, %v1532_v60  ;;  %v1679_v61 = vsub.f32 0.0, %v7393_v15  ;;  %v7427_v60 = vmul.f32 %v4976_v48, %v7247_v57 }
 0x352   :  { %v1225_v4 = vpop.permute.xlu0 %1224  ;;  %v4980_v41 = vpop.eup %4979  ;;  %4999 = vpow2.f32 %v1748_v59  ;;  %v1762_v12 = vmul.f32 1.442695, %v1678_v63 }
 0x353   :  { %9920 = vst [vmem:[#allocation16_spill] sm:$0xff] %v7410_v29  ;;  %v1375_v38 = vadd.f32 %v7339_v51, %v1225_v4  ;;  %v7413_v45 = vpop.f32.mrb[52].mxu0  ;;  %v4982_v18 = vpop.eup %4981  ;;  %v7419_v13 = vmul.f32 %v4980_v41, %v7261_v33  ;;  %5001 = vpow2.f32 %v1752_v14  ;;  %v1681_v41 = vsub.f32 0.0, %v7410_v29 }
 0x354   :  { %v7422_v7 = vpop.f32.mrb[52].mxu1  ;;  %v7424_v23 = vpop.f32.mrb[53].mxu0  ;;  %v7430_v51 = vmul.f32 %v4982_v18, %v7266_v6  ;;  %5003 = vpow2.f32 %v1754_v42  ;;  %v1536_v44 = vadd.f32 %v7346_v34, %v1225_v4  ;;  %v1766_v6 = vmul.f32 1.442695, %v1680_v36  ;;  %v5761_v42 = vld [vmem:[%s9782_s1 + $0xc0] sm:$0xff]  ;;  %v5762_v36 = vld [vmem:[%s9782_s1 + $0xd0] sm:$0xff] }
 0x355   :  { %v4984_v59 = vpop.eup %4983  ;;  %v7432_v62 = vpop.f32.mrb[53].mxu1  ;;  %5005 = vpow2.f32 %v1758_v16  ;;  %v7443_v48 = vadd.f32 %v5761_v42, %v1375_v38  ;;  %v7448_v16 = vmul.f32 %v4978_v10, %v7253_v55  ;;  %v1764_v34 = vmul.f32 1.442695, %v1679_v61 }
 0x356   :  { %v4986_v33 = vpop.eup %4985  ;;  %5007 = vpow2.f32 %v1756_v20  ;;  %v7445_v63 = vpop.f32.mrb[54].mxu0  ;;  %v7457_v38 = vadd.f32 %v5762_v36, %v1536_v44  ;;  %v1377_v42 = vadd.f32 %v7348_v19, %v1225_v4  ;;  %v1538_v55 = vadd.f32 %v7350_v47, %v1225_v4  ;;  %v5763_v47 = vld [vmem:[%s9782_s1 + $0xc8] sm:$0xff] }
 0x357   :  { %v4988_v43 = vpop.eup %4987  ;;  %5009 = vpow2.f32 %v1760_v32  ;;  %v7450_v9 = vpop.f32.mrb[54].mxu1  ;;  %v7464_v32 = vmul.f32 %v4984_v59, %v7271_v40  ;;  %v7467_v61 = vmul.f32 %v4986_v33, %v7277_v21  ;;  %v1682_v19 = vsub.f32 0.0, %v7443_v48  ;;  %v5764_v33 = vld [vmem:[%s9782_s1 + $0xd8] sm:$0xff] }
 0x358   :  { %v4990_v18 = vpop.eup %4989  ;;  %v1861_v14 = vadd.f32 1.0, %v4988_v43  ;;  %v7452_v57 = vpop.f32.mrb[55].mxu0  ;;  %5011 = vpow2.f32 %v1762_v12  ;;  %9921 = vst [vmem:[#allocation17_spill] sm:$0xff] %v7457_v38  ;;  %v1768_v12 = vmul.f32 1.442695, %v1681_v41  ;;  %v7475_v4 = vadd.f32 %v5763_v47, %v1377_v42 }
 0x359   :  { %v4992_v20 = vpop.eup %4991  ;;  %v7461_v10 = vpop.f32.mrb[55].mxu1  ;;  %v7480_v21 = vmul.f32 %v4990_v18, %v7285_v17  ;;  %v1381_v41 = vadd.f32 %v7364_v22, %v1230_v25  ;;  %v1684_v18 = vsub.f32 0.0, %v7457_v38  ;;  %v5765_v22 = vld [vmem:[%s9782_s1 + $0xe0] sm:$0xff] }
 0x35a   :  { %v4994_v43 = vpop.eup %4993  ;;  %5013 = vrcp.f32 %v1861_v14  ;;  %9922 = vst [vmem:[#allocation12_spill] sm:$0xff] %v7475_v4  ;;  %v7477_v40 = vpop.f32.mrb[56].mxu0  ;;  %v7485_v14 = vadd.f32 %v5764_v33, %v1538_v55  ;;  %v1683_v55 = vsub.f32 0.0, %v7475_v4 }
 0x35b   :  { %v7469_v1 = vpop.eup %4995  ;;  %v1862_v44 = vadd.f32 1.0, %v4994_v43  ;;  %5015 = vpow2.f32 %v1766_v6  ;;  %v7488_v6 = vpop.f32.mrb[56].mxu1  ;;  %v7493_v43 = vmul.f32 %v4992_v20, %v7290_v39  ;;  %v7502_v33 = vadd.f32 %v5765_v22, %v1381_v41 }
 0x35c   :  { %v4998_v59 = vpop.eup %4997  ;;  %5017 = vpow2.f32 %v1764_v34  ;;  %9923 = vst [vmem:[#allocation13_spill] sm:$0xff] %v7485_v14  ;;  %v7490_v36 = vpop.f32.mrb[57].mxu0  ;;  %v1770_v20 = vmul.f32 1.442695, %v1682_v19  ;;  %v1383_v19 = vadd.f32 %v7370_v52, %v1230_v25 }
 0x35d   :  { %v5000_v42 = vpop.eup %4999  ;;  %9924 = vst [vmem:[#allocation18_spill] sm:$0xff] %v7493_v43  ;;  %5019 = vrcp.f32 %v1862_v44  ;;  %v1864_v17 = vadd.f32 1.0, %v4998_v59  ;;  %v7496_v34 = vpop.f32.mrb[57].mxu1  ;;  %9926 = vst [vmem:[#allocation20_spill] sm:$0xff] %v7502_v33  ;;  %v1542_v44 = vadd.f32 %v7368_v53, %v1230_v25  ;;  %v1686_v4 = vsub.f32 0.0, %v7502_v33 }
 0x35e   :  { %9925 = vst [vmem:[#allocation19_spill] sm:$0xff] %v7496_v34  ;;  %v5002_v47 = vpop.eup %5001  ;;  %v1863_v58 = vadd.f32 1.0, %v5000_v42  ;;  %5021 = vpow2.f32 %v1768_v12  ;;  %v7505_v59 = vpop.f32.mrb[58].mxu0  ;;  %v1685_v12 = vsub.f32 0.0, %v7485_v14  ;;  %v1544_v53 = vadd.f32 %v7378_v28, %v1230_v25  ;;  %v5767_v25 = vld [vmem:[%s9782_s1 + $0xe8] sm:$0xff] }
 0x35f   :  { %v5004_v29 = vpop.eup %5003  ;;  %5023 = vrcp.f32 %v1864_v17  ;;  %v1865_v39 = vadd.f32 1.0, %v5002_v47  ;;  %9927 = vst [vmem:[#allocation21_spill] sm:$0xff] %v7505_v59  ;;  %v7509_v38 = vpop.f32.mrb[58].mxu1  ;;  %v7517_v14 = vmul.f32 1.442695, %v1683_v55  ;;  %v7527_v52 = vadd.f32 %v5767_v25, %v1383_v19 }
 0x360   :  { %v5006_v15 = vpop.eup %5005  ;;  %5025 = vrcp.f32 %v1863_v58  ;;  %v1866_v42 = vadd.f32 1.0, %v5004_v29  ;;  %9928 = vst [vmem:[#allocation22_spill] sm:$0xff] %v7509_v38  ;;  %v7511_v34 = vpop.f32.mrb[59].mxu0  ;;  %v1774_v29 = vmul.f32 1.442695, %v1684_v18  ;;  %v7543_v19 = vmul.f32 %v7469_v1, %v7297_v3 }
 0x361   :  { %v5008_v41 = vpop.eup %5007  ;;  %5027 = vrcp.f32 %v1865_v39  ;;  %v1868_v17 = vadd.f32 1.0, %v5006_v15  ;;  %v7515_v47 = vpop.f32.mrb[59].mxu1  ;;  %v5766_v15 = vld [vmem:[%s9782_s1 + $0xf0] sm:$0xff]  ;;  %v1687_v3 = vsub.f32 0.0, %v7527_v52 }
 0x362   :  { %9929 = vst [vmem:[#allocation23_spill] sm:$0xff] %v7515_v47  ;;  %v5010_v22 = vpop.eup %5009  ;;  %5029 = vrcp.f32 %v1866_v42  ;;  %v1867_v58 = vadd.f32 1.0, %v5008_v41  ;;  %v1235_v33 = vpop.permute.xlu0 %1234  ;;  %v7522_v39 = vadd.f32 %v5766_v15, %v1542_v44  ;;  %v5768_v42 = vld [vmem:[%s9782_s1 + $0xf8] sm:$0xff] }
 0x363   :  { %v5012_v59 = vpop.eup %5011  ;;  %5031 = vrcp.f32 %v1868_v17  ;;  %v1869_v38 = vadd.f32 1.0, %v5010_v22  ;;  %v7529_v28 = vpop.f32.mrb[60].mxu0  ;;  %v7534_v41 = vadd.f32 %v5768_v42, %v1544_v53  ;;  %v1387_v44 = vadd.f32 %v7383_v46, %v1235_v33  ;;  %v5769_v46 = vld [vmem:[%s9782_s1 + $0x100] sm:$0xff] }
 0x364   :  { %9930 = vst [vmem:[#allocation24_spill] sm:$0xff] %v7529_v28  ;;  %v5014_v18 = vpop.eup %5013  ;;  %5033 = vrcp.f32 %v1867_v58  ;;  %v1870_v55 = vadd.f32 1.0, %v5012_v59  ;;  %v7537_v17 = vpop.f32.mrb[60].mxu1  ;;  %v1776_v58 = vmul.f32 1.442695, %v1685_v12  ;;  %v1688_v1 = vsub.f32 0.0, %v7522_v39 }
 0x365   :  { %9931 = vst [vmem:[#allocation25_spill] sm:$0xff] %v7537_v17  ;;  %v7539_v22 = vpop.f32.mrb[61].mxu0  ;;  %v5016_v15 = vpop.eup %5015  ;;  %5035 = vrcp.f32 %v1869_v38  ;;  %v1778_v59 = vmul.f32 1.442695, %v1686_v4  ;;  %v7550_v42 = vadd.f32 %v5769_v46, %v1387_v44 }
 0x366   :  { %9932 = vst [vmem:[#allocation26_spill] sm:$0xff] %v7539_v22  ;;  %v7545_v25 = vpop.f32.mrb[61].mxu1  ;;  %v5018_v28 = vpop.eup %5017  ;;  %5037 = vrcp.f32 %v1870_v55  ;;  %v1872_v53 = vadd.f32 1.0, %v5016_v15  ;;  %v1548_v22 = vadd.f32 %v7395_v2, %v1235_v33  ;;  %v1689_v55 = vsub.f32 0.0, %v7534_v41  ;;  %v5770_v2 = vld [vmem:[%s9782_s1 + $0x110] sm:$0xff] }
 0x367   :  { %9933 = vst [vmem:[#allocation27_spill] sm:$0xff] %v7545_v25  ;;  %v5020_v17 = vpop.eup %5019  ;;  %v1871_v47 = vadd.f32 1.0, %v5018_v28  ;;  %5039 = vpow2.f32 %v1770_v20  ;;  %v7555_v38 = vpop.f32.mrb[62].mxu0 }
 0x368   :  { %9934 = vst [vmem:[#allocation28_spill] sm:$0xff] %v7555_v38  ;;  %v5022_v4 = vpop.eup %5021  ;;  %v7558_v12 = vmul.f32 %v5020_v17, %v7307_v8  ;;  %5041 = vrcp.f32 %v1872_v53  ;;  %v7564_v44 = vadd.f32 %v5770_v2, %v1548_v22  ;;  %v7566_v20 = vpop.f32.mrb[62].mxu1  ;;  %v1389_v38 = vadd.f32 %v7397_v26, %v1235_v33  ;;  %v5771_v26 = vld [vmem:[%s9782_s1 + $0x108] sm:$0xff] }
 0x369   :  { %9935 = vst [vmem:[#allocation29_spill] sm:$0xff] %v7566_v20  ;;  %v7568_v28 = vpop.f32.mrb[63].mxu0  ;;  %v5024_v15 = vpop.eup %5023  ;;  %5043 = vrcp.f32 %v1871_v47  ;;  %v1873_v46 = vadd.f32 1.0, %v5022_v4  ;;  %v1550_v8 = vadd.f32 %v7401_v27, %v1235_v33  ;;  %v1690_v2 = vsub.f32 0.0, %v7550_v42 }
 0x36a   :  { %9936 = vst [vmem:[#allocation6_spill] sm:$0xff] %v7568_v28  ;;  %v7572_v17 = vpop.f32.mrb[63].mxu1  ;;  %v5026_v53 = vpop.eup %5025  ;;  %v7577_v22 = vmul.f32 %v5024_v15, %v7313_v50  ;;  %5045 = vpow2.f32 %v1774_v29  ;;  %v1782_v47 = vmul.f32 1.442695, %v1688_v1  ;;  %v1692_v4 = vsub.f32 0.0, %v7564_v44  ;;  %v5772_v1 = vld [vmem:[%s9782_s1 + $0x118] sm:$0xff] }
 0x36b   :  { %9937 = vst [vmem:[#allocation11_spill] sm:$0xff] %v7572_v17  ;;  %v5028_v28 = vpop.eup %5027  ;;  %5047 = vrcp.f32 %v1873_v46  ;;  %v7584_v27 = vadd.f32 %v5771_v26, %v1389_v38  ;;  %v7586_v33 = vpop.f32.mrb[64].mxu0  ;;  %v1780_v29 = vmul.f32 1.442695, %v1687_v3  ;;  %v7594_v15 = vadd.f32 %v5772_v1, %v1550_v8 }
 0x36c   :  { %9938 = vst [vmem:[#allocation10_spill] sm:$0xff] %v7577_v22  ;;  %9939 = vst [vmem:[#allocation7_spill] sm:$0xff] %v7586_v33  ;;  %v5030_v25 = vpop.eup %5029  ;;  %5049 = vpow2.f32 %v7517_v14  ;;  %v7596_v46 = vpop.f32.mrb[64].mxu1  ;;  %v7601_v33 = vmul.f32 %v5014_v18, %v7302_v24  ;;  %v1784_v50 = vmul.f32 1.442695, %v1689_v55 }
 0x36d   :  { %9940 = vst [vmem:[#allocation30_spill] sm:$0xff] %v7596_v46  ;;  %v7598_v17 = vpop.f32.mrb[65].mxu0  ;;  %v5032_v38 = vpop.eup %5031  ;;  %5051 = vpow2.f32 %v1776_v58  ;;  %v1691_v14 = vsub.f32 0.0, %v7584_v27  ;;  %v1786_v43 = vmul.f32 1.442695, %v1690_v2  ;;  %v1693_v8 = vsub.f32 0.0, %v7594_v15 }
 0x36e   :  { %9941 = vst [vmem:[#allocation31_spill] sm:$0xff] %v7598_v17  ;;  %v1240_v26 = vpop.permute.xlu1 %1239  ;;  %v7604_v3 = vpop.f32.mrb[65].mxu1  ;;  %5053 = vpow2.f32 %v1778_v59  ;;  %v7609_v17 = vmul.f32 %v5030_v25, %v7337_v37  ;;  %v1790_v24 = vmul.f32 1.442695, %v1692_v4  ;;  %v5773_v59 = vld [vmem:[%s9782_s1 + $0x120] sm:$0xff]  ;;  %v5774_v37 = vld [vmem:[%s9782_s1 + $0x130] sm:$0xff] }
 0x36f   :  { %9942 = vst [vmem:[#allocation32_spill] sm:$0xff] %v7604_v3  ;;  %v5034_v20 = vpop.eup %5033  ;;  %v1393_v1 = vadd.f32 %v7413_v45, %v1240_v26  ;;  %5055 = vpow2.f32 %v1782_v47  ;;  %v1554_v18 = vadd.f32 %v7422_v7, %v1240_v26  ;;  %v1788_v55 = vmul.f32 1.442695, %v1691_v14 }
 0x370   :  { %v5036_v46 = vpop.eup %5035  ;;  %5057 = vpow2.f32 %v1780_v29  ;;  %v1792_v22 = vmul.f32 1.442695, %v1693_v8  ;;  %v1395_v25 = vadd.f32 %v7424_v23, %v1240_v26  ;;  %v1556_v14 = vadd.f32 %v7432_v62, %v1240_v26  ;;  %v5775_v62 = vld [vmem:[%s9782_s1 + $0x128] sm:$0xff] }
 0x371   :  { %v5038_v58 = vpop.eup %5037  ;;  %v7615_v2 = vadd.f32 %v5773_v59, %v1393_v1  ;;  %5059 = vpow2.f32 %v1784_v50  ;;  %v7623_v7 = vadd.f32 %v5774_v37, %v1554_v18  ;;  %v7654_v18 = vmul.f32 %v5034_v20, %v7356_v11  ;;  %v5776_v59 = vld [vmem:[%s9782_s1 + $0x138] sm:$0xff] }
 0x372   :  { %v5040_v3 = vpop.eup %5039  ;;  %v7618_v45 = vmul.f32 %v5038_v58, %v7376_v56  ;;  %5061 = vpow2.f32 %v1786_v43  ;;  %v7631_v56 = vmul.f32 %v5032_v38, %v7344_v54  ;;  %v7644_v26 = vadd.f32 %v5775_v62, %v1395_v25 }
 0x373   :  { %v5042_v47 = vpop.eup %5041  ;;  %v1874_v4 = vadd.f32 1.0, %v5040_v3  ;;  %v1694_v29 = vsub.f32 0.0, %v7615_v2  ;;  %5063 = vpow2.f32 %v1790_v24  ;;  %v7639_v3 = vmul.f32 %v5026_v53, %v7321_v30  ;;  %v1245_v53 = vpop.permute.xlu0 %1244 }
 0x374   :  { %v7628_v8 = vpop.eup %5043  ;;  %v7636_v1 = vmul.f32 %v5042_v47, %v7388_v49  ;;  %v7649_v38 = vmul.f32 %v5028_v28, %v7332_v0  ;;  %v1696_v58 = vsub.f32 0.0, %v7623_v7  ;;  %v7660_v37 = vadd.f32 %v5776_v59, %v1556_v14 }
 0x375   :  { %v5046_v23 = vpop.eup %5045  ;;  %5065 = vrcp.f32 %v1874_v4  ;;  %v1794_v43 = vmul.f32 1.442695, %v1694_v29  ;;  %v1399_v25 = vadd.f32 %v7445_v63, %v1245_v53  ;;  %v7665_v11 = vmul.f32 %v5036_v46, %v7362_v35  ;;  %v5778_v35 = vld [vmem:[%s9782_s1 + $0x150] sm:$0xff] }
 0x376   :  { %v7646_v54 = vpop.eup %5047  ;;  %v1876_v24 = vadd.f32 1.0, %v5046_v23  ;;  %5067 = vpow2.f32 %v1788_v55  ;;  %v1560_v55 = vadd.f32 %v7450_v9, %v1245_v53  ;;  %v1697_v14 = vsub.f32 0.0, %v7660_v37  ;;  %v5777_v23 = vld [vmem:[%s9782_s1 + $0x140] sm:$0xff] }
 0x377   :  { %v5050_v30 = vpop.eup %5049  ;;  %5069 = vpow2.f32 %v1792_v22  ;;  %v1695_v22 = vsub.f32 0.0, %v7644_v26  ;;  %v7672_v63 = vadd.f32 %v5777_v23, %v1399_v25  ;;  %v1798_v59 = vmul.f32 1.442695, %v1696_v58 }
 0x378   :  { %v5052_v0 = vpop.eup %5051  ;;  %5071 = vrcp.f32 %v1876_v24  ;;  %v1875_v28 = vadd.f32 1.0, %v5050_v30  ;;  %v7677_v46 = vadd.f32 %v5778_v35, %v1560_v55  ;;  %v1562_v55 = vadd.f32 %v7461_v10, %v1245_v53 }
 0x379   :  { %v5054_v47 = vpop.eup %5053  ;;  %v1877_v20 = vadd.f32 1.0, %v5052_v0  ;;  %5073 = vpow2.f32 %v1794_v43  ;;  %v1401_v43 = vadd.f32 %v7452_v57, %v1245_v53  ;;  %v1698_v0 = vsub.f32 0.0, %v7672_v63 }
 0x37a   :  { %v5056_v4 = vpop.eup %5055  ;;  %5075 = vrcp.f32 %v1875_v28  ;;  %v1878_v29 = vadd.f32 1.0, %v5054_v47  ;;  %v5779_v47 = vld [vmem:[%s9782_s1 + $0x148] sm:$0xff]  ;;  %v1796_v23 = vmul.f32 1.442695, %v1695_v22  ;;  %v1700_v35 = vsub.f32 0.0, %v7677_v46 }
 0x37b   :  { %v5058_v9 = vpop.eup %5057  ;;  %5077 = vrcp.f32 %v1877_v20  ;;  %v1880_v62 = vadd.f32 1.0, %v5056_v4  ;;  %v7684_v20 = vadd.f32 %v5779_v47, %v1401_v43  ;;  %v1802_v47 = vmul.f32 1.442695, %v1698_v0 }
 0x37c   :  { %v5060_v24 = vpop.eup %5059  ;;  %5079 = vrcp.f32 %v1878_v29  ;;  %v1879_v30 = vadd.f32 1.0, %v5058_v9  ;;  %v1800_v29 = vmul.f32 1.442695, %v1697_v14  ;;  %v4496_v10 = vpack.c.bf16 %v7464_v32, %v7427_v60  ;;  %v1250_v14 = vpop.permute.xlu1 %1249 }
 0x37d   :  { %v5062_v28 = vpop.eup %5061  ;;  %5081 = vrcp.f32 %v1880_v62  ;;  %v1881_v25 = vadd.f32 1.0, %v5060_v24  ;;  %v5780_v62 = vld [vmem:[%s9782_s1 + $0x158] sm:$0xff]  ;;  %v4528_v53 = vpack.c.bf16 %v7467_v61, %v7448_v16  ;;  %v1405_v0 = vadd.f32 %v7477_v40, %v1250_v14 }
 0x37e   :  { %v5064_v4 = vpop.eup %5063  ;;  %5083 = vrcp.f32 %v1879_v30  ;;  %v1882_v57 = vadd.f32 1.0, %v5062_v28  ;;  %v7691_v24 = vadd.f32 %v5780_v62, %v1562_v55  ;;  %v1699_v28 = vsub.f32 0.0, %v7684_v20  ;;  %4497 = vmatprep.subr.bf16.mxu0 %v4496_v10 }
 0x37f   :  { %v5066_v9 = vpop.eup %5065  ;;  %5085 = vrcp.f32 %v1881_v25  ;;  %v1884_v58 = vadd.f32 1.0, %v5064_v4  ;;  %4529 = vmatprep.subr.bf16.mxu1 %v4528_v53  ;;  %v1566_v60 = vadd.f32 %v7488_v6, %v1250_v14  ;;  %v1806_v61 = vmul.f32 1.442695, %v1700_v35  ;;  %v9945_v35 = vld [vmem:[#allocation19_spill] sm:$0xff] }
 0x380   :  { %v5068_v43 = vpop.eup %5067  ;;  %5087 = vrcp.f32 %v1882_v57  ;;  %v1701_v25 = vsub.f32 0.0, %v7691_v24  ;;  %v7702_v16 = vmul.f32 %v5066_v9, %v7443_v48  ;;  %v9943_v57 = vpack.c.bf16 %v7419_v13, %v7404_v5  ;;  %v5781_v48 = vld [vmem:[%s9782_s1 + $0x160] sm:$0xff]  ;;  %v5782_v5 = vld [vmem:[%s9782_s1 + $0x170] sm:$0xff] }
 0x381   :  { %v5070_v22 = vpop.eup %5069  ;;  %5089 = vrcp.f32 %v1884_v58  ;;  %v1883_v30 = vadd.f32 1.0, %v5068_v43  ;;  %v9944_v58 = vpack.c.bf16 %v7430_v51, %v7416_v31  ;;  %v7714_v6 = vadd.f32 %v5781_v48, %v1405_v0  ;;  %v5783_v51 = vld [vmem:[%s9782_s1 + $0x168] sm:$0xff]  ;;  %v9946_v0 = vld [vmem:[#allocation20_spill] sm:$0xff]  ;;  %v9948_v48 = vld [vmem:[#allocation9_spill] sm:$0xff] }
 0x382   :  { %v5072_v4 = vpop.eup %5071  ;;  %v1885_v55 = vadd.f32 1.0, %v5070_v22  ;;  %5091 = vpow2.f32 %v1798_v59  ;;  %4499 = vmatpush1.bf16.msra.mxu0 %v9943_v57  ;;  %v1407_v59 = vadd.f32 %v7490_v36, %v1250_v14  ;;  %v7719_v13 = vadd.f32 %v5782_v5, %v1566_v60  ;;  %v9947_v57 = vld [vmem:[#allocation17_spill] sm:$0xff] }
 0x383   :  { %v5074_v32 = vpop.eup %5073  ;;  %5093 = vrcp.f32 %v1883_v30  ;;  %4531 = vmatpush1.bf16.msra.mxu1 %v9944_v58  ;;  %v1804_v31 = vmul.f32 1.442695, %v1699_v28  ;;  %v1568_v43 = vadd.f32 %v9945_v35, %v1250_v14  ;;  %v1808_v53 = vmul.f32 1.442695, %v1701_v25  ;;  %v5784_v28 = vld [vmem:[%s9782_s1 + $0x178] sm:$0xff]  ;;  %v9953_v5 = vld [vmem:[#allocation13_spill] sm:$0xff] }
 0x384   :  { %v5076_v62 = vpop.eup %5075  ;;  %5095 = vrcp.f32 %v1885_v55  ;;  %v1886_v40 = vadd.f32 1.0, %v5074_v32  ;;  %v7724_v36 = vadd.f32 %v5783_v51, %v1407_v59  ;;  %v1702_v22 = vsub.f32 0.0, %v7714_v6 }
 0x385   :  { %v5078_v9 = vpop.eup %5077  ;;  %5097 = vpow2.f32 %v1796_v23  ;;  %v1704_v30 = vsub.f32 0.0, %v7719_v13  ;;  %v7736_v32 = vadd.f32 %v5784_v28, %v1568_v43  ;;  %v7739_v25 = vmul.f32 %v5072_v4, %v9947_v57  ;;  %v1255_v43 = vpop.permute.xlu0 %1254  ;;  %v9951_v28 = vld [vmem:[#allocation22_spill] sm:$0xff]  ;;  %v9952_v57 = vld [vmem:[#allocation12_spill] sm:$0xff] }
 0x386   :  { %v5080_v10 = vpop.eup %5079  ;;  %5099 = vrcp.f32 %v1886_v40  ;;  %v1703_v23 = vsub.f32 0.0, %v7724_v36  ;;  %v1810_v59 = vmul.f32 1.442695, %v1702_v22  ;;  %v9949_v22 = vld [vmem:[#allocation16_spill] sm:$0xff]  ;;  %v7764_v49 = vmul.f32 %v5078_v9, %v9953_v5  ;;  %v9954_v9 = vld [vmem:[#allocation23_spill] sm:$0xff] }
 0x387   :  { %v5082_v55 = vpop.eup %5081  ;;  %v7730_v60 = vmul.f32 %v5080_v10, %v9946_v0  ;;  %5101 = vpow2.f32 %v1800_v29  ;;  %v7746_v29 = vmul.f32 %v7628_v8, %v9948_v48  ;;  %v1814_v51 = vmul.f32 1.442695, %v1704_v30  ;;  %v9950_v8 = vld [vmem:[#allocation21_spill] sm:$0xff] }
 0x388   :  { %v5084_v14 = vpop.eup %5083  ;;  %v7742_v58 = vmul.f32 %v5082_v55, %v7522_v39  ;;  %5103 = vpow2.f32 %v1802_v47  ;;  %v1812_v39 = vmul.f32 1.442695, %v1703_v23  ;;  %v1705_v47 = vsub.f32 0.0, %v7736_v32 }
 0x389   :  { %v5086_v40 = vpop.eup %5085  ;;  %5105 = vpow2.f32 %v1806_v61  ;;  %v7755_v55 = vmul.f32 %v7646_v54, %v9949_v22  ;;  %v1411_v0 = vadd.f32 %v9950_v8, %v1255_v43  ;;  %v1572_v61 = vadd.f32 %v9951_v28, %v1255_v43  ;;  %v5785_v54 = vld [vmem:[%s9782_s1 + $0x180] sm:$0xff] }
 0x38a   :  { %v5088_v35 = vpop.eup %5087  ;;  %5107 = vpow2.f32 %v1804_v31  ;;  %v7760_v48 = vmul.f32 %v5076_v62, %v9952_v57  ;;  %v1816_v4 = vmul.f32 1.442695, %v1705_v47  ;;  %v1413_v31 = vadd.f32 %v7511_v34, %v1255_v43  ;;  %v5786_v34 = vld [vmem:[%s9782_s1 + $0x190] sm:$0xff] }
 0x38b   :  { %v5090_v10 = vpop.eup %5089  ;;  %5109 = vpow2.f32 %v1808_v53  ;;  %v7769_v53 = vadd.f32 %v5785_v54, %v1411_v0  ;;  %v7772_v62 = vmul.f32 %v5084_v14, %v7527_v52  ;;  %v1574_v5 = vadd.f32 %v9954_v9, %v1255_v43  ;;  %v5787_v43 = vld [vmem:[%s9782_s1 + $0x188] sm:$0xff] }
 0x38c   :  { %v5092_v30 = vpop.eup %5091  ;;  %5111 = vpow2.f32 %v1810_v59  ;;  %v7777_v59 = vadd.f32 %v5786_v34, %v1572_v61  ;;  %v7781_v47 = vmul.f32 %v5086_v40, %v7534_v41  ;;  %v7784_v8 = vmul.f32 %v5088_v35, %v7550_v42  ;;  %v5788_v61 = vld [vmem:[%s9782_s1 + $0x198] sm:$0xff] }
 0x38d   :  { %v5094_v23 = vpop.eup %5093  ;;  %v1888_v50 = vadd.f32 1.0, %v5092_v30  ;;  %5113 = vpow2.f32 %v1814_v51  ;;  %v1706_v52 = vsub.f32 0.0, %v7769_v53  ;;  %v7793_v28 = vadd.f32 %v5787_v43, %v1413_v31  ;;  %v9956_v34 = vld [vmem:[#allocation24_spill] sm:$0xff] }
 0x38e   :  { %v5096_v22 = vpop.eup %5095  ;;  %5115 = vpow2.f32 %v1812_v39  ;;  %v7788_v39 = vmul.f32 %v5090_v10, %v7564_v44  ;;  %v7796_v40 = vmul.f32 %v5094_v23, %v7584_v27  ;;  %v4500_v44 = vpack.c.bf16 %v7639_v3, %v7543_v19 }
 0x38f   :  { %v5098_v51 = vpop.eup %5097  ;;  %5117 = vrcp.f32 %v1888_v50  ;;  %v1818_v50 = vmul.f32 1.442695, %v1706_v52  ;;  %v1708_v10 = vsub.f32 0.0, %v7777_v59  ;;  %v7810_v27 = vadd.f32 %v5788_v61, %v1574_v5  ;;  %v9957_v52 = vld [vmem:[#allocation25_spill] sm:$0xff] }
 0x390   :  { %v5100_v14 = vpop.eup %5099  ;;  %v1887_v0 = vadd.f32 1.0, %v5098_v51  ;;  %5119 = vpow2.f32 %v1816_v4  ;;  %v7804_v4 = vmul.f32 %v5096_v22, %v7594_v15  ;;  %4501 = vmatprep.subr.bf16.mxu0 %v4500_v44  ;;  %v4532_v15 = vpack.c.bf16 %v7649_v38, %v7601_v33 }
 0x391   :  { %v5102_v41 = vpop.eup %5101  ;;  %v7799_v42 = vmul.f32 %v5100_v14, %v7615_v2  ;;  %v1260_v2 = vpop.permute.xlu1 %1259  ;;  %v1707_v54 = vsub.f32 0.0, %v7793_v28  ;;  %v9955_v22 = vpack.c.bf16 %v7558_v12, %v7480_v21  ;;  %v1709_v38 = vsub.f32 0.0, %v7810_v27  ;;  %v5789_v21 = vld [vmem:[%s9782_s1 + $0x1a0] sm:$0xff] }
 0x392   :  { %v5104_v35 = vpop.eup %5103  ;;  %5121 = vrcp.f32 %v1887_v0  ;;  %v1889_v31 = vadd.f32 1.0, %v5102_v41  ;;  %v1417_v9 = vadd.f32 %v9956_v34, %v1260_v2  ;;  %4533 = vmatprep.subr.bf16.mxu1 %v4532_v15  ;;  %v1578_v14 = vadd.f32 %v9957_v52, %v1260_v2  ;;  %v9958_v0 = vld [vmem:[#allocation26_spill] sm:$0xff]  ;;  %v5790_v15 = vld [vmem:[%s9782_s1 + $0x1b0] sm:$0xff] }
 0x393   :  { %v5106_v30 = vpop.eup %5105  ;;  %v1890_v19 = vadd.f32 1.0, %v5104_v35  ;;  %5123 = vpow2.f32 %v1818_v50  ;;  %4503 = vmatpush1.bf16.msra.mxu0 %v9955_v22  ;;  %v1419_v43 = vadd.f32 %v9958_v0, %v1260_v2  ;;  %v9959_v41 = vld [vmem:[#allocation10_spill] sm:$0xff]  ;;  %v9962_v35 = vld [vmem:[#allocation27_spill] sm:$0xff]  ;;  %v1822_v52 = vmul.f32 1.442695, %v1708_v10 }
 0x394   :  { %v5108_v3 = vpop.eup %5107  ;;  %v1892_v23 = vadd.f32 1.0, %v5106_v30  ;;  %v9960_v50 = vld [vmem:[#allocation18_spill] sm:$0xff]  ;;  %v7830_v12 = vadd.f32 %v5789_v21, %v1417_v9  ;;  %v1580_v61 = vadd.f32 %v9962_v35, %v1260_v2  ;;  %v5792_v2 = vld [vmem:[%s9782_s1 + $0x1b8] sm:$0xff] }
 0x395   :  { %v5110_v5 = vpop.eup %5109  ;;  %5125 = vrcp.f32 %v1890_v19  ;;  %v1891_v51 = vadd.f32 1.0, %v5108_v3  ;;  %v9961_v44 = vpack.c.bf16 %v9959_v41, %v9960_v50  ;;  %v7836_v3 = vadd.f32 %v5790_v15, %v1578_v14  ;;  %v9963_v15 = vld [vmem:[#allocation28_spill] sm:$0xff] }
 0x396   :  { %v5112_v33 = vpop.eup %5111  ;;  %5127 = vrcp.f32 %v1892_v23  ;;  %v5791_v23 = vld [vmem:[%s9782_s1 + $0x1a8] sm:$0xff]  ;;  %v1710_v41 = vsub.f32 0.0, %v7830_v12  ;;  %v1893_v21 = vadd.f32 1.0, %v5110_v5 }
 0x397   :  { %4535 = vmatpush1.bf16.msra.mxu1 %v9961_v44  ;;  %v5114_v30 = vpop.eup %5113  ;;  %5129 = vrcp.f32 %v1889_v31  ;;  %v1894_v19 = vadd.f32 1.0, %v5112_v33  ;;  %v7841_v22 = vadd.f32 %v5791_v23, %v1419_v43  ;;  %v7846_v31 = vadd.f32 %v5792_v2, %v1580_v61  ;;  %v1265_v44 = vpop.permute.xlu0 %1264 }
 0x398   :  { %v5116_v34 = vpop.eup %5115  ;;  %5131 = vrcp.f32 %v1891_v51  ;;  %v1896_v9 = vadd.f32 1.0, %v5114_v30  ;;  %v1820_v33 = vmul.f32 1.442695, %v1707_v54  ;;  %v1824_v51 = vmul.f32 1.442695, %v1709_v38  ;;  %v9964_v38 = vld [vmem:[#allocation29_spill] sm:$0xff] }
 0x399   :  { %v5118_v0 = vpop.eup %5117  ;;  %5133 = vrcp.f32 %v1894_v19  ;;  %v1895_v14 = vadd.f32 1.0, %v5116_v34  ;;  %v1712_v10 = vsub.f32 0.0, %v7836_v3  ;;  %v1711_v61 = vsub.f32 0.0, %v7841_v22 }
 0x39a   :  { %v5120_v50 = vpop.eup %5119  ;;  %v7850_v43 = vmul.f32 %v5118_v0, %v7623_v7  ;;  %5135 = vrcp.f32 %v1896_v9  ;;  %v1713_v19 = vsub.f32 0.0, %v7846_v31  ;;  %v1423_v7 = vadd.f32 %v9963_v15, %v1265_v44  ;;  %v9965_v9 = vld [vmem:[#allocation6_spill] sm:$0xff] }
 0x39b   :  { %5137 = vrcp.f32 %v1895_v14  ;;  %v1897_v35 = vadd.f32 1.0, %v5120_v50  ;;  %v1826_v23 = vmul.f32 1.442695, %v1710_v41  ;;  %v1584_v34 = vadd.f32 %v9964_v38, %v1265_v44  ;;  %v5793_v14 = vld [vmem:[%s9782_s1 + $0x1c0] sm:$0xff]  ;;  %v5794_v41 = vld [vmem:[%s9782_s1 + $0x1d0] sm:$0xff] }
 0x39c   :  { %v5122_v30 = vpop.eup %5121  ;;  %5139 = vpow2.f32 %v1822_v52  ;;  %v1425_v2 = vadd.f32 %v9965_v9, %v1265_v44  ;;  %v1830_v0 = vmul.f32 1.442695, %v1712_v10  ;;  %v7863_v50 = vadd.f32 %v5793_v14, %v1423_v7  ;;  %v9967_v52 = vld [vmem:[#allocation11_spill] sm:$0xff] }
 0x39d   :  { %5141 = vrcp.f32 %v1897_v35  ;;  %v5124_v5 = vpop.eup %5123  ;;  %v1586_v54 = vadd.f32 %v9967_v52, %v1265_v44  ;;  %v1828_v15 = vmul.f32 1.442695, %v1711_v61  ;;  %v7869_v35 = vadd.f32 %v5794_v41, %v1584_v34 }
 0x39e   :  { %5143 = vpow2.f32 %v1820_v33  ;;  %9966 = vst [vmem:[#allocation19_spill] sm:$0xff] %v7863_v50  ;;  %v5795_v33 = vld [vmem:[%s9782_s1 + $0x1c8] sm:$0xff]  ;;  %v1832_v7 = vmul.f32 1.442695, %v1713_v19  ;;  %v1714_v44 = vsub.f32 0.0, %v7863_v50  ;;  %v1898_v34 = vadd.f32 1.0, %v5124_v5 }
 0x39f   :  { %v5126_v57 = vpop.eup %5125  ;;  %5145 = vpow2.f32 %v1824_v51  ;;  %9968 = vst [vmem:[#allocation20_spill] sm:$0xff] %v7869_v35  ;;  %v7874_v10 = vadd.f32 %v5795_v33, %v1425_v2  ;;  %v5796_v51 = vld [vmem:[%s9782_s1 + $0x1d8] sm:$0xff]  ;;  %v1716_v14 = vsub.f32 0.0, %v7869_v35 }
 0x3a0   :  { %v5128_v38 = vpop.eup %5127  ;;  %5147 = vrcp.f32 %v1893_v21  ;;  %v7880_v61 = vadd.f32 %v5796_v51, %v1586_v54  ;;  %v7885_v41 = vmul.f32 %v5126_v57, %v7672_v63  ;;  %v1834_v21 = vmul.f32 1.442695, %v1714_v44  ;;  %v1270_v51 = vpop.permute.xlu1 %1269 }
 0x3a1   :  { %9969 = vst [vmem:[#allocation17_spill] sm:$0xff] %v7874_v10  ;;  %v5130_v9 = vpop.eup %5129  ;;  %5149 = vpow2.f32 %v1826_v23  ;;  %v1715_v52 = vsub.f32 0.0, %v7874_v10  ;;  %v7889_v50 = vmul.f32 %v5128_v38, %v7677_v46  ;;  %v1838_v54 = vmul.f32 1.442695, %v1716_v14 }
 0x3a2   :  { %v5132_v2 = vpop.eup %5131  ;;  %5151 = vpow2.f32 %v1830_v0  ;;  %v1717_v19 = vsub.f32 0.0, %v7880_v61  ;;  %v4504_v63 = vpack.c.bf16 %v7746_v29, %v7654_v18  ;;  %v4536_v46 = vpack.c.bf16 %v7755_v55, %v7665_v11  ;;  %v9971_v18 = vld [vmem:[#allocation30_spill] sm:$0xff] }
 0x3a3   :  { %v5134_v33 = vpop.eup %5133  ;;  %5153 = vpow2.f32 %v1828_v15  ;;  %v1836_v5 = vmul.f32 1.442695, %v1715_v52  ;;  %v9970_v15 = vld [vmem:[#allocation7_spill] sm:$0xff]  ;;  %v7903_v14 = vmul.f32 %v5122_v30, %v7644_v26  ;;  %v1590_v29 = vadd.f32 %v9971_v18, %v1270_v51  ;;  %v5797_v26 = vld [vmem:[%s9782_s1 + $0x1e0] sm:$0xff] }
 0x3a4   :  { %v5136_v23 = vpop.eup %5135  ;;  %v7892_v35 = vmul.f32 %v5134_v33, %v7714_v6  ;;  %5155 = vpow2.f32 %v1832_v7  ;;  %v1840_v10 = vmul.f32 1.442695, %v1717_v19  ;;  %v1429_v38 = vadd.f32 %v9970_v15, %v1270_v51  ;;  %4505 = vmatprep.subr.bf16.mxu0 %v4504_v63  ;;  %4537 = vmatprep.subr.bf16.mxu1 %v4536_v46  ;;  %v9974_v33 = vld [vmem:[#allocation31_spill] sm:$0xff]  ;;  %v9975_v63 = vld [vmem:[#allocation32_spill] sm:$0xff] }
 0x3a5   :  { %v5138_v57 = vpop.eup %5137  ;;  %v7897_v0 = vmul.f32 %v5136_v23, %v7719_v13  ;;  %5157 = vpow2.f32 %v1834_v21  ;;  %v9972_v11 = vpack.c.bf16 %v7618_v45, %v7609_v17  ;;  %v2019_v21 = vmul.f32 %v5132_v2, %v7684_v20  ;;  %v5799_v2 = vld [vmem:[%s9782_s1 + $0x1e8] sm:$0xff] }
 0x3a6   :  { %v5140_v44 = vpop.eup %5139  ;;  %v4518_v6 = vpack.c.bf16 %v7892_v35, %v7885_v41  ;;  %5159 = vrcp.f32 %v1898_v34  ;;  %v7916_v55 = vadd.f32 %v5797_v26, %v1429_v38  ;;  %v2017_v34 = vmul.f32 %v5130_v9, %v7660_v37  ;;  %v5798_v37 = vld [vmem:[%s9782_s1 + $0x1f0] sm:$0xff] }
 0x3a7   :  { %v5142_v7 = vpop.eup %5141  ;;  %v4550_v13 = vpack.c.bf16 %v7897_v0, %v7889_v50  ;;  %v1900_v52 = vadd.f32 1.0, %v5140_v44  ;;  %5161 = vpow2.f32 %v1838_v54  ;;  %4507 = vmatpush1.bf16.msra.mxu0 %v9972_v11  ;;  %v9973_v19 = vpack.c.bf16 %v7636_v1, %v7631_v56 }
 0x3a8   :  { %v5144_v30 = vpop.eup %5143  ;;  %5163 = vpow2.f32 %v1836_v5  ;;  %v1431_v54 = vadd.f32 %v9974_v33, %v1270_v51  ;;  %v1718_v23 = vsub.f32 0.0, %v7916_v55  ;;  %v1592_v46 = vadd.f32 %v9975_v63, %v1270_v51 }
 0x3a9   :  { %4539 = vmatpush1.bf16.msra.mxu1 %v9973_v19  ;;  %v5146_v17 = vpop.eup %5145  ;;  %v1899_v45 = vadd.f32 1.0, %v5144_v30  ;;  %5165 = vpow2.f32 %v1840_v10  ;;  %v7929_v20 = vadd.f32 %v5798_v37, %v1590_v29  ;;  %v4508_v56 = vpack.c.bf16 %v7772_v62, %v7760_v48  ;;  %v5800_v48 = vld [vmem:[%s9782_s1 + $0x1f8] sm:$0xff] }
 0x3aa   :  { %v5148_v15 = vpop.eup %5147  ;;  %5167 = vrcp.f32 %v1900_v52  ;;  %v1901_v38 = vadd.f32 1.0, %v5146_v17  ;;  %v2023_v9 = vmul.f32 %v5138_v57, %v7724_v36  ;;  %v1842_v10 = vmul.f32 1.442695, %v1718_v23 }
 0x3ab   :  { %v5150_v1 = vpop.eup %5149  ;;  %5169 = vrcp.f32 %v1899_v45  ;;  %v7937_v5 = vadd.f32 %v5799_v2, %v1431_v54  ;;  %v2025_v44 = vmul.f32 %v5142_v7, %v7736_v32  ;;  %v7943_v62 = vadd.f32 %v5800_v48, %v1592_v46  ;;  %4509 = vmatprep.subr.bf16.mxu0 %v4508_v56 }
 0x3ac   :  { %v5152_v51 = vpop.eup %5151  ;;  %5171 = vrcp.f32 %v1901_v38  ;;  %v1902_v18 = vadd.f32 1.0, %v5150_v1  ;;  %v2021_v57 = vmul.f32 %v5148_v15, %v7691_v24  ;;  %v4540_v52 = vpack.c.bf16 %v7781_v47, %v7764_v49 }
 0x3ad   :  { %v5154_v36 = vpop.eup %5153  ;;  %v1904_v29 = vadd.f32 1.0, %v5152_v51  ;;  %5173 = vpow2.f32 %v1842_v10  ;;  %v9976_v32 = vpack.c.bf16 %v7730_v60, %v7702_v16  ;;  %v1720_v26 = vsub.f32 0.0, %v7929_v20 }
 0x3ae   :  { %v5156_v7 = vpop.eup %5155  ;;  %5175 = vrcp.f32 %v1902_v18  ;;  %v1903_v11 = vadd.f32 1.0, %v5154_v36  ;;  %v4512_v30 = vpack.c.bf16 %v7903_v14, %v7796_v40  ;;  %v1719_v33 = vsub.f32 0.0, %v7937_v5  ;;  %4541 = vmatprep.subr.bf16.mxu1 %v4540_v52  ;;  %v9980_v36 = vld [vmem:[#allocation19_spill] sm:$0xff] }
 0x3af   :  { %4511 = vmatpush1.bf16.msra.mxu0 %v9976_v32  ;;  %v5158_v19 = vpop.eup %5157  ;;  %5177 = vrcp.f32 %v1904_v29  ;;  %v1905_v24 = vadd.f32 1.0, %v5156_v7  ;;  %v4544_v49 = vpack.c.bf16 %v2017_v34, %v7804_v4  ;;  %v1721_v16 = vsub.f32 0.0, %v7943_v62 }
 0x3b0   :  { %v5160_v47 = vpop.eup %5159  ;;  %5179 = vrcp.f32 %v1903_v11  ;;  %v9977_v60 = vpack.c.bf16 %v7742_v58, %v7739_v25  ;;  %4513 = vmatprep.subr.bf16.mxu0 %v4512_v30  ;;  %v4516_v54 = vpack.c.bf16 %v2023_v9, %v2019_v21  ;;  %v4548_v17 = vpack.c.bf16 %v2025_v44, %v2021_v57 }
 0x3b1   :  { %v5162_v40 = vpop.eup %5161  ;;  %5181 = vrcp.f32 %v1905_v24  ;;  %v1906_v14 = vadd.f32 1.0, %v5158_v19  ;;  %v9978_v45 = vpack.c.bf16 %v7799_v42, %v7784_v8  ;;  %v1846_v34 = vmul.f32 1.442695, %v1720_v26  ;;  %v9981_v19 = vld [vmem:[#allocation20_spill] sm:$0xff] }
 0x3b2   :  { %4543 = vmatpush1.bf16.msra.mxu1 %v9977_v60  ;;  %v5164_v4 = vpop.eup %5163  ;;  %v1844_v63 = vmul.f32 1.442695, %v1719_v33  ;;  %v1848_v15 = vmul.f32 1.442695, %v1721_v16  ;;  %v9979_v25 = vpack.c.bf16 %v7850_v43, %v7788_v39  ;;  %v2026_v43 = vmul.f32 %v5160_v47, %v7769_v53  ;;  %v9982_v47 = vld [vmem:[#allocation17_spill] sm:$0xff] }
 0x3b3   :  { %4545 = vmatprep.subr.bf16.mxu1 %v4544_v49  ;;  %4515 = vmatpush1.bf16.msra.mxu0 %v9978_v45  ;;  %v5166_v23 = vpop.eup %5165  ;;  %5183 = vrcp.f32 %v1906_v14  ;;  %v1908_v53 = vadd.f32 1.0, %v5162_v40  ;;  %v1907_v2 = vadd.f32 1.0, %v5164_v4  ;;  %v9983_v45 = vmov 0.0  }
 0x3b4   :  { %4517 = vmatprep.subr.bf16.mxu0 %v4516_v54  ;;  %v5168_v46 = vpop.eup %5167  ;;  %5185 = vpow2.f32 %v1846_v34  ;;  %v1909_v51 = vadd.f32 1.0, %v5166_v23 }
 0x3b5   :  { %v5170_v58 = vpop.eup %5169  ;;  %5187 = vpow2.f32 %v1844_v63  ;;  %v2028_v35 = vmul.f32 %v5168_v46, %v7777_v59 }
 0x3b6   :  { %4547 = vmatpush1.bf16.msra.mxu1 %v9979_v25  ;;  %v5172_v8 = vpop.eup %5171  ;;  %5189 = vpow2.f32 %v1848_v15  ;;  %v2027_v1 = vmul.f32 %v5170_v58, %v7793_v28  ;;  %v9986_v15 = vld [vmem:[#allocation5_spill] sm:$0xff] }
 0x3b7   :  { %4549 = vmatprep.subr.bf16.mxu1 %v4548_v17  ;;  %4519 = vmatpush1.bf16.msra.mxu0 %v4518_v6  ;;  %v5174_v42 = vpop.eup %5173  ;;  %v2029_v50 = vmul.f32 %v5172_v8, %v7810_v27  ;;  %v2185_v25 = vmul.f32 1.5615181, %v9986_v15 }
 0x3b8   :  { %v5176_v21 = vpop.eup %5175  ;;  %v1910_v38 = vadd.f32 1.0, %v5174_v42 }
 0x3b9   :  { %v5178_v39 = vpop.eup %5177  ;;  %v2030_v37 = vmul.f32 %v5176_v21, %v7830_v12 }
 0x3ba   :  { %4551 = vmatpush1.bf16.msra.mxu1 %v4550_v13  ;;  %v5180_v56 = vpop.eup %5179  ;;  %v2032_v41 = vmul.f32 %v5178_v39, %v7836_v3  ;;  %5191 = vrcp.f32 %v1910_v38  ;;  %v9988_v38 = vld [vmem:[#allocation15_spill] sm:$0xff] }
 0x3bb   :  { %v5182_v6 = vpop.eup %5181  ;;  %v4522_v9 = vpack.c.bf16 %v2030_v37, %v2026_v43  ;;  %v2031_v10 = vmul.f32 %v5180_v56, %v7841_v22  ;;  %5193 = vrcp.f32 %v1908_v53  ;;  %v2187_v39 = vmul.f32 1.5615181, %v9988_v38  ;;  %v5810_v53 = vld [vmem:[%s9784_s3 + $0x40] sm:$0xff] }
 0x3bc   :  { %v4554_v0 = vpack.c.bf16 %v2032_v41, %v2028_v35  ;;  %v2033_v13 = vmul.f32 %v5182_v6, %v7846_v31  ;;  %5195 = vrcp.f32 %v1907_v2  ;;  %v5802_v41 = vld [vmem:[%s9784_s3] sm:$0xff]  ;;  %v5803_v6 = vld [vmem:[%s9784_s3 + $0x8] sm:$0xff] }
 0x3bd   :  { %v4520_v12 = vpack.c.bf16 %v2031_v10, %v2027_v1  ;;  %v5184_v59 = vpop.eup %5183  ;;  %5197 = vrcp.f32 %v1909_v51  ;;  %v5804_v1 = vld [vmem:[%s9784_s3 + $0x10] sm:$0xff]  ;;  %v5806_v10 = vld [vmem:[%s9784_s3 + $0x20] sm:$0xff]  ;;  %v5811_v2 = vld [vmem:[%s9784_s3 + $0x48] sm:$0xff] }
 0x3be   :  { %v4552_v44 = vpack.c.bf16 %v2033_v13, %v2029_v50  ;;  %v5186_v3 = vpop.eup %5185  ;;  %v2034_v57 = vmul.f32 %v5184_v59, %v9980_v36  ;;  %v5807_v50 = vld [vmem:[%s9784_s3 + $0x28] sm:$0xff]  ;;  %v5809_v13 = vld [vmem:[%s9784_s3 + $0x38] sm:$0xff] }
 0x3bf   :  { %4521 = vmatprep.subr.bf16.mxu0 %v4520_v12  ;;  %v5188_v28 = vpop.eup %5187  ;;  %v1912_v18 = vadd.f32 1.0, %v5186_v3  ;;  %v5812_v12 = vld [vmem:[%s9784_s3 + $0x50] sm:$0xff]  ;;  %v5813_v51 = vld [vmem:[%s9784_s3 + $0x58] sm:$0xff]  ;;  %v5815_v59 = vld [vmem:[%s9784_s3 + $0x68] sm:$0xff] }
 0x3c0   :  { %4553 = vmatprep.subr.bf16.mxu1 %v4552_v44  ;;  %4523 = vmatpush1.bf16.msra.mxu0 %v4522_v9  ;;  %v5190_v22 = vpop.eup %5189  ;;  %v1911_v27 = vadd.f32 1.0, %v5188_v28  ;;  %v5805_v9 = vld [vmem:[%s9784_s3 + $0x18] sm:$0xff]  ;;  %v5814_v44 = vld [vmem:[%s9784_s3 + $0x60] sm:$0xff]  ;;  %v5816_v3 = vld [vmem:[%s9784_s3 + $0x70] sm:$0xff] }
 0x3c1   :  { %4555 = vmatpush1.bf16.msra.mxu1 %v4554_v0  ;;  %5199 = vrcp.f32 %v1912_v18  ;;  %v1913_v31 = vadd.f32 1.0, %v5190_v22  ;;  %v5808_v0 = vld [vmem:[%s9784_s3 + $0x30] sm:$0xff]  ;;  %v5817_v28 = vld [vmem:[%s9784_s3 + $0x78] sm:$0xff]  ;;  %v2216_v18 = vpop.permute.xlu0 %2215 }
 0x3c2   :  { %5201 = vrcp.f32 %v1911_v27 }
 0x3c3   :  { %5203 = vrcp.f32 %v1913_v31 }
 0x3c4   :  { %v5192_v48 = vpop.eup %5191 }
 0x3c5   :  { %v2038_v29 = vmul.f32 %v5192_v48, %v7916_v55  ;;  %v5194_v32 = vpop.eup %5193 }
 0x3c6   :  { %v5196_v7 = vpop.eup %5195  ;;  %v2036_v24 = vmul.f32 %v5194_v32, %v9981_v19  ;;  %v5820_v19 = vld [vmem:[%s9782_s1 + $0x8] sm:$0xff] }
 0x3c7   :  { %v4526_v52 = vpack.c.bf16 %v2038_v29, %v2034_v57  ;;  %v5198_v11 = vpop.eup %5197  ;;  %v2035_v16 = vmul.f32 %v5196_v7, %v9982_v47  ;;  %v5821_v47 = vld [vmem:[%s9782_s1 + $0x18] sm:$0xff] }
 0x3c8   :  { %v2037_v54 = vmul.f32 %v5198_v11, %v7880_v61  ;;  %v2221_v11 = vpop.permute.xlu1 %2220 }
 0x3cb   :  { %v5200_v26 = vpop.eup %5199 }
 0x3cc   :  { %v5202_v30 = vpop.eup %5201  ;;  %v2040_v33 = vmul.f32 %v5200_v26, %v7929_v20  ;;  %v5801_v20 = vld [vmem:[%s9785_s4] sm:$0xff]  ;;  %v5819_v26 = vld [vmem:[%s9782_s1 + $0x10] sm:$0xff] }
 0x3cd   :  { %v5204_v49 = vpop.eup %5203  ;;  %v2039_v60 = vmul.f32 %v5202_v30, %v7937_v5  ;;  %v9984_v5 = vld [vmem:[#allocation8_spill] sm:$0xff] }
 0x3ce   :  { %v4558_v17 = vpack.c.bf16 %v2040_v33, %v2036_v24  ;;  %v2041_v55 = vmul.f32 %v5204_v49, %v7943_v62  ;;  %v2184_v4 = vmul.f32 1.5615181, %v9984_v5  ;;  %v9985_v62 = vld [vmem:[#allocation14_spill] sm:$0xff] }
 0x3cf   :  { %v4524_v40 = vpack.c.bf16 %v2039_v60, %v2035_v16  ;;  %v2186_v34 = vmul.f32 1.5615181, %v9985_v62  ;;  %v5822_v62 = vld [vmem:[%s9782_s1 + $0x20] sm:$0xff] }
 0x3d0   :  { %v4556_v14 = vpack.c.bf16 %v2041_v55, %v2037_v54 }
 0x3d1   :  { %4525 = vmatprep.subr.bf16.mxu0 %v4524_v40 }
 0x3d2   :  { %4557 = vmatprep.subr.bf16.mxu1 %v4556_v14  ;;  %4527 = vmatpush1.bf16.msra.mxu0 %v4526_v52  ;;  %v5818_v52 = vld [vmem:[%s9782_s1] sm:$0xff] }
 0x3d3   :  { %4559 = vmatpush1.bf16.msra.mxu1 %v4558_v17 }
 0x3d5   :  { %2107 = vmatmul.mubr.f32.vlgmr.msra.gmra.mrb[66].mxu0 %v5801_v20 }
 0x3d6   :  { %2178 = vmatmul.mubr.f32.vlgmr.msra.gmra.mrb[66].mxu1 %v5801_v20  ;;  %2357 = vmatprep.mubr.f32.mxu0 %v9983_v45 }
 0x3d7   :  { %2518 = vmatprep.mubr.f32.mxu1 %v9983_v45 }
 0x4a8   :  { %v2108_v61 = vpop.f32.mrb[66].mxu0 }
 0x4a9   :  { %v2188_v23 = vmul.f32 -0.75721645, %v2108_v61  ;;  %v2179_v63 = vpop.f32.mrb[66].mxu1  ;;  %v2110_v46 = vpop.f32.mrb[67].mxu0 }
 0x4aa   :  { %v2190_v58 = vmul.f32 -0.75721645, %v2179_v63  ;;  %v2189_v8 = vmul.f32 -0.75721645, %v2110_v46  ;;  %v2181_v42 = vpop.f32.mrb[67].mxu1  ;;  %v2226_v63 = vpop.permute.xlu0 %2225 }
 0x4ab   :  { %v7996_v21 = vadd.f32 %v2188_v23, %v2184_v4  ;;  %v2191_v43 = vmul.f32 -0.75721645, %v2181_v42 }
 0x4ac   :  { %v7999_v37 = vadd.f32 %v2190_v58, %v2186_v34  ;;  %v8001_v56 = vadd.f32 %v2189_v8, %v2185_v25  ;;  %v5823_v25 = vld [vmem:[%s9782_s1 + $0x30] sm:$0xff]  ;;  %v5824_v8 = vld [vmem:[%s9782_s1 + $0x28] sm:$0xff] }
 0x4ad   :  { %9987 = vst [vmem:[#allocation9_spill] sm:$0xff] %v7996_v21  ;;  %v8003_v35 = vadd.f32 %v2191_v43, %v2187_v39 }
 0x4ae   :  { %9989 = vst [vmem:[#allocation16_spill] sm:$0xff] %v7999_v37  ;;  %9990 = vst [vmem:[#allocation21_spill] sm:$0xff] %v8001_v56  ;;  %2293 = vmatprep.subr.mxu0 %v8001_v56 }
 0x4af   :  { %9991 = vst [vmem:[#allocation22_spill] sm:$0xff] %v8003_v35  ;;  %2454 = vmatprep.subr.mxu1 %v8003_v35  ;;  %2294 = vmatpush1.msra.mxu0 %v7996_v21 }
 0x4b0   :  { %2455 = vmatpush1.msra.mxu1 %v7999_v37  ;;  %4352 = vmatmul.mubr.msk.f32.vlgmr.msra.gmra.mrb[68].mxu0 %vm137_vm0, %v5802_v41 }
 0x4b1   :  { %4368 = vmatmul.mubr.msk.f32.vlgmr.msra.gmra.mrb[68].mxu1 %vm137_vm0, %v5802_v41  ;;  %2363 = vmatprep.mubr.f32.mxu0 %v9983_v45  ;;  %v5825_v41 = vld [vmem:[%s9782_s1 + $0x38] sm:$0xff] }
 0x4b2   :  { %2524 = vmatprep.mubr.f32.mxu1 %v9983_v45 }
 0x4b4   :  { %4353 = vmatmul.mubr.msk.f32.gmra.mrb[70].mxu0 %vm137_vm0, %v5803_v6 }
 0x4b5   :  { %4369 = vmatmul.mubr.msk.f32.gmra.mrb[70].mxu1 %vm137_vm0, %v5803_v6  ;;  %2369 = vmatprep.mubr.f32.mxu0 %v9983_v45 }
 0x4b6   :  { %2530 = vmatprep.mubr.f32.mxu1 %v9983_v45 }
 0x4b8   :  { %4354 = vmatmul.mubr.msk.f32.gmra.mrb[72].mxu0 %vm137_vm0, %v5804_v1 }
 0x4b9   :  { %4370 = vmatmul.mubr.msk.f32.gmra.mrb[72].mxu1 %vm137_vm0, %v5804_v1  ;;  %2375 = vmatprep.mubr.f32.mxu0 %v9983_v45 }
 0x4ba   :  { %2536 = vmatprep.mubr.f32.mxu1 %v9983_v45 }
 0x4bc   :  { %4355 = vmatmul.mubr.msk.f32.gmra.mrb[74].mxu0 %vm137_vm0, %v5805_v9 }
 0x4bd   :  { %4371 = vmatmul.mubr.msk.f32.gmra.mrb[74].mxu1 %vm137_vm0, %v5805_v9  ;;  %2381 = vmatprep.mubr.f32.mxu0 %v9983_v45 }
 0x4be   :  { %2542 = vmatprep.mubr.f32.mxu1 %v9983_v45 }
 0x4c0   :  { %4356 = vmatmul.mubr.msk.f32.gmra.mrb[76].mxu0 %vm137_vm0, %v5806_v10 }
 0x4c1   :  { %4372 = vmatmul.mubr.msk.f32.gmra.mrb[76].mxu1 %vm137_vm0, %v5806_v10  ;;  %2387 = vmatprep.mubr.f32.mxu0 %v9983_v45 }
 0x4c2   :  { %2548 = vmatprep.mubr.f32.mxu1 %v9983_v45 }
 0x4c4   :  { %4357 = vmatmul.mubr.msk.f32.gmra.mrb[78].mxu0 %vm137_vm0, %v5807_v50 }
 0x4c5   :  { %4373 = vmatmul.mubr.msk.f32.gmra.mrb[78].mxu1 %vm137_vm0, %v5807_v50  ;;  %2393 = vmatprep.mubr.f32.mxu0 %v9983_v45 }
 0x4c6   :  { %2554 = vmatprep.mubr.f32.mxu1 %v9983_v45 }
 0x4c8   :  { %4358 = vmatmul.mubr.msk.f32.gmra.mrb[80].mxu0 %vm137_vm0, %v5808_v0 }
 0x4c9   :  { %4374 = vmatmul.mubr.msk.f32.gmra.mrb[80].mxu1 %vm137_vm0, %v5808_v0  ;;  %2399 = vmatprep.mubr.f32.mxu0 %v9983_v45 }
 0x4ca   :  { %2560 = vmatprep.mubr.f32.mxu1 %v9983_v45 }
 0x4cc   :  { %4359 = vmatmul.mubr.msk.f32.gmra.mrb[82].mxu0 %vm137_vm0, %v5809_v13 }
 0x4cd   :  { %4375 = vmatmul.mubr.msk.f32.gmra.mrb[82].mxu1 %vm137_vm0, %v5809_v13  ;;  %2405 = vmatprep.mubr.f32.mxu0 %v9983_v45 }
 0x4ce   :  { %2566 = vmatprep.mubr.f32.mxu1 %v9983_v45 }
 0x4d0   :  { %4360 = vmatmul.mubr.msk.f32.gmra.mrb[84].mxu0 %vm137_vm0, %v5810_v53 }
 0x4d1   :  { %4376 = vmatmul.mubr.msk.f32.gmra.mrb[84].mxu1 %vm137_vm0, %v5810_v53  ;;  %2411 = vmatprep.mubr.f32.mxu0 %v9983_v45 }
 0x4d2   :  { %2572 = vmatprep.mubr.f32.mxu1 %v9983_v45 }
 0x4d4   :  { %4361 = vmatmul.mubr.msk.f32.gmra.mrb[86].mxu0 %vm137_vm0, %v5811_v2 }
 0x4d5   :  { %4377 = vmatmul.mubr.msk.f32.gmra.mrb[86].mxu1 %vm137_vm0, %v5811_v2  ;;  %2417 = vmatprep.mubr.f32.mxu0 %v9983_v45 }
 0x4d6   :  { %2578 = vmatprep.mubr.f32.mxu1 %v9983_v45 }
 0x4d8   :  { %4362 = vmatmul.mubr.msk.f32.gmra.mrb[88].mxu0 %vm137_vm0, %v5812_v12 }
 0x4d9   :  { %4378 = vmatmul.mubr.msk.f32.gmra.mrb[88].mxu1 %vm137_vm0, %v5812_v12  ;;  %2423 = vmatprep.mubr.f32.mxu0 %v9983_v45 }
 0x4da   :  { %2584 = vmatprep.mubr.f32.mxu1 %v9983_v45 }
 0x4dc   :  { %4363 = vmatmul.mubr.msk.f32.gmra.mrb[90].mxu0 %vm137_vm0, %v5813_v51 }
 0x4dd   :  { %4379 = vmatmul.mubr.msk.f32.gmra.mrb[90].mxu1 %vm137_vm0, %v5813_v51  ;;  %2429 = vmatprep.mubr.f32.mxu0 %v9983_v45  ;;  %v2231_v51 = vpop.permute.xlu1 %2230 }
 0x4de   :  { %2590 = vmatprep.mubr.f32.mxu1 %v9983_v45 }
 0x4e0   :  { %4364 = vmatmul.mubr.msk.f32.gmra.mrb[92].mxu0 %vm137_vm0, %v5814_v44 }
 0x4e1   :  { %4380 = vmatmul.mubr.msk.f32.gmra.mrb[92].mxu1 %vm137_vm0, %v5814_v44  ;;  %2435 = vmatprep.mubr.f32.mxu0 %v9983_v45 }
 0x4e2   :  { %2596 = vmatprep.mubr.f32.mxu1 %v9983_v45 }
 0x4e4   :  { %4365 = vmatmul.mubr.msk.f32.gmra.mrb[94].mxu0 %vm137_vm0, %v5815_v59 }
 0x4e5   :  { %4381 = vmatmul.mubr.msk.f32.gmra.mrb[94].mxu1 %vm137_vm0, %v5815_v59  ;;  %2441 = vmatprep.mubr.f32.mxu0 %v9983_v45 }
 0x4e6   :  { %2602 = vmatprep.mubr.f32.mxu1 %v9983_v45 }
 0x4e8   :  { %4366 = vmatmul.mubr.msk.f32.gmra.mrb[96].mxu0 %vm137_vm0, %v5816_v3 }
 0x4e9   :  { %4382 = vmatmul.mubr.msk.f32.gmra.mrb[96].mxu1 %vm137_vm0, %v5816_v3  ;;  %2447 = vmatprep.mubr.f32.mxu0 %v9983_v45  ;;  %v5826_v3 = vld [vmem:[%s9782_s1 + $0x40] sm:$0xff] }
 0x4ea   :  { %2608 = vmatprep.mubr.f32.mxu1 %v9983_v45 }
 0x4ec   :  { %4367 = vmatmul.mubr.msk.f32.gmra.mrb[98].mxu0 %vm137_vm0, %v5817_v28 }
 0x4ed   :  { %4383 = vmatmul.mubr.msk.f32.gmra.mrb[98].mxu1 %vm137_vm0, %v5817_v28  ;;  %3127 = vmatprep.mubr.f32.mxu0 %v9983_v45 }
 0x4ee   :  { %3198 = vmatprep.mubr.f32.mxu1 %v9983_v45 }
 0x583   :  { %v2359_v22 = vpop.f32.mrb[68].mxu0 }
 0x584   :  { %v2360_v27 = vadd.f32 %v2359_v22, %v2216_v18  ;;  %v2520_v31 = vpop.f32.mrb[68].mxu1  ;;  %v2361_v48 = vpop.f32.mrb[69].mxu0 }
 0x585   :  { %v2521_v36 = vadd.f32 %v2520_v31, %v2216_v18  ;;  %v2362_v57 = vadd.f32 %v2361_v48, %v2216_v18  ;;  %v2522_v29 = vpop.f32.mrb[69].mxu1 }
 0x586   :  { %v8124_v32 = vadd.f32 %v5818_v52, %v2360_v27  ;;  %v2523_v7 = vadd.f32 %v2522_v29, %v2216_v18  ;;  %v5827_v27 = vld [vmem:[%s9782_s1 + $0x50] sm:$0xff] }
 0x587   :  { %v8129_v30 = vadd.f32 %v5819_v26, %v2521_v36  ;;  %v8134_v24 = vadd.f32 %v5820_v19, %v2362_v57  ;;  %v2365_v33 = vpop.f32.mrb[70].mxu0  ;;  %v5828_v19 = vld [vmem:[%s9782_s1 + $0x48] sm:$0xff] }
 0x588   :  { %v2679_v49 = vsub.f32 0.0, %v8124_v32  ;;  %v8140_v16 = vadd.f32 %v5821_v47, %v2523_v7  ;;  %v2366_v60 = vadd.f32 %v2365_v33, %v2221_v11  ;;  %v2526_v54 = vpop.f32.mrb[70].mxu1  ;;  %v2367_v17 = vpop.f32.mrb[71].mxu0 }
 0x589   :  { %v2681_v55 = vsub.f32 0.0, %v8129_v30  ;;  %v2680_v40 = vsub.f32 0.0, %v8134_v24  ;;  %v2527_v14 = vadd.f32 %v2526_v54, %v2221_v11  ;;  %v2368_v20 = vadd.f32 %v2367_v17, %v2221_v11  ;;  %v2528_v61 = vpop.f32.mrb[71].mxu1  ;;  %v5830_v17 = vld [vmem:[%s9782_s1 + $0x60] sm:$0xff] }
 0x58a   :  { %v2743_v5 = vmul.f32 1.442695, %v2679_v49  ;;  %v2682_v4 = vsub.f32 0.0, %v8140_v16  ;;  %v8148_v34 = vadd.f32 %v5822_v62, %v2366_v60  ;;  %v2529_v23 = vadd.f32 %v2528_v61, %v2221_v11  ;;  %v5829_v60 = vld [vmem:[%s9782_s1 + $0x58] sm:$0xff]  ;;  %v5831_v61 = vld [vmem:[%s9782_s1 + $0x70] sm:$0xff] }
 0x58b   :  { %v2747_v46 = vmul.f32 1.442695, %v2681_v55  ;;  %v2745_v15 = vmul.f32 1.442695, %v2680_v40  ;;  %v8153_v58 = vadd.f32 %v5823_v25, %v2527_v14  ;;  %v8158_v42 = vadd.f32 %v5824_v8, %v2368_v20  ;;  %v2371_v38 = vpop.f32.mrb[72].mxu0 }
 0x58c   :  { %5205 = vpow2.f32 %v2743_v5  ;;  %v2749_v39 = vmul.f32 1.442695, %v2682_v4  ;;  %v2683_v43 = vsub.f32 0.0, %v8148_v34  ;;  %v8164_v6 = vadd.f32 %v5825_v41, %v2529_v23  ;;  %v2532_v1 = vpop.f32.mrb[72].mxu1  ;;  %v2373_v9 = vpop.f32.mrb[73].mxu0 }
 0x58d   :  { %5207 = vpow2.f32 %v2747_v46  ;;  %v2685_v10 = vsub.f32 0.0, %v8153_v58  ;;  %v2684_v50 = vsub.f32 0.0, %v8158_v42  ;;  %v2372_v0 = vadd.f32 %v2371_v38, %v2226_v63  ;;  %v2534_v13 = vpop.f32.mrb[73].mxu1 }
 0x58e   :  { %5209 = vpow2.f32 %v2745_v15  ;;  %v2751_v53 = vmul.f32 1.442695, %v2683_v43  ;;  %v2686_v2 = vsub.f32 0.0, %v8164_v6  ;;  %v2533_v12 = vadd.f32 %v2532_v1, %v2226_v63 }
 0x58f   :  { %5211 = vpow2.f32 %v2749_v39  ;;  %v2755_v44 = vmul.f32 1.442695, %v2685_v10  ;;  %v2753_v59 = vmul.f32 1.442695, %v2684_v50  ;;  %v8172_v28 = vadd.f32 %v5826_v3, %v2372_v0  ;;  %v2377_v18 = vpop.f32.mrb[74].mxu0  ;;  %v2236_v39 = vpop.permute.xlu0 %2235  ;;  %v5832_v0 = vld [vmem:[%s9782_s1 + $0x68] sm:$0xff] }
 0x590   :  { %5213 = vpow2.f32 %v2751_v53  ;;  %v2757_v22 = vmul.f32 1.442695, %v2686_v2  ;;  %v8177_v31 = vadd.f32 %v5827_v27, %v2533_v12  ;;  %v2374_v48 = vadd.f32 %v2373_v9, %v2226_v63  ;;  %v2538_v36 = vpop.f32.mrb[74].mxu1  ;;  %v2379_v57 = vpop.f32.mrb[75].mxu0 }
 0x591   :  { %5215 = vpow2.f32 %v2755_v44  ;;  %v2687_v29 = vsub.f32 0.0, %v8172_v28  ;;  %v2535_v52 = vadd.f32 %v2534_v13, %v2226_v63  ;;  %v2378_v7 = vadd.f32 %v2377_v18, %v2231_v51  ;;  %v2540_v11 = vpop.f32.mrb[75].mxu1 }
 0x592   :  { %5217 = vpow2.f32 %v2753_v59  ;;  %v2689_v26 = vsub.f32 0.0, %v8177_v31  ;;  %v8184_v33 = vadd.f32 %v5828_v19, %v2374_v48  ;;  %v2539_v49 = vadd.f32 %v2538_v36, %v2231_v51 }
 0x593   :  { %5219 = vpow2.f32 %v2757_v22  ;;  %v2759_v47 = vmul.f32 1.442695, %v2687_v29  ;;  %v8189_v54 = vadd.f32 %v5829_v60, %v2535_v52  ;;  %v8194_v55 = vadd.f32 %v5830_v17, %v2378_v7  ;;  %v2383_v40 = vpop.f32.mrb[76].mxu0  ;;  %v5833_v29 = vld [vmem:[%s9782_s1 + $0x78] sm:$0xff]  ;;  %v5834_v7 = vld [vmem:[%s9782_s1 + $0x80] sm:$0xff] }
 0x594   :  { %v2763_v14 = vmul.f32 1.442695, %v2689_v26  ;;  %v2688_v20 = vsub.f32 0.0, %v8184_v33  ;;  %v8200_v5 = vadd.f32 %v5831_v61, %v2539_v49  ;;  %v2380_v4 = vadd.f32 %v2379_v57, %v2231_v51  ;;  %v2544_v62 = vpop.f32.mrb[76].mxu1  ;;  %v2385_v23 = vpop.f32.mrb[77].mxu0 }
 0x595   :  { %5221 = vpow2.f32 %v2759_v47  ;;  %v2690_v63 = vsub.f32 0.0, %v8189_v54  ;;  %v2546_v46 = vpop.f32.mrb[77].mxu1  ;;  %v2691_v8 = vsub.f32 0.0, %v8194_v55  ;;  %v2541_v41 = vadd.f32 %v2540_v11, %v2231_v51  ;;  %v5835_v47 = vld [vmem:[%s9782_s1 + $0x90] sm:$0xff] }
 0x596   :  { %v5206_v15 = vpop.eup %5205  ;;  %5223 = vpow2.f32 %v2763_v14  ;;  %v2761_v25 = vmul.f32 1.442695, %v2688_v20  ;;  %v2693_v50 = vsub.f32 0.0, %v8200_v5  ;;  %v8208_v13 = vadd.f32 %v5832_v0, %v2380_v4 }
 0x597   :  { %v5208_v38 = vpop.eup %5207  ;;  %v2871_v43 = vadd.f32 1.0, %v5206_v15  ;;  %v2389_v1 = vpop.f32.mrb[78].mxu0  ;;  %v2765_v51 = vmul.f32 1.442695, %v2690_v63  ;;  %v2384_v59 = vadd.f32 %v2383_v40, %v2236_v39  ;;  %v2767_v27 = vmul.f32 1.442695, %v2691_v8 }
 0x598   :  { %v5210_v9 = vpop.eup %5209  ;;  %v2873_v10 = vadd.f32 1.0, %v5208_v38  ;;  %5225 = vpow2.f32 %v2761_v25  ;;  %v8210_v53 = vpop.f32.mrb[78].mxu1  ;;  %v2545_v48 = vadd.f32 %v2544_v62, %v2236_v39  ;;  %v8219_v52 = vadd.f32 %v5833_v29, %v2541_v41 }
 0x599   :  { %v8212_v2 = vpop.f32.mrb[79].mxu0  ;;  %v5212_v12 = vpop.eup %5211  ;;  %5227 = vrcp.f32 %v2871_v43  ;;  %v2872_v44 = vadd.f32 1.0, %v5210_v9  ;;  %v8224_v11 = vadd.f32 %v5834_v7, %v2384_v59  ;;  %v2386_v17 = vadd.f32 %v2385_v23, %v2236_v39  ;;  %v5836_v23 = vld [vmem:[%s9782_s1 + $0x88] sm:$0xff] }
 0x59a   :  { %v8214_v3 = vpop.f32.mrb[79].mxu1  ;;  %v5214_v18 = vpop.eup %5213  ;;  %5229 = vrcp.f32 %v2873_v10  ;;  %v2874_v22 = vadd.f32 1.0, %v5212_v12  ;;  %v8231_v60 = vadd.f32 %v5835_v47, %v2545_v48  ;;  %v2771_v4 = vmul.f32 1.442695, %v2693_v50 }
 0x59b   :  { %v5216_v36 = vpop.eup %5215  ;;  %5231 = vrcp.f32 %v2872_v44  ;;  %v2875_v57 = vadd.f32 1.0, %v5214_v18  ;;  %v8226_v26 = vpop.f32.mrb[80].mxu0  ;;  %v2547_v62 = vadd.f32 %v2546_v46, %v2236_v39  ;;  %v2692_v8 = vsub.f32 0.0, %v8208_v13  ;;  %v5837_v46 = vld [vmem:[%s9782_s1 + $0x98] sm:$0xff] }
 0x59c   :  { %v5218_v19 = vpop.eup %5217  ;;  %5233 = vrcp.f32 %v2874_v22  ;;  %v2877_v49 = vadd.f32 1.0, %v5216_v36  ;;  %v8233_v40 = vpop.f32.mrb[80].mxu1  ;;  %v8243_v38 = vadd.f32 %v5836_v23, %v2386_v17  ;;  %v2694_v41 = vsub.f32 0.0, %v8219_v52  ;;  %v5839_v23 = vld [vmem:[%s9782_s1 + $0xb0] sm:$0xff] }
 0x59d   :  { %v8235_v14 = vpop.f32.mrb[81].mxu0  ;;  %v5220_v20 = vpop.eup %5219  ;;  %5235 = vrcp.f32 %v2875_v57  ;;  %v2876_v61 = vadd.f32 1.0, %v5218_v19  ;;  %v8249_v39 = vadd.f32 %v5837_v46, %v2547_v62  ;;  %v2695_v12 = vsub.f32 0.0, %v8224_v11 }
 0x59e   :  { %v8237_v63 = vpop.f32.mrb[81].mxu1  ;;  %v2241_v15 = vpop.permute.xlu1 %2240  ;;  %5237 = vrcp.f32 %v2877_v49  ;;  %v2878_v25 = vadd.f32 1.0, %v5220_v20  ;;  %v2697_v44 = vsub.f32 0.0, %v8231_v60  ;;  %v2696_v48 = vsub.f32 0.0, %v8243_v38 }
 0x59f   :  { %v5222_v43 = vpop.eup %5221  ;;  %5239 = vrcp.f32 %v2876_v61  ;;  %v2390_v9 = vadd.f32 %v2389_v1, %v2241_v15  ;;  %v8251_v10 = vpop.f32.mrb[82].mxu0  ;;  %v5838_v1 = vld [vmem:[%s9782_s1 + $0xa0] sm:$0xff]  ;;  %v2698_v7 = vsub.f32 0.0, %v8249_v39  ;;  %v2551_v19 = vadd.f32 %v8210_v53, %v2241_v15  ;;  %v5840_v53 = vld [vmem:[%s9782_s1 + $0xa8] sm:$0xff] }
 0x5a0   :  { %v5224_v50 = vpop.eup %5223  ;;  %5241 = vrcp.f32 %v2878_v25  ;;  %v2879_v0 = vadd.f32 1.0, %v5222_v43  ;;  %v8255_v59 = vpop.f32.mrb[82].mxu1  ;;  %v2392_v49 = vadd.f32 %v8212_v2, %v2241_v15  ;;  %v2769_v17 = vmul.f32 1.442695, %v2692_v8 }
 0x5a1   :  { %v8257_v18 = vpop.f32.mrb[83].mxu0  ;;  %v2881_v22 = vadd.f32 1.0, %v5224_v50  ;;  %5243 = vpow2.f32 %v2765_v51  ;;  %v8263_v36 = vadd.f32 %v5838_v1, %v2390_v9  ;;  %v8265_v57 = vpop.f32.mrb[83].mxu1  ;;  %v2773_v20 = vmul.f32 1.442695, %v2694_v41 }
 0x5a2   :  { %v5226_v29 = vpop.eup %5225  ;;  %5245 = vrcp.f32 %v2879_v0  ;;  %v2775_v25 = vmul.f32 1.442695, %v2695_v12  ;;  %v8275_v43 = vadd.f32 %v5839_v23, %v2551_v19  ;;  %v8280_v2 = vadd.f32 %v5840_v53, %v2392_v49  ;;  %v2251_v21 = vpop.permute.xlu1 %2250 }
 0x5a3   :  { %v5228_v47 = vpop.eup %5227  ;;  %5247 = vrcp.f32 %v2881_v22  ;;  %v2880_v51 = vadd.f32 1.0, %v5226_v29  ;;  %v8270_v61 = vpop.f32.mrb[84].mxu0  ;;  %v2699_v9 = vsub.f32 0.0, %v8263_v36  ;;  %v2553_v50 = vadd.f32 %v8214_v3, %v2241_v15 }
 0x5a4   :  { %v5230_v62 = vpop.eup %5229  ;;  %5249 = vpow2.f32 %v2767_v27  ;;  %9992 = vst [vmem:[#allocation12_spill] sm:$0xff] %v8280_v2  ;;  %v8282_v46 = vpop.f32.mrb[84].mxu1  ;;  %v2779_v27 = vmul.f32 1.442695, %v2697_v44  ;;  %v8291_v1 = vmul.f32 %v5228_v47, %v8124_v32  ;;  %v2777_v29 = vmul.f32 1.442695, %v2696_v48 }
 0x5a5   :  { %v8284_v8 = vpop.f32.mrb[85].mxu0  ;;  %v5232_v41 = vpop.eup %5231  ;;  %5251 = vrcp.f32 %v2880_v51  ;;  %v2781_v19 = vmul.f32 1.442695, %v2698_v7  ;;  %v2701_v23 = vsub.f32 0.0, %v8275_v43  ;;  %v5841_v44 = vld [vmem:[%s9782_s1 + $0xb8] sm:$0xff]  ;;  %v8303_v32 = vmul.f32 %v5230_v62, %v8129_v30 }
 0x5a6   :  { %v8288_v0 = vpop.f32.mrb[85].mxu1  ;;  %v5234_v12 = vpop.eup %5233  ;;  %5253 = vpow2.f32 %v2771_v4  ;;  %v8297_v51 = vadd.f32 %v5841_v44, %v2553_v50  ;;  %v2700_v48 = vsub.f32 0.0, %v8280_v2  ;;  %v8314_v50 = vmul.f32 %v5232_v41, %v8134_v24 }
 0x5a7   :  { %v2246_v22 = vpop.permute.xlu0 %2245  ;;  %v5236_v49 = vpop.eup %5235  ;;  %5255 = vpow2.f32 %v2769_v17  ;;  %v2783_v30 = vmul.f32 1.442695, %v2699_v9 }
 0x5a8   :  { %9993 = vst [vmem:[#allocation13_spill] sm:$0xff] %v8297_v51  ;;  %v2396_v3 = vadd.f32 %v8226_v26, %v2246_v22  ;;  %v8300_v15 = vpop.f32.mrb[86].mxu0  ;;  %v5238_v53 = vpop.eup %5237  ;;  %v8306_v4 = vmul.f32 %v5236_v49, %v8148_v34  ;;  %5257 = vpow2.f32 %v2773_v20  ;;  %v2702_v49 = vsub.f32 0.0, %v8297_v51 }
 0x5a9   :  { %v8309_v7 = vpop.f32.mrb[86].mxu1  ;;  %v8311_v47 = vpop.f32.mrb[87].mxu0  ;;  %v8317_v26 = vmul.f32 %v5238_v53, %v8153_v58  ;;  %5259 = vpow2.f32 %v2775_v25  ;;  %v2557_v44 = vadd.f32 %v8233_v40, %v2246_v22  ;;  %v2787_v58 = vmul.f32 1.442695, %v2701_v23  ;;  %v5842_v25 = vld [vmem:[%s9782_s1 + $0xc0] sm:$0xff]  ;;  %v5843_v23 = vld [vmem:[%s9782_s1 + $0xd0] sm:$0xff] }
 0x5aa   :  { %v5240_v17 = vpop.eup %5239  ;;  %v8319_v62 = vpop.f32.mrb[87].mxu1  ;;  %5261 = vpow2.f32 %v2779_v27  ;;  %v8330_v41 = vadd.f32 %v5842_v25, %v2396_v3  ;;  %v8335_v27 = vmul.f32 %v5234_v12, %v8140_v16  ;;  %v2785_v40 = vmul.f32 1.442695, %v2700_v48 }
 0x5ab   :  { %v5242_v34 = vpop.eup %5241  ;;  %5263 = vpow2.f32 %v2777_v29  ;;  %v8332_v9 = vpop.f32.mrb[88].mxu0  ;;  %v8344_v3 = vadd.f32 %v5843_v23, %v2557_v44  ;;  %v2398_v25 = vadd.f32 %v8235_v14, %v2246_v22  ;;  %v2559_v16 = vadd.f32 %v8237_v63, %v2246_v22  ;;  %v5844_v63 = vld [vmem:[%s9782_s1 + $0xc8] sm:$0xff] }
 0x5ac   :  { %v5244_v35 = vpop.eup %5243  ;;  %5265 = vpow2.f32 %v2781_v19  ;;  %v8337_v56 = vpop.f32.mrb[88].mxu1  ;;  %v8351_v19 = vmul.f32 %v5240_v17, %v8158_v42  ;;  %v8354_v48 = vmul.f32 %v5242_v34, %v8164_v6  ;;  %v2703_v14 = vsub.f32 0.0, %v8330_v41  ;;  %v5845_v34 = vld [vmem:[%s9782_s1 + $0xd8] sm:$0xff] }
 0x5ad   :  { %v5246_v53 = vpop.eup %5245  ;;  %v2882_v20 = vadd.f32 1.0, %v5244_v35  ;;  %v8339_v24 = vpop.f32.mrb[89].mxu0  ;;  %5267 = vpow2.f32 %v2783_v30  ;;  %9994 = vst [vmem:[#allocation23_spill] sm:$0xff] %v8344_v3  ;;  %v2789_v30 = vmul.f32 1.442695, %v2702_v49  ;;  %v8362_v22 = vadd.f32 %v5844_v63, %v2398_v25 }
 0x5ae   :  { %v5248_v29 = vpop.eup %5247  ;;  %v8348_v12 = vpop.f32.mrb[89].mxu1  ;;  %v8367_v6 = vmul.f32 %v5246_v53, %v8172_v28  ;;  %v2402_v49 = vadd.f32 %v8251_v10, %v2251_v21  ;;  %v2705_v53 = vsub.f32 0.0, %v8344_v3  ;;  %v5846_v10 = vld [vmem:[%s9782_s1 + $0xe0] sm:$0xff] }
 0x5af   :  { %v5250_v35 = vpop.eup %5249  ;;  %5269 = vrcp.f32 %v2882_v20  ;;  %9995 = vst [vmem:[#allocation24_spill] sm:$0xff] %v8362_v22  ;;  %v8364_v42 = vpop.f32.mrb[90].mxu0  ;;  %v8372_v20 = vadd.f32 %v5845_v34, %v2559_v16  ;;  %v2704_v16 = vsub.f32 0.0, %v8362_v22 }
 0x5b0   :  { %v8356_v37 = vpop.eup %5251  ;;  %v2883_v44 = vadd.f32 1.0, %v5250_v35  ;;  %5271 = vpow2.f32 %v2787_v58  ;;  %v8375_v58 = vpop.f32.mrb[90].mxu1  ;;  %v8380_v35 = vmul.f32 %v5248_v29, %v8177_v31  ;;  %v8389_v34 = vadd.f32 %v5846_v10, %v2402_v49 }
 0x5b1   :  { %v5254_v17 = vpop.eup %5253  ;;  %5273 = vpow2.f32 %v2785_v40  ;;  %9996 = vst [vmem:[#allocation25_spill] sm:$0xff] %v8372_v20  ;;  %v8377_v23 = vpop.f32.mrb[91].mxu0  ;;  %v2791_v29 = vmul.f32 1.442695, %v2703_v14  ;;  %v2404_v14 = vadd.f32 %v8257_v18, %v2251_v21 }
 0x5b2   :  { %v5256_v25 = vpop.eup %5255  ;;  %9997 = vst [vmem:[#allocation26_spill] sm:$0xff] %v8380_v35  ;;  %5275 = vrcp.f32 %v2883_v44  ;;  %v2885_v28 = vadd.f32 1.0, %v5254_v17  ;;  %v8383_v40 = vpop.f32.mrb[91].mxu1  ;;  %9999 = vst [vmem:[#allocation18_spill] sm:$0xff] %v8389_v34  ;;  %v2563_v44 = vadd.f32 %v8255_v59, %v2251_v21  ;;  %v2707_v22 = vsub.f32 0.0, %v8389_v34 }
 0x5b3   :  { %9998 = vst [vmem:[#allocation10_spill] sm:$0xff] %v8383_v40  ;;  %v5258_v63 = vpop.eup %5257  ;;  %v2884_v45 = vadd.f32 1.0, %v5256_v25  ;;  %5277 = vpow2.f32 %v2789_v30  ;;  %v8392_v17 = vpop.f32.mrb[92].mxu0  ;;  %v2706_v30 = vsub.f32 0.0, %v8372_v20  ;;  %v2565_v59 = vadd.f32 %v8265_v57, %v2251_v21  ;;  %v5848_v21 = vld [vmem:[%s9782_s1 + $0xe8] sm:$0xff] }
 0x5b4   :  { %v5260_v51 = vpop.eup %5259  ;;  %5279 = vrcp.f32 %v2885_v28  ;;  %v2886_v31 = vadd.f32 1.0, %v5258_v63  ;;  %10000 = vst [vmem:[#allocation27_spill] sm:$0xff] %v8392_v17  ;;  %v8396_v3 = vpop.f32.mrb[92].mxu1  ;;  %v8404_v20 = vmul.f32 1.442695, %v2704_v16  ;;  %v8414_v18 = vadd.f32 %v5848_v21, %v2404_v14 }
 0x5b5   :  { %v5262_v2 = vpop.eup %5261  ;;  %5281 = vrcp.f32 %v2884_v45  ;;  %v2887_v25 = vadd.f32 1.0, %v5260_v51  ;;  %10001 = vst [vmem:[#allocation28_spill] sm:$0xff] %v8396_v3  ;;  %v8398_v40 = vpop.f32.mrb[93].mxu0  ;;  %v2795_v51 = vmul.f32 1.442695, %v2705_v53  ;;  %v8430_v14 = vmul.f32 %v8356_v37, %v8184_v33 }
 0x5b6   :  { %v5264_v49 = vpop.eup %5263  ;;  %5283 = vrcp.f32 %v2886_v31  ;;  %v2889_v28 = vadd.f32 1.0, %v5262_v2  ;;  %v8402_v63 = vpop.f32.mrb[93].mxu1  ;;  %v5847_v2 = vld [vmem:[%s9782_s1 + $0xf0] sm:$0xff]  ;;  %v2708_v33 = vsub.f32 0.0, %v8414_v18 }
 0x5b7   :  { %10002 = vst [vmem:[#allocation29_spill] sm:$0xff] %v8402_v63  ;;  %v5266_v10 = vpop.eup %5265  ;;  %5285 = vrcp.f32 %v2887_v25  ;;  %v2888_v45 = vadd.f32 1.0, %v5264_v49  ;;  %v2256_v34 = vpop.permute.xlu0 %2255  ;;  %v8409_v31 = vadd.f32 %v5847_v2, %v2563_v44  ;;  %v5849_v25 = vld [vmem:[%s9782_s1 + $0xf8] sm:$0xff] }
 0x5b8   :  { %v5268_v17 = vpop.eup %5267  ;;  %5287 = vrcp.f32 %v2889_v28  ;;  %v2890_v3 = vadd.f32 1.0, %v5266_v10  ;;  %v8416_v57 = vpop.f32.mrb[94].mxu0  ;;  %v8421_v49 = vadd.f32 %v5849_v25, %v2565_v59  ;;  %v2408_v44 = vadd.f32 %v8270_v61, %v2256_v34  ;;  %v5850_v61 = vld [vmem:[%s9782_s1 + $0x100] sm:$0xff] }
 0x5b9   :  { %10003 = vst [vmem:[#allocation6_spill] sm:$0xff] %v8416_v57  ;;  %v5270_v53 = vpop.eup %5269  ;;  %5289 = vrcp.f32 %v2888_v45  ;;  %v2891_v16 = vadd.f32 1.0, %v5268_v17  ;;  %v8424_v28 = vpop.f32.mrb[94].mxu1  ;;  %v2797_v45 = vmul.f32 1.442695, %v2706_v30  ;;  %v2709_v37 = vsub.f32 0.0, %v8409_v31 }
 0x5ba   :  { %10004 = vst [vmem:[#allocation11_spill] sm:$0xff] %v8424_v28  ;;  %v8426_v10 = vpop.f32.mrb[95].mxu0  ;;  %v5272_v2 = vpop.eup %5271  ;;  %5291 = vrcp.f32 %v2890_v3  ;;  %v2799_v17 = vmul.f32 1.442695, %v2707_v22  ;;  %v8437_v25 = vadd.f32 %v5850_v61, %v2408_v44 }
 0x5bb   :  { %10005 = vst [vmem:[#allocation7_spill] sm:$0xff] %v8426_v10  ;;  %v8432_v21 = vpop.f32.mrb[95].mxu1  ;;  %v5274_v57 = vpop.eup %5273  ;;  %5293 = vrcp.f32 %v2891_v16  ;;  %v2893_v59 = vadd.f32 1.0, %v5272_v2  ;;  %v2569_v10 = vadd.f32 %v8282_v46, %v2256_v34  ;;  %v2710_v16 = vsub.f32 0.0, %v8421_v49  ;;  %v5851_v46 = vld [vmem:[%s9782_s1 + $0x110] sm:$0xff] }
 0x5bc   :  { %10006 = vst [vmem:[#allocation30_spill] sm:$0xff] %v8432_v21  ;;  %v5276_v28 = vpop.eup %5275  ;;  %v2892_v63 = vadd.f32 1.0, %v5274_v57  ;;  %5295 = vpow2.f32 %v2791_v29  ;;  %v8442_v3 = vpop.f32.mrb[96].mxu0 }
 0x5bd   :  { %10007 = vst [vmem:[#allocation31_spill] sm:$0xff] %v8442_v3  ;;  %v5278_v22 = vpop.eup %5277  ;;  %v8445_v30 = vmul.f32 %v5276_v28, %v8194_v55  ;;  %5297 = vrcp.f32 %v2893_v59  ;;  %v8451_v44 = vadd.f32 %v5851_v46, %v2569_v10  ;;  %v8453_v29 = vpop.f32.mrb[96].mxu1  ;;  %v2410_v3 = vadd.f32 %v8284_v8, %v2256_v34  ;;  %v5852_v8 = vld [vmem:[%s9782_s1 + $0x108] sm:$0xff] }
 0x5be   :  { %10008 = vst [vmem:[#allocation32_spill] sm:$0xff] %v8453_v29  ;;  %v8455_v57 = vpop.f32.mrb[97].mxu0  ;;  %v5280_v2 = vpop.eup %5279  ;;  %5299 = vrcp.f32 %v2892_v63  ;;  %v2894_v61 = vadd.f32 1.0, %v5278_v22  ;;  %v2571_v55 = vadd.f32 %v8288_v0, %v2256_v34  ;;  %v2711_v46 = vsub.f32 0.0, %v8437_v25 }
 0x5bf   :  { %10009 = vst [vmem:[#allocation19_spill] sm:$0xff] %v8455_v57  ;;  %v8459_v28 = vpop.f32.mrb[97].mxu1  ;;  %v5282_v59 = vpop.eup %5281  ;;  %v8464_v10 = vmul.f32 %v5280_v2, %v8200_v5  ;;  %5301 = vpow2.f32 %v2795_v51  ;;  %v2803_v63 = vmul.f32 1.442695, %v2709_v37  ;;  %v2713_v22 = vsub.f32 0.0, %v8451_v44  ;;  %v5853_v37 = vld [vmem:[%s9782_s1 + $0x118] sm:$0xff] }
 0x5c0   :  { %10010 = vst [vmem:[#allocation20_spill] sm:$0xff] %v8459_v28  ;;  %v5284_v57 = vpop.eup %5283  ;;  %5303 = vrcp.f32 %v2894_v61  ;;  %v8471_v0 = vadd.f32 %v5852_v8, %v2410_v3  ;;  %v8473_v34 = vpop.f32.mrb[98].mxu0  ;;  %v2801_v51 = vmul.f32 1.442695, %v2708_v33  ;;  %v8481_v2 = vadd.f32 %v5853_v37, %v2571_v55 }
 0x5c1   :  { %10011 = vst [vmem:[#allocation17_spill] sm:$0xff] %v8464_v10  ;;  %10012 = vst [vmem:[#allocation8_spill] sm:$0xff] %v8473_v34  ;;  %v5286_v21 = vpop.eup %5285  ;;  %5305 = vpow2.f32 %v8404_v20  ;;  %v8483_v61 = vpop.f32.mrb[98].mxu1  ;;  %v8488_v34 = vmul.f32 %v5270_v53, %v8189_v54  ;;  %v2805_v5 = vmul.f32 1.442695, %v2710_v16 }
 0x5c2   :  { %10013 = vst [vmem:[#allocation14_spill] sm:$0xff] %v8483_v61  ;;  %v8485_v28 = vpop.f32.mrb[99].mxu0  ;;  %v5288_v3 = vpop.eup %5287  ;;  %5307 = vpow2.f32 %v2797_v45  ;;  %v2712_v20 = vsub.f32 0.0, %v8471_v0  ;;  %v2807_v35 = vmul.f32 1.442695, %v2711_v46  ;;  %v2714_v55 = vsub.f32 0.0, %v8481_v2 }
 0x5c3   :  { %10014 = vst [vmem:[#allocation5_spill] sm:$0xff] %v8485_v28  ;;  %v2261_v8 = vpop.permute.xlu1 %2260  ;;  %v8491_v33 = vpop.f32.mrb[99].mxu1  ;;  %5309 = vpow2.f32 %v2799_v17  ;;  %v8496_v28 = vmul.f32 %v5286_v21, %v8224_v11  ;;  %v2811_v54 = vmul.f32 1.442695, %v2713_v22  ;;  %v5854_v17 = vld [vmem:[%s9782_s1 + $0x120] sm:$0xff]  ;;  %v5855_v11 = vld [vmem:[%s9782_s1 + $0x130] sm:$0xff] }
 0x5c4   :  { %10015 = vst [vmem:[#allocation15_spill] sm:$0xff] %v8491_v33  ;;  %v5290_v29 = vpop.eup %5289  ;;  %v2414_v37 = vadd.f32 %v8300_v15, %v2261_v8  ;;  %5311 = vpow2.f32 %v2803_v63  ;;  %v2575_v53 = vadd.f32 %v8309_v7, %v2261_v8  ;;  %v2809_v16 = vmul.f32 1.442695, %v2712_v20 }
 0x5c5   :  { %v5292_v61 = vpop.eup %5291  ;;  %5313 = vpow2.f32 %v2801_v51  ;;  %v2813_v10 = vmul.f32 1.442695, %v2714_v55  ;;  %v2416_v21 = vadd.f32 %v8311_v47, %v2261_v8  ;;  %v2577_v20 = vadd.f32 %v8319_v62, %v2261_v8  ;;  %v5856_v62 = vld [vmem:[%s9782_s1 + $0x128] sm:$0xff] }
 0x5c6   :  { %v5294_v45 = vpop.eup %5293  ;;  %v8502_v46 = vadd.f32 %v5854_v17, %v2414_v37  ;;  %5315 = vpow2.f32 %v2805_v5  ;;  %v8510_v7 = vadd.f32 %v5855_v11, %v2575_v53  ;;  %v8541_v53 = vmul.f32 %v5290_v29, %v8243_v38  ;;  %v5857_v17 = vld [vmem:[%s9782_s1 + $0x138] sm:$0xff] }
 0x5c7   :  { %v5296_v33 = vpop.eup %5295  ;;  %v8505_v15 = vmul.f32 %v5294_v45, %v8263_v36  ;;  %5317 = vpow2.f32 %v2807_v35  ;;  %v8518_v36 = vmul.f32 %v5288_v3, %v8231_v60  ;;  %v8531_v8 = vadd.f32 %v5856_v62, %v2416_v21 }
 0x5c8   :  { %v5298_v63 = vpop.eup %5297  ;;  %v2895_v22 = vadd.f32 1.0, %v5296_v33  ;;  %v2715_v51 = vsub.f32 0.0, %v8502_v46  ;;  %5319 = vpow2.f32 %v2811_v54  ;;  %v8526_v33 = vmul.f32 %v5282_v59, %v8208_v13  ;;  %v2266_v59 = vpop.permute.xlu0 %2265 }
 0x5c9   :  { %v8515_v55 = vpop.eup %5299  ;;  %v8523_v37 = vmul.f32 %v5298_v63, %v8275_v43  ;;  %v8536_v3 = vmul.f32 %v5284_v57, %v8219_v52  ;;  %v2717_v45 = vsub.f32 0.0, %v8510_v7  ;;  %v8547_v11 = vadd.f32 %v5857_v17, %v2577_v20 }
 0x5ca   :  { %v5302_v47 = vpop.eup %5301  ;;  %5321 = vrcp.f32 %v2895_v22  ;;  %v2815_v35 = vmul.f32 1.442695, %v2715_v51  ;;  %v2420_v21 = vadd.f32 %v8332_v9, %v2266_v59  ;;  %v8552_v38 = vmul.f32 %v5292_v61, %v8249_v39  ;;  %v5859_v39 = vld [vmem:[%s9782_s1 + $0x150] sm:$0xff] }
 0x5cb   :  { %v8533_v60 = vpop.eup %5303  ;;  %v2897_v54 = vadd.f32 1.0, %v5302_v47  ;;  %5323 = vpow2.f32 %v2809_v16  ;;  %v2581_v16 = vadd.f32 %v8337_v56, %v2266_v59  ;;  %v2718_v20 = vsub.f32 0.0, %v8547_v11  ;;  %v5858_v47 = vld [vmem:[%s9782_s1 + $0x140] sm:$0xff] }
 0x5cc   :  { %v5306_v13 = vpop.eup %5305  ;;  %5325 = vpow2.f32 %v2813_v10  ;;  %v2716_v10 = vsub.f32 0.0, %v8531_v8  ;;  %v8559_v9 = vadd.f32 %v5858_v47, %v2420_v21  ;;  %v2819_v17 = vmul.f32 1.442695, %v2717_v45 }
 0x5cd   :  { %v5308_v52 = vpop.eup %5307  ;;  %5327 = vrcp.f32 %v2897_v54  ;;  %v2896_v57 = vadd.f32 1.0, %v5306_v13  ;;  %v8564_v61 = vadd.f32 %v5859_v39, %v2581_v16  ;;  %v2583_v16 = vadd.f32 %v8348_v12, %v2266_v59 }
 0x5ce   :  { %v5310_v63 = vpop.eup %5309  ;;  %v2898_v29 = vadd.f32 1.0, %v5308_v52  ;;  %5329 = vpow2.f32 %v2815_v35  ;;  %v2422_v35 = vadd.f32 %v8339_v24, %v2266_v59  ;;  %v2719_v52 = vsub.f32 0.0, %v8559_v9 }
 0x5cf   :  { %v5312_v22 = vpop.eup %5311  ;;  %5331 = vrcp.f32 %v2896_v57  ;;  %v2899_v51 = vadd.f32 1.0, %v5310_v63  ;;  %v5860_v63 = vld [vmem:[%s9782_s1 + $0x148] sm:$0xff]  ;;  %v2817_v47 = vmul.f32 1.442695, %v2716_v10  ;;  %v2721_v39 = vsub.f32 0.0, %v8564_v61 }
 0x5d0   :  { %v5314_v56 = vpop.eup %5313  ;;  %5333 = vrcp.f32 %v2898_v29  ;;  %v2901_v62 = vadd.f32 1.0, %v5312_v22  ;;  %v8571_v29 = vadd.f32 %v5860_v63, %v2422_v35  ;;  %v2823_v63 = vmul.f32 1.442695, %v2719_v52 }
 0x5d1   :  { %v5316_v54 = vpop.eup %5315  ;;  %5335 = vrcp.f32 %v2899_v51  ;;  %v2900_v13 = vadd.f32 1.0, %v5314_v56  ;;  %v2821_v51 = vmul.f32 1.442695, %v2718_v20  ;;  %v4560_v12 = vpack.c.bf16 %v8351_v19, %v8314_v50  ;;  %v2271_v20 = vpop.permute.xlu1 %2270 }
 0x5d2   :  { %v5318_v57 = vpop.eup %5317  ;;  %5337 = vrcp.f32 %v2901_v62  ;;  %v2902_v21 = vadd.f32 1.0, %v5316_v54  ;;  %v5861_v62 = vld [vmem:[%s9782_s1 + $0x158] sm:$0xff]  ;;  %v4592_v59 = vpack.c.bf16 %v8354_v48, %v8335_v27  ;;  %v2426_v52 = vadd.f32 %v8364_v42, %v2271_v20 }
 0x5d3   :  { %v5320_v22 = vpop.eup %5319  ;;  %5339 = vrcp.f32 %v2900_v13  ;;  %v2903_v24 = vadd.f32 1.0, %v5318_v57  ;;  %v8578_v54 = vadd.f32 %v5861_v62, %v2583_v16  ;;  %v2720_v57 = vsub.f32 0.0, %v8571_v29  ;;  %4561 = vmatprep.subr.bf16.mxu0 %v4560_v12 }
 0x5d4   :  { %v5322_v56 = vpop.eup %5321  ;;  %5341 = vrcp.f32 %v2902_v21  ;;  %v2905_v45 = vadd.f32 1.0, %v5320_v22  ;;  %4593 = vmatprep.subr.bf16.mxu1 %v4592_v59  ;;  %v2587_v50 = vadd.f32 %v8375_v58, %v2271_v20  ;;  %v2827_v48 = vmul.f32 1.442695, %v2721_v39  ;;  %v10018_v39 = vld [vmem:[#allocation10_spill] sm:$0xff] }
 0x5d5   :  { %v5324_v35 = vpop.eup %5323  ;;  %5343 = vrcp.f32 %v2903_v24  ;;  %v2722_v21 = vsub.f32 0.0, %v8578_v54  ;;  %v8589_v27 = vmul.f32 %v5322_v56, %v8330_v41  ;;  %v10016_v24 = vpack.c.bf16 %v8306_v4, %v8291_v1  ;;  %v5862_v41 = vld [vmem:[%s9782_s1 + $0x160] sm:$0xff]  ;;  %v5863_v1 = vld [vmem:[%s9782_s1 + $0x170] sm:$0xff] }
 0x5d6   :  { %v5326_v10 = vpop.eup %5325  ;;  %5345 = vrcp.f32 %v2905_v45  ;;  %v2904_v13 = vadd.f32 1.0, %v5324_v35  ;;  %v10017_v45 = vpack.c.bf16 %v8317_v26, %v8303_v32  ;;  %v8601_v58 = vadd.f32 %v5862_v41, %v2426_v52  ;;  %v5864_v26 = vld [vmem:[%s9782_s1 + $0x168] sm:$0xff]  ;;  %v10021_v41 = vld [vmem:[#allocation12_spill] sm:$0xff] }
 0x5d7   :  { %v5328_v22 = vpop.eup %5327  ;;  %v2906_v16 = vadd.f32 1.0, %v5326_v10  ;;  %5347 = vpow2.f32 %v2819_v17  ;;  %4563 = vmatpush1.bf16.msra.mxu0 %v10016_v24  ;;  %v2428_v17 = vadd.f32 %v8377_v23, %v2271_v20  ;;  %v8606_v4 = vadd.f32 %v5863_v1, %v2587_v50  ;;  %v10019_v52 = vld [vmem:[#allocation18_spill] sm:$0xff]  ;;  %v10020_v24 = vld [vmem:[#allocation23_spill] sm:$0xff]  ;;  %v10026_v1 = vld [vmem:[#allocation25_spill] sm:$0xff] }
 0x5d8   :  { %v5330_v19 = vpop.eup %5329  ;;  %5349 = vrcp.f32 %v2904_v13  ;;  %4595 = vmatpush1.bf16.msra.mxu1 %v10017_v45  ;;  %v2825_v32 = vmul.f32 1.442695, %v2720_v57  ;;  %v2589_v35 = vadd.f32 %v10018_v39, %v2271_v20  ;;  %v2829_v59 = vmul.f32 1.442695, %v2722_v21  ;;  %v5865_v57 = vld [vmem:[%s9782_s1 + $0x178] sm:$0xff] }
 0x5d9   :  { %v5332_v62 = vpop.eup %5331  ;;  %5351 = vrcp.f32 %v2906_v16  ;;  %v2907_v42 = vadd.f32 1.0, %v5330_v19  ;;  %v8611_v23 = vadd.f32 %v5864_v26, %v2428_v17  ;;  %v2723_v10 = vsub.f32 0.0, %v8601_v58 }
 0x5da   :  { %v5334_v56 = vpop.eup %5333  ;;  %5353 = vpow2.f32 %v2817_v47  ;;  %v2725_v13 = vsub.f32 0.0, %v8606_v4  ;;  %v8623_v19 = vadd.f32 %v5865_v57, %v2589_v35  ;;  %v8626_v21 = vmul.f32 %v5328_v22, %v10020_v24  ;;  %v2276_v35 = vpop.permute.xlu0 %2275  ;;  %v10024_v57 = vld [vmem:[#allocation28_spill] sm:$0xff] }
 0x5db   :  { %v5336_v12 = vpop.eup %5335  ;;  %5355 = vrcp.f32 %v2907_v42  ;;  %v2724_v47 = vsub.f32 0.0, %v8611_v23  ;;  %v2831_v17 = vmul.f32 1.442695, %v2723_v10  ;;  %v10022_v10 = vld [vmem:[#allocation13_spill] sm:$0xff]  ;;  %v10025_v24 = vld [vmem:[#allocation24_spill] sm:$0xff]  ;;  %v8651_v43 = vmul.f32 %v5334_v56, %v10026_v1 }
 0x5dc   :  { %v5338_v16 = vpop.eup %5337  ;;  %v8617_v50 = vmul.f32 %v5336_v12, %v10019_v52  ;;  %5357 = vpow2.f32 %v2821_v51  ;;  %v8633_v51 = vmul.f32 %v8515_v55, %v10021_v41  ;;  %v2835_v26 = vmul.f32 1.442695, %v2725_v13  ;;  %v10023_v55 = vld [vmem:[#allocation27_spill] sm:$0xff]  ;;  %v10027_v56 = vld [vmem:[#allocation29_spill] sm:$0xff] }
 0x5dd   :  { %v5340_v20 = vpop.eup %5339  ;;  %v8629_v45 = vmul.f32 %v5338_v16, %v8409_v31  ;;  %5359 = vpow2.f32 %v2823_v63  ;;  %v2833_v31 = vmul.f32 1.442695, %v2724_v47  ;;  %v2726_v63 = vsub.f32 0.0, %v8623_v19 }
 0x5de   :  { %v5342_v42 = vpop.eup %5341  ;;  %5361 = vpow2.f32 %v2827_v48  ;;  %v8642_v16 = vmul.f32 %v8533_v60, %v10022_v10  ;;  %v2432_v52 = vadd.f32 %v10023_v55, %v2276_v35  ;;  %v2593_v48 = vadd.f32 %v10024_v57, %v2276_v35  ;;  %v5866_v60 = vld [vmem:[%s9782_s1 + $0x180] sm:$0xff] }
 0x5df   :  { %v5344_v39 = vpop.eup %5343  ;;  %5363 = vpow2.f32 %v2825_v32  ;;  %v8647_v41 = vmul.f32 %v5332_v62, %v10025_v24  ;;  %v2837_v22 = vmul.f32 1.442695, %v2726_v63  ;;  %v2434_v32 = vadd.f32 %v8398_v40, %v2276_v35  ;;  %v5867_v40 = vld [vmem:[%s9782_s1 + $0x190] sm:$0xff] }
 0x5e0   :  { %v5346_v12 = vpop.eup %5345  ;;  %5365 = vpow2.f32 %v2829_v59  ;;  %v8656_v59 = vadd.f32 %v5866_v60, %v2432_v52  ;;  %v8659_v62 = vmul.f32 %v5340_v20, %v8414_v18  ;;  %v2595_v1 = vadd.f32 %v10027_v56, %v2276_v35  ;;  %v5868_v35 = vld [vmem:[%s9782_s1 + $0x188] sm:$0xff] }
 0x5e1   :  { %v5348_v13 = vpop.eup %5347  ;;  %5367 = vpow2.f32 %v2831_v17  ;;  %v8664_v17 = vadd.f32 %v5867_v40, %v2593_v48  ;;  %v8668_v63 = vmul.f32 %v5342_v42, %v8421_v49  ;;  %v8671_v55 = vmul.f32 %v5344_v39, %v8437_v25  ;;  %v5869_v48 = vld [vmem:[%s9782_s1 + $0x198] sm:$0xff]  ;;  %v10029_v40 = vld [vmem:[#allocation6_spill] sm:$0xff] }
 0x5e2   :  { %v5350_v47 = vpop.eup %5349  ;;  %v2909_v5 = vadd.f32 1.0, %v5348_v13  ;;  %5369 = vpow2.f32 %v2835_v26  ;;  %v2727_v18 = vsub.f32 0.0, %v8656_v59  ;;  %v8680_v57 = vadd.f32 %v5868_v35, %v2434_v32 }
 0x5e3   :  { %v5352_v10 = vpop.eup %5351  ;;  %5371 = vpow2.f32 %v2833_v31  ;;  %v8675_v31 = vmul.f32 %v5346_v12, %v8451_v44  ;;  %v8683_v42 = vmul.f32 %v5350_v47, %v8471_v0  ;;  %v4564_v44 = vpack.c.bf16 %v8526_v33, %v8430_v14 }
 0x5e4   :  { %v5354_v26 = vpop.eup %5353  ;;  %5373 = vrcp.f32 %v2909_v5  ;;  %v2839_v5 = vmul.f32 1.442695, %v2727_v18  ;;  %v2729_v12 = vsub.f32 0.0, %v8664_v17  ;;  %v8697_v0 = vadd.f32 %v5869_v48, %v2595_v1  ;;  %v10030_v18 = vld [vmem:[#allocation11_spill] sm:$0xff] }
 0x5e5   :  { %v5356_v20 = vpop.eup %5355  ;;  %v2908_v52 = vadd.f32 1.0, %v5354_v26  ;;  %5375 = vpow2.f32 %v2837_v22  ;;  %v8691_v22 = vmul.f32 %v5352_v10, %v8481_v2  ;;  %4565 = vmatprep.subr.bf16.mxu0 %v4564_v44  ;;  %v4596_v2 = vpack.c.bf16 %v8536_v3, %v8488_v34 }
 0x5e6   :  { %v5358_v49 = vpop.eup %5357  ;;  %v8686_v25 = vmul.f32 %v5356_v20, %v8502_v46  ;;  %v2281_v46 = vpop.permute.xlu1 %2280  ;;  %v2728_v60 = vsub.f32 0.0, %v8680_v57  ;;  %v10028_v10 = vpack.c.bf16 %v8445_v30, %v8367_v6  ;;  %v2730_v3 = vsub.f32 0.0, %v8697_v0  ;;  %v5870_v6 = vld [vmem:[%s9782_s1 + $0x1a0] sm:$0xff] }
 0x5e7   :  { %v5360_v39 = vpop.eup %5359  ;;  %5377 = vrcp.f32 %v2908_v52  ;;  %v2910_v32 = vadd.f32 1.0, %v5358_v49  ;;  %v2438_v56 = vadd.f32 %v10029_v40, %v2281_v46  ;;  %4597 = vmatprep.subr.bf16.mxu1 %v4596_v2  ;;  %v2599_v20 = vadd.f32 %v10030_v18, %v2281_v46  ;;  %v10031_v52 = vld [vmem:[#allocation7_spill] sm:$0xff]  ;;  %v10032_v49 = vld [vmem:[#allocation17_spill] sm:$0xff] }
 0x5e8   :  { %v5362_v13 = vpop.eup %5361  ;;  %v2911_v14 = vadd.f32 1.0, %v5360_v39  ;;  %5379 = vpow2.f32 %v2839_v5  ;;  %4567 = vmatpush1.bf16.msra.mxu0 %v10028_v10  ;;  %v2440_v35 = vadd.f32 %v10031_v52, %v2281_v46  ;;  %v10033_v5 = vld [vmem:[#allocation26_spill] sm:$0xff]  ;;  %v5871_v2 = vld [vmem:[%s9782_s1 + $0x1b0] sm:$0xff]  ;;  %v2843_v18 = vmul.f32 1.442695, %v2729_v12 }
 0x5e9   :  { %v5364_v33 = vpop.eup %5363  ;;  %v2913_v47 = vadd.f32 1.0, %v5362_v13  ;;  %v10034_v44 = vpack.c.bf16 %v10032_v49, %v10033_v5  ;;  %v8717_v30 = vadd.f32 %v5870_v6, %v2438_v56  ;;  %v10035_v39 = vld [vmem:[#allocation30_spill] sm:$0xff] }
 0x5ea   :  { %v5366_v1 = vpop.eup %5365  ;;  %5381 = vrcp.f32 %v2911_v14  ;;  %v2912_v26 = vadd.f32 1.0, %v5364_v33  ;;  %v2601_v48 = vadd.f32 %v10035_v39, %v2281_v46  ;;  %v8723_v33 = vadd.f32 %v5871_v2, %v2599_v20  ;;  %v5873_v46 = vld [vmem:[%s9782_s1 + $0x1b8] sm:$0xff]  ;;  %v10036_v2 = vld [vmem:[#allocation31_spill] sm:$0xff] }
 0x5eb   :  { %v5368_v34 = vpop.eup %5367  ;;  %5383 = vrcp.f32 %v2913_v47  ;;  %4599 = vmatpush1.bf16.msra.mxu1 %v10034_v44  ;;  %v5872_v47 = vld [vmem:[%s9782_s1 + $0x1a8] sm:$0xff]  ;;  %v2731_v49 = vsub.f32 0.0, %v8717_v30  ;;  %v2286_v44 = vpop.permute.xlu0 %2285  ;;  %v2914_v6 = vadd.f32 1.0, %v5366_v1 }
 0x5ec   :  { %v5370_v13 = vpop.eup %5369  ;;  %5385 = vrcp.f32 %v2910_v32  ;;  %v2915_v14 = vadd.f32 1.0, %v5368_v34  ;;  %v8728_v10 = vadd.f32 %v5872_v47, %v2440_v35  ;;  %v8733_v32 = vadd.f32 %v5873_v46, %v2601_v48 }
 0x5ed   :  { %v5372_v40 = vpop.eup %5371  ;;  %5387 = vrcp.f32 %v2912_v26  ;;  %v2917_v56 = vadd.f32 1.0, %v5370_v13  ;;  %v2841_v34 = vmul.f32 1.442695, %v2728_v60  ;;  %v2845_v26 = vmul.f32 1.442695, %v2730_v3  ;;  %v10037_v3 = vld [vmem:[#allocation32_spill] sm:$0xff] }
 0x5ee   :  { %v5374_v52 = vpop.eup %5373  ;;  %5389 = vrcp.f32 %v2915_v14  ;;  %v2916_v20 = vadd.f32 1.0, %v5372_v40  ;;  %v2733_v12 = vsub.f32 0.0, %v8723_v33  ;;  %v2732_v48 = vsub.f32 0.0, %v8728_v10 }
 0x5ef   :  { %v5376_v5 = vpop.eup %5375  ;;  %v8737_v35 = vmul.f32 %v5374_v52, %v8510_v7  ;;  %5391 = vrcp.f32 %v2917_v56  ;;  %v2734_v14 = vsub.f32 0.0, %v8733_v32  ;;  %v2444_v7 = vadd.f32 %v10036_v2, %v2286_v44  ;;  %v10038_v56 = vld [vmem:[#allocation19_spill] sm:$0xff] }
 0x5f0   :  { %5393 = vrcp.f32 %v2916_v20  ;;  %v2918_v39 = vadd.f32 1.0, %v5376_v5  ;;  %v2847_v47 = vmul.f32 1.442695, %v2731_v49  ;;  %v2605_v40 = vadd.f32 %v10037_v3, %v2286_v44  ;;  %v5874_v20 = vld [vmem:[%s9782_s1 + $0x1c0] sm:$0xff]  ;;  %v5875_v49 = vld [vmem:[%s9782_s1 + $0x1d0] sm:$0xff] }
 0x5f1   :  { %v5378_v13 = vpop.eup %5377  ;;  %5395 = vpow2.f32 %v2843_v18  ;;  %v2446_v46 = vadd.f32 %v10038_v56, %v2286_v44  ;;  %v2851_v52 = vmul.f32 1.442695, %v2733_v12  ;;  %v8750_v5 = vadd.f32 %v5874_v20, %v2444_v7  ;;  %v10040_v18 = vld [vmem:[#allocation20_spill] sm:$0xff] }
 0x5f2   :  { %5397 = vrcp.f32 %v2918_v39  ;;  %v5380_v1 = vpop.eup %5379  ;;  %v2607_v60 = vadd.f32 %v10040_v18, %v2286_v44  ;;  %v2849_v2 = vmul.f32 1.442695, %v2732_v48  ;;  %v8756_v39 = vadd.f32 %v5875_v49, %v2605_v40 }
 0x5f3   :  { %5399 = vpow2.f32 %v2841_v34  ;;  %10039 = vst [vmem:[#allocation10_spill] sm:$0xff] %v8750_v5  ;;  %v5876_v34 = vld [vmem:[%s9782_s1 + $0x1c8] sm:$0xff]  ;;  %v2853_v7 = vmul.f32 1.442695, %v2734_v14  ;;  %v2735_v44 = vsub.f32 0.0, %v8750_v5  ;;  %v2919_v40 = vadd.f32 1.0, %v5380_v1 }
 0x5f4   :  { %v5382_v24 = vpop.eup %5381  ;;  %5401 = vpow2.f32 %v2845_v26  ;;  %10041 = vst [vmem:[#allocation18_spill] sm:$0xff] %v8756_v39  ;;  %v8761_v12 = vadd.f32 %v5876_v34, %v2446_v46  ;;  %v5877_v26 = vld [vmem:[%s9782_s1 + $0x1d8] sm:$0xff]  ;;  %v2737_v20 = vsub.f32 0.0, %v8756_v39 }
 0x5f5   :  { %v5384_v3 = vpop.eup %5383  ;;  %5403 = vrcp.f32 %v2914_v6  ;;  %v8767_v48 = vadd.f32 %v5877_v26, %v2607_v60  ;;  %v8772_v49 = vmul.f32 %v5382_v24, %v8559_v9  ;;  %v2855_v6 = vmul.f32 1.442695, %v2735_v44  ;;  %v2291_v26 = vpop.permute.xlu1 %2290 }
 0x5f6   :  { %10042 = vst [vmem:[#allocation23_spill] sm:$0xff] %v8761_v12  ;;  %v5386_v56 = vpop.eup %5385  ;;  %5405 = vpow2.f32 %v2847_v47  ;;  %v2736_v18 = vsub.f32 0.0, %v8761_v12  ;;  %v8776_v5 = vmul.f32 %v5384_v3, %v8564_v61  ;;  %v2859_v60 = vmul.f32 1.442695, %v2737_v20 }
 0x5f7   :  { %v5388_v46 = vpop.eup %5387  ;;  %5407 = vpow2.f32 %v2851_v52  ;;  %v2738_v14 = vsub.f32 0.0, %v8767_v48  ;;  %v4568_v9 = vpack.c.bf16 %v8633_v51, %v8541_v53  ;;  %v4600_v61 = vpack.c.bf16 %v8642_v16, %v8552_v38  ;;  %v10044_v53 = vld [vmem:[#allocation14_spill] sm:$0xff] }
 0x5f8   :  { %v5390_v34 = vpop.eup %5389  ;;  %5409 = vpow2.f32 %v2849_v2  ;;  %v2857_v1 = vmul.f32 1.442695, %v2736_v18  ;;  %v10043_v2 = vld [vmem:[#allocation8_spill] sm:$0xff]  ;;  %v8790_v20 = vmul.f32 %v5378_v13, %v8531_v8  ;;  %v2611_v51 = vadd.f32 %v10044_v53, %v2291_v26  ;;  %v5878_v8 = vld [vmem:[%s9782_s1 + $0x1e0] sm:$0xff] }
 0x5f9   :  { %v5392_v47 = vpop.eup %5391  ;;  %v8779_v39 = vmul.f32 %v5390_v34, %v8601_v58  ;;  %5411 = vpow2.f32 %v2853_v7  ;;  %v2861_v12 = vmul.f32 1.442695, %v2738_v14  ;;  %v2450_v3 = vadd.f32 %v10043_v2, %v2291_v26  ;;  %4569 = vmatprep.subr.bf16.mxu0 %v4568_v9  ;;  %4601 = vmatprep.subr.bf16.mxu1 %v4600_v61  ;;  %v10047_v34 = vld [vmem:[#allocation5_spill] sm:$0xff]  ;;  %v10048_v9 = vld [vmem:[#allocation15_spill] sm:$0xff] }
 0x5fa   :  { %v5394_v24 = vpop.eup %5393  ;;  %v8784_v52 = vmul.f32 %v5392_v47, %v8606_v4  ;;  %5413 = vpow2.f32 %v2855_v6  ;;  %v10045_v38 = vpack.c.bf16 %v8505_v15, %v8496_v28  ;;  %v3040_v6 = vmul.f32 %v5388_v46, %v8571_v29  ;;  %v5880_v46 = vld [vmem:[%s9782_s1 + $0x1e8] sm:$0xff] }
 0x5fb   :  { %v5396_v44 = vpop.eup %5395  ;;  %v4582_v58 = vpack.c.bf16 %v8779_v39, %v8772_v49  ;;  %5415 = vrcp.f32 %v2919_v40  ;;  %v8803_v16 = vadd.f32 %v5878_v8, %v2450_v3  ;;  %v3038_v40 = vmul.f32 %v5386_v56, %v8547_v11  ;;  %v5879_v11 = vld [vmem:[%s9782_s1 + $0x1f0] sm:$0xff] }
 0x5fc   :  { %v5398_v7 = vpop.eup %5397  ;;  %v4614_v4 = vpack.c.bf16 %v8784_v52, %v8776_v5  ;;  %v2921_v18 = vadd.f32 1.0, %v5396_v44  ;;  %5417 = vpow2.f32 %v2859_v60  ;;  %4571 = vmatpush1.bf16.msra.mxu0 %v10045_v38  ;;  %v10046_v14 = vpack.c.bf16 %v8523_v37, %v8518_v36 }
 0x5fd   :  { %v5400_v13 = vpop.eup %5399  ;;  %5419 = vpow2.f32 %v2857_v1  ;;  %v2452_v60 = vadd.f32 %v10047_v34, %v2291_v26  ;;  %v2739_v47 = vsub.f32 0.0, %v8803_v16  ;;  %v2613_v61 = vadd.f32 %v10048_v9, %v2291_v26 }
 0x5fe   :  { %4603 = vmatpush1.bf16.msra.mxu1 %v10046_v14  ;;  %v5402_v28 = vpop.eup %5401  ;;  %v2920_v15 = vadd.f32 1.0, %v5400_v13  ;;  %5421 = vpow2.f32 %v2861_v12  ;;  %v8816_v29 = vadd.f32 %v5879_v11, %v2611_v51  ;;  %v4572_v36 = vpack.c.bf16 %v8659_v62, %v8647_v41  ;;  %v5881_v41 = vld [vmem:[%s9782_s1 + $0x1f8] sm:$0xff] }
 0x5ff   :  { %v5404_v2 = vpop.eup %5403  ;;  %5423 = vrcp.f32 %v2921_v18  ;;  %v2922_v3 = vadd.f32 1.0, %v5402_v28  ;;  %v3044_v56 = vmul.f32 %v5394_v24, %v8611_v23  ;;  %v2863_v12 = vmul.f32 1.442695, %v2739_v47 }
 0x600   :  { %v5406_v37 = vpop.eup %5405  ;;  %5425 = vrcp.f32 %v2920_v15  ;;  %v8824_v1 = vadd.f32 %v5880_v46, %v2452_v60  ;;  %v3046_v44 = vmul.f32 %v5398_v7, %v8623_v19  ;;  %v8830_v62 = vadd.f32 %v5881_v41, %v2613_v61  ;;  %4573 = vmatprep.subr.bf16.mxu0 %v4572_v36 }
 0x601   :  { %v5408_v26 = vpop.eup %5407  ;;  %5427 = vrcp.f32 %v2922_v3  ;;  %v2923_v53 = vadd.f32 1.0, %v5406_v37  ;;  %v3042_v24 = vmul.f32 %v5404_v2, %v8578_v54  ;;  %v4604_v18 = vpack.c.bf16 %v8668_v63, %v8651_v43 }
 0x602   :  { %v5410_v23 = vpop.eup %5409  ;;  %v2925_v51 = vadd.f32 1.0, %v5408_v26  ;;  %5429 = vpow2.f32 %v2863_v12  ;;  %v10049_v19 = vpack.c.bf16 %v8617_v50, %v8589_v27  ;;  %v2741_v8 = vsub.f32 0.0, %v8816_v29 }
 0x603   :  { %v5412_v7 = vpop.eup %5411  ;;  %5431 = vrcp.f32 %v2923_v53  ;;  %v2924_v38 = vadd.f32 1.0, %v5410_v23  ;;  %v4576_v13 = vpack.c.bf16 %v8790_v20, %v8683_v42  ;;  %v2740_v34 = vsub.f32 0.0, %v8824_v1  ;;  %4605 = vmatprep.subr.bf16.mxu1 %v4604_v18  ;;  %v10053_v23 = vld [vmem:[#allocation10_spill] sm:$0xff] }
 0x604   :  { %4575 = vmatpush1.bf16.msra.mxu0 %v10049_v19  ;;  %v5414_v14 = vpop.eup %5413  ;;  %5433 = vrcp.f32 %v2925_v51  ;;  %v2926_v54 = vadd.f32 1.0, %v5412_v7  ;;  %v4608_v43 = vpack.c.bf16 %v3038_v40, %v8691_v22  ;;  %v2742_v27 = vsub.f32 0.0, %v8830_v62 }
 0x605   :  { %v5416_v63 = vpop.eup %5415  ;;  %5435 = vrcp.f32 %v2924_v38  ;;  %v10050_v50 = vpack.c.bf16 %v8629_v45, %v8626_v21  ;;  %4577 = vmatprep.subr.bf16.mxu0 %v4576_v13  ;;  %v4580_v60 = vpack.c.bf16 %v3044_v56, %v3040_v6  ;;  %v4612_v28 = vpack.c.bf16 %v3046_v44, %v3042_v24 }
 0x606   :  { %v5418_v42 = vpop.eup %5417  ;;  %5437 = vrcp.f32 %v2926_v54  ;;  %v2927_v20 = vadd.f32 1.0, %v5414_v14  ;;  %v10051_v15 = vpack.c.bf16 %v8686_v25, %v8671_v55  ;;  %v2867_v40 = vmul.f32 1.442695, %v2741_v8  ;;  %v10054_v14 = vld [vmem:[#allocation18_spill] sm:$0xff] }
 0x607   :  { %4607 = vmatpush1.bf16.msra.mxu1 %v10050_v50  ;;  %v5420_v22 = vpop.eup %5419  ;;  %v2865_v9 = vmul.f32 1.442695, %v2740_v34  ;;  %v2869_v2 = vmul.f32 1.442695, %v2742_v27  ;;  %v10052_v21 = vpack.c.bf16 %v8737_v35, %v8675_v31  ;;  %v3047_v35 = vmul.f32 %v5416_v63, %v8656_v59  ;;  %v10055_v63 = vld [vmem:[#allocation23_spill] sm:$0xff] }
 0x608   :  { %4609 = vmatprep.subr.bf16.mxu1 %v4608_v43  ;;  %4579 = vmatpush1.bf16.msra.mxu0 %v10051_v15  ;;  %v5422_v47 = vpop.eup %5421  ;;  %5439 = vrcp.f32 %v2927_v20  ;;  %v2929_v59 = vadd.f32 1.0, %v5418_v42  ;;  %v2928_v46 = vadd.f32 1.0, %v5420_v22  ;;  %v10056_v15 = vmov 0.0  }
 0x609   :  { %4581 = vmatprep.subr.bf16.mxu0 %v4580_v60  ;;  %v5424_v61 = vpop.eup %5423  ;;  %5441 = vpow2.f32 %v2867_v40  ;;  %v2930_v26 = vadd.f32 1.0, %v5422_v47 }
 0x60a   :  { %v5426_v45 = vpop.eup %5425  ;;  %5443 = vpow2.f32 %v2865_v9  ;;  %v3049_v39 = vmul.f32 %v5424_v61, %v8664_v17 }
 0x60b   :  { %4611 = vmatpush1.bf16.msra.mxu1 %v10052_v21  ;;  %v5428_v55 = vpop.eup %5427  ;;  %5445 = vpow2.f32 %v2869_v2  ;;  %v3048_v37 = vmul.f32 %v5426_v45, %v8680_v57  ;;  %v10059_v2 = vld [vmem:[#allocation21_spill] sm:$0xff] }
 0x60c   :  { %4613 = vmatprep.subr.bf16.mxu1 %v4612_v28  ;;  %4583 = vmatpush1.bf16.msra.mxu0 %v4582_v58  ;;  %v5430_v25 = vpop.eup %5429  ;;  %v3050_v5 = vmul.f32 %v5428_v55, %v8697_v0  ;;  %v3206_v21 = vmul.f32 1.2177334, %v10059_v2  ;;  %v5904_v2 = vld [vmem:[%s9782_s1 + $0x30] sm:$0xff] }
 0x60d   :  { %v5432_v6 = vpop.eup %5431  ;;  %v2931_v3 = vadd.f32 1.0, %v5430_v25 }
 0x60e   :  { %v5434_v31 = vpop.eup %5433  ;;  %v3051_v11 = vmul.f32 %v5432_v6, %v8717_v30 }
 0x60f   :  { %4615 = vmatpush1.bf16.msra.mxu1 %v4614_v4  ;;  %v5436_v36 = vpop.eup %5435  ;;  %v3053_v49 = vmul.f32 %v5434_v31, %v8723_v33  ;;  %5447 = vrcp.f32 %v2931_v3  ;;  %v10061_v3 = vld [vmem:[#allocation22_spill] sm:$0xff] }
 0x610   :  { %v5438_v58 = vpop.eup %5437  ;;  %v4586_v56 = vpack.c.bf16 %v3051_v11, %v3047_v35  ;;  %v3052_v12 = vmul.f32 %v5436_v36, %v8728_v10  ;;  %5449 = vrcp.f32 %v2929_v59  ;;  %v3208_v31 = vmul.f32 1.2177334, %v10061_v3  ;;  %v5891_v59 = vld [vmem:[%s9784_s3 + $0x40] sm:$0xff] }
 0x611   :  { %v4618_v52 = vpack.c.bf16 %v3053_v49, %v3049_v39  ;;  %v3054_v4 = vmul.f32 %v5438_v58, %v8733_v32  ;;  %5451 = vrcp.f32 %v2928_v46  ;;  %v5883_v49 = vld [vmem:[%s9784_s3] sm:$0xff]  ;;  %v5884_v58 = vld [vmem:[%s9784_s3 + $0x8] sm:$0xff] }
 0x612   :  { %v4584_v30 = vpack.c.bf16 %v3052_v12, %v3048_v37  ;;  %v5440_v17 = vpop.eup %5439  ;;  %5453 = vrcp.f32 %v2930_v26  ;;  %v5885_v37 = vld [vmem:[%s9784_s3 + $0x10] sm:$0xff]  ;;  %v5887_v12 = vld [vmem:[%s9784_s3 + $0x20] sm:$0xff]  ;;  %v5892_v46 = vld [vmem:[%s9784_s3 + $0x48] sm:$0xff] }
 0x613   :  { %v4616_v44 = vpack.c.bf16 %v3054_v4, %v3050_v5  ;;  %v5442_v33 = vpop.eup %5441  ;;  %v3055_v24 = vmul.f32 %v5440_v17, %v10053_v23  ;;  %v5888_v5 = vld [vmem:[%s9784_s3 + $0x28] sm:$0xff]  ;;  %v5890_v4 = vld [vmem:[%s9784_s3 + $0x38] sm:$0xff] }
 0x614   :  { %4585 = vmatprep.subr.bf16.mxu0 %v4584_v30  ;;  %v5444_v57 = vpop.eup %5443  ;;  %v2933_v53 = vadd.f32 1.0, %v5442_v33  ;;  %v5893_v30 = vld [vmem:[%s9784_s3 + $0x50] sm:$0xff]  ;;  %v5894_v26 = vld [vmem:[%s9784_s3 + $0x58] sm:$0xff]  ;;  %v5896_v17 = vld [vmem:[%s9784_s3 + $0x68] sm:$0xff] }
 0x615   :  { %4617 = vmatprep.subr.bf16.mxu1 %v4616_v44  ;;  %4587 = vmatpush1.bf16.msra.mxu0 %v4586_v56  ;;  %v5446_v10 = vpop.eup %5445  ;;  %v2932_v0 = vadd.f32 1.0, %v5444_v57  ;;  %v5886_v56 = vld [vmem:[%s9784_s3 + $0x18] sm:$0xff]  ;;  %v5895_v44 = vld [vmem:[%s9784_s3 + $0x60] sm:$0xff]  ;;  %v5897_v33 = vld [vmem:[%s9784_s3 + $0x70] sm:$0xff] }
 0x616   :  { %4619 = vmatpush1.bf16.msra.mxu1 %v4618_v52  ;;  %5455 = vrcp.f32 %v2933_v53  ;;  %v2934_v32 = vadd.f32 1.0, %v5446_v10  ;;  %v5889_v52 = vld [vmem:[%s9784_s3 + $0x30] sm:$0xff]  ;;  %v5898_v57 = vld [vmem:[%s9784_s3 + $0x78] sm:$0xff]  ;;  %v3237_v53 = vpop.permute.xlu0 %3236 }
 0x617   :  { %5457 = vrcp.f32 %v2932_v0 }
 0x618   :  { %5459 = vrcp.f32 %v2934_v32 }
 0x619   :  { %v5448_v41 = vpop.eup %5447 }
 0x61a   :  { %v3059_v51 = vmul.f32 %v5448_v41, %v8803_v16  ;;  %v5450_v19 = vpop.eup %5449 }
 0x61b   :  { %v5452_v7 = vpop.eup %5451  ;;  %v3057_v54 = vmul.f32 %v5450_v19, %v10054_v14  ;;  %v5901_v14 = vld [vmem:[%s9782_s1 + $0x8] sm:$0xff] }
 0x61c   :  { %v4590_v18 = vpack.c.bf16 %v3059_v51, %v3055_v24  ;;  %v5454_v38 = vpop.eup %5453  ;;  %v3056_v27 = vmul.f32 %v5452_v7, %v10055_v63  ;;  %v5902_v63 = vld [vmem:[%s9782_s1 + $0x18] sm:$0xff] }
 0x61d   :  { %v3058_v60 = vmul.f32 %v5454_v38, %v8767_v48  ;;  %v3242_v38 = vpop.permute.xlu1 %3241 }
 0x620   :  { %v5456_v8 = vpop.eup %5455 }
 0x621   :  { %v5458_v13 = vpop.eup %5457  ;;  %v3061_v34 = vmul.f32 %v5456_v8, %v8816_v29  ;;  %v5882_v29 = vld [vmem:[%s9785_s4] sm:$0xff]  ;;  %v5900_v8 = vld [vmem:[%s9782_s1 + $0x10] sm:$0xff] }
 0x622   :  { %v5460_v43 = vpop.eup %5459  ;;  %v3060_v50 = vmul.f32 %v5458_v13, %v8824_v1  ;;  %v10057_v1 = vld [vmem:[#allocation9_spill] sm:$0xff] }
 0x623   :  { %v4622_v28 = vpack.c.bf16 %v3061_v34, %v3057_v54  ;;  %v3062_v16 = vmul.f32 %v5460_v43, %v8830_v62  ;;  %v3205_v22 = vmul.f32 1.2177334, %v10057_v1  ;;  %v10058_v62 = vld [vmem:[#allocation16_spill] sm:$0xff] }
 0x624   :  { %v4588_v42 = vpack.c.bf16 %v3060_v50, %v3056_v27  ;;  %v3207_v40 = vmul.f32 1.2177334, %v10058_v62 }
 0x625   :  { %v4620_v20 = vpack.c.bf16 %v3062_v16, %v3058_v60 }
 0x626   :  { %4589 = vmatprep.subr.bf16.mxu0 %v4588_v42 }
 0x627   :  { %4621 = vmatprep.subr.bf16.mxu1 %v4620_v20  ;;  %4591 = vmatpush1.bf16.msra.mxu0 %v4590_v18  ;;  %v5899_v18 = vld [vmem:[%s9782_s1] sm:$0xff] }
 0x628   :  { %4623 = vmatpush1.bf16.msra.mxu1 %v4622_v28 }
 0x62a   :  { %3128 = vmatmul.mubr.f32.vlgmr.msra.gmra.mrb[100].mxu0 %v5882_v29 }
 0x62b   :  { %3199 = vmatmul.mubr.f32.vlgmr.msra.gmra.mrb[100].mxu1 %v5882_v29  ;;  %3378 = vmatprep.mubr.f32.mxu0 %v10056_v15 }
 0x62c   :  { %3539 = vmatprep.mubr.f32.mxu1 %v10056_v15 }
 0x6fd   :  { %v3129_v48 = vpop.f32.mrb[100].mxu0 }
 0x6fe   :  { %v3209_v47 = vmul.f32 -0.6663484, %v3129_v48  ;;  %v3200_v9 = vpop.f32.mrb[100].mxu1  ;;  %v3131_v61 = vpop.f32.mrb[101].mxu0 }
 0x6ff   :  { %v3211_v45 = vmul.f32 -0.6663484, %v3200_v9  ;;  %v3210_v55 = vmul.f32 -0.6663484, %v3131_v61  ;;  %v3202_v25 = vpop.f32.mrb[101].mxu1 }
 0x700   :  { %v8883_v6 = vadd.f32 %v3209_v47, %v3205_v22  ;;  %v3212_v35 = vmul.f32 -0.6663484, %v3202_v25  ;;  %v5903_v22 = vld [vmem:[%s9782_s1 + $0x20] sm:$0xff]  ;;  %v3247_v47 = vpop.permute.xlu0 %3246 }
 0x701   :  { %v8886_v11 = vadd.f32 %v3211_v45, %v3207_v40  ;;  %v8888_v36 = vadd.f32 %v3210_v55, %v3206_v21  ;;  %v5905_v45 = vld [vmem:[%s9782_s1 + $0x28] sm:$0xff] }
 0x702   :  { %10060 = vst [vmem:[#allocation12_spill] sm:$0xff] %v8883_v6  ;;  %v8890_v39 = vadd.f32 %v3212_v35, %v3208_v31  ;;  %v5906_v35 = vld [vmem:[%s9782_s1 + $0x38] sm:$0xff] }
 0x703   :  { %10062 = vst [vmem:[#allocation13_spill] sm:$0xff] %v8886_v11  ;;  %10063 = vst [vmem:[#allocation27_spill] sm:$0xff] %v8888_v36  ;;  %3314 = vmatprep.subr.mxu0 %v8888_v36 }
 0x704   :  { %10064 = vst [vmem:[#allocation28_spill] sm:$0xff] %v8890_v39  ;;  %3475 = vmatprep.subr.mxu1 %v8890_v39  ;;  %3315 = vmatpush1.msra.mxu0 %v8883_v6 }
 0x705   :  { %3476 = vmatpush1.msra.mxu1 %v8886_v11  ;;  %4400 = vmatmul.mubr.msk.f32.vlgmr.msra.gmra.mrb[102].mxu0 %vm137_vm0, %v5883_v49 }
 0x706   :  { %4416 = vmatmul.mubr.msk.f32.vlgmr.msra.gmra.mrb[102].mxu1 %vm137_vm0, %v5883_v49  ;;  %3384 = vmatprep.mubr.f32.mxu0 %v10056_v15 }
 0x707   :  { %3545 = vmatprep.mubr.f32.mxu1 %v10056_v15 }
 0x709   :  { %4401 = vmatmul.mubr.msk.f32.gmra.mrb[104].mxu0 %vm137_vm0, %v5884_v58 }
 0x70a   :  { %4417 = vmatmul.mubr.msk.f32.gmra.mrb[104].mxu1 %vm137_vm0, %v5884_v58  ;;  %3390 = vmatprep.mubr.f32.mxu0 %v10056_v15 }
 0x70b   :  { %3551 = vmatprep.mubr.f32.mxu1 %v10056_v15 }
 0x70d   :  { %4402 = vmatmul.mubr.msk.f32.gmra.mrb[106].mxu0 %vm137_vm0, %v5885_v37 }
 0x70e   :  { %4418 = vmatmul.mubr.msk.f32.gmra.mrb[106].mxu1 %vm137_vm0, %v5885_v37  ;;  %3396 = vmatprep.mubr.f32.mxu0 %v10056_v15 }
 0x70f   :  { %3557 = vmatprep.mubr.f32.mxu1 %v10056_v15 }
 0x711   :  { %4403 = vmatmul.mubr.msk.f32.gmra.mrb[108].mxu0 %vm137_vm0, %v5886_v56 }
 0x712   :  { %4419 = vmatmul.mubr.msk.f32.gmra.mrb[108].mxu1 %vm137_vm0, %v5886_v56  ;;  %3402 = vmatprep.mubr.f32.mxu0 %v10056_v15 }
 0x713   :  { %3563 = vmatprep.mubr.f32.mxu1 %v10056_v15 }
 0x715   :  { %4404 = vmatmul.mubr.msk.f32.gmra.mrb[110].mxu0 %vm137_vm0, %v5887_v12 }
 0x716   :  { %4420 = vmatmul.mubr.msk.f32.gmra.mrb[110].mxu1 %vm137_vm0, %v5887_v12  ;;  %3408 = vmatprep.mubr.f32.mxu0 %v10056_v15 }
 0x717   :  { %3569 = vmatprep.mubr.f32.mxu1 %v10056_v15 }
 0x719   :  { %4405 = vmatmul.mubr.msk.f32.gmra.mrb[112].mxu0 %vm137_vm0, %v5888_v5 }
 0x71a   :  { %4421 = vmatmul.mubr.msk.f32.gmra.mrb[112].mxu1 %vm137_vm0, %v5888_v5  ;;  %3414 = vmatprep.mubr.f32.mxu0 %v10056_v15 }
 0x71b   :  { %3575 = vmatprep.mubr.f32.mxu1 %v10056_v15 }
 0x71d   :  { %4406 = vmatmul.mubr.msk.f32.gmra.mrb[114].mxu0 %vm137_vm0, %v5889_v52 }
 0x71e   :  { %4422 = vmatmul.mubr.msk.f32.gmra.mrb[114].mxu1 %vm137_vm0, %v5889_v52  ;;  %3420 = vmatprep.mubr.f32.mxu0 %v10056_v15 }
 0x71f   :  { %3581 = vmatprep.mubr.f32.mxu1 %v10056_v15 }
 0x721   :  { %4407 = vmatmul.mubr.msk.f32.gmra.mrb[116].mxu0 %vm137_vm0, %v5890_v4 }
 0x722   :  { %4423 = vmatmul.mubr.msk.f32.gmra.mrb[116].mxu1 %vm137_vm0, %v5890_v4  ;;  %3426 = vmatprep.mubr.f32.mxu0 %v10056_v15 }
 0x723   :  { %3587 = vmatprep.mubr.f32.mxu1 %v10056_v15 }
 0x725   :  { %4408 = vmatmul.mubr.msk.f32.gmra.mrb[118].mxu0 %vm137_vm0, %v5891_v59 }
 0x726   :  { %4424 = vmatmul.mubr.msk.f32.gmra.mrb[118].mxu1 %vm137_vm0, %v5891_v59  ;;  %3432 = vmatprep.mubr.f32.mxu0 %v10056_v15 }
 0x727   :  { %3593 = vmatprep.mubr.f32.mxu1 %v10056_v15 }
 0x729   :  { %4409 = vmatmul.mubr.msk.f32.gmra.mrb[120].mxu0 %vm137_vm0, %v5892_v46 }
 0x72a   :  { %4425 = vmatmul.mubr.msk.f32.gmra.mrb[120].mxu1 %vm137_vm0, %v5892_v46  ;;  %3438 = vmatprep.mubr.f32.mxu0 %v10056_v15 }
 0x72b   :  { %3599 = vmatprep.mubr.f32.mxu1 %v10056_v15 }
 0x72d   :  { %4410 = vmatmul.mubr.msk.f32.gmra.mrb[122].mxu0 %vm137_vm0, %v5893_v30 }
 0x72e   :  { %4426 = vmatmul.mubr.msk.f32.gmra.mrb[122].mxu1 %vm137_vm0, %v5893_v30  ;;  %3444 = vmatprep.mubr.f32.mxu0 %v10056_v15  ;;  %v3252_v30 = vpop.permute.xlu1 %3251 }
 0x72f   :  { %3605 = vmatprep.mubr.f32.mxu1 %v10056_v15 }
 0x731   :  { %4411 = vmatmul.mubr.msk.f32.gmra.mrb[124].mxu0 %vm137_vm0, %v5894_v26 }
 0x732   :  { %4427 = vmatmul.mubr.msk.f32.gmra.mrb[124].mxu1 %vm137_vm0, %v5894_v26  ;;  %3450 = vmatprep.mubr.f32.mxu0 %v10056_v15 }
 0x733   :  { %3611 = vmatprep.mubr.f32.mxu1 %v10056_v15 }
 0x735   :  { %4412 = vmatmul.mubr.msk.f32.gmra.mrb[126].mxu0 %vm137_vm0, %v5895_v44 }
 0x736   :  { %4428 = vmatmul.mubr.msk.f32.gmra.mrb[126].mxu1 %vm137_vm0, %v5895_v44  ;;  %3456 = vmatprep.mubr.f32.mxu0 %v10056_v15 }
 0x737   :  { %3617 = vmatprep.mubr.f32.mxu1 %v10056_v15 }
 0x739   :  { %4413 = vmatmul.mubr.msk.f32.gmra.mrb[128].mxu0 %vm137_vm0, %v5896_v17 }
 0x73a   :  { %4429 = vmatmul.mubr.msk.f32.gmra.mrb[128].mxu1 %vm137_vm0, %v5896_v17  ;;  %3462 = vmatprep.mubr.f32.mxu0 %v10056_v15  ;;  %v5907_v17 = vld [vmem:[%s9782_s1 + $0x40] sm:$0xff] }
 0x73b   :  { %3623 = vmatprep.mubr.f32.mxu1 %v10056_v15 }
 0x73d   :  { %4414 = vmatmul.mubr.msk.f32.gmra.mrb[130].mxu0 %vm137_vm0, %v5897_v33 }
 0x73e   :  { %4430 = vmatmul.mubr.msk.f32.gmra.mrb[130].mxu1 %vm137_vm0, %v5897_v33  ;;  %3468 = vmatprep.mubr.f32.mxu0 %v10056_v15 }
 0x73f   :  { %3629 = vmatprep.mubr.f32.mxu1 %v10056_v15 }
 0x741   :  { %4415 = vmatmul.mubr.msk.f32.gmra.mrb[132].mxu0 %vm137_vm0, %v5898_v57 }
 0x742   :  { %4431 = vmatmul.mubr.msk.f32.gmra.mrb[132].mxu1 %vm137_vm0, %v5898_v57  ;;  %4148 = vmatprep.mubr.f32.mxu0 %v10056_v15 }
 0x743   :  { %4219 = vmatprep.mubr.f32.mxu1 %v10056_v15 }
 0x7d8   :  { %v3380_v10 = vpop.f32.mrb[102].mxu0 }
 0x7d9   :  { %v3381_v0 = vadd.f32 %v3380_v10, %v3237_v53  ;;  %v3541_v32 = vpop.f32.mrb[102].mxu1  ;;  %v3382_v41 = vpop.f32.mrb[103].mxu0  ;;  %v5908_v10 = vld [vmem:[%s9782_s1 + $0x50] sm:$0xff] }
 0x7da   :  { %v3542_v23 = vadd.f32 %v3541_v32, %v3237_v53  ;;  %v3383_v24 = vadd.f32 %v3382_v41, %v3237_v53  ;;  %v3543_v51 = vpop.f32.mrb[103].mxu1 }
 0x7db   :  { %v9011_v19 = vadd.f32 %v5899_v18, %v3381_v0  ;;  %v3544_v7 = vadd.f32 %v3543_v51, %v3237_v53 }
 0x7dc   :  { %v9016_v13 = vadd.f32 %v5900_v8, %v3542_v23  ;;  %v9021_v54 = vadd.f32 %v5901_v14, %v3383_v24  ;;  %v3386_v34 = vpop.f32.mrb[104].mxu0  ;;  %v5909_v8 = vld [vmem:[%s9782_s1 + $0x48] sm:$0xff] }
 0x7dd   :  { %v3700_v43 = vsub.f32 0.0, %v9011_v19  ;;  %v9027_v27 = vadd.f32 %v5902_v63, %v3544_v7  ;;  %v3387_v50 = vadd.f32 %v3386_v34, %v3242_v38  ;;  %v3547_v60 = vpop.f32.mrb[104].mxu1  ;;  %v3388_v28 = vpop.f32.mrb[105].mxu0  ;;  %v5910_v63 = vld [vmem:[%s9782_s1 + $0x58] sm:$0xff] }
 0x7de   :  { %v3702_v16 = vsub.f32 0.0, %v9016_v13  ;;  %v3701_v42 = vsub.f32 0.0, %v9021_v54  ;;  %v3548_v20 = vadd.f32 %v3547_v60, %v3242_v38  ;;  %v3389_v29 = vadd.f32 %v3388_v28, %v3242_v38  ;;  %v3549_v15 = vpop.f32.mrb[105].mxu1  ;;  %v5911_v60 = vld [vmem:[%s9782_s1 + $0x60] sm:$0xff] }
 0x7df   :  { %v3764_v48 = vmul.f32 1.442695, %v3700_v43  ;;  %v3703_v1 = vsub.f32 0.0, %v9027_v27  ;;  %v9035_v62 = vadd.f32 %v5903_v22, %v3387_v50  ;;  %v3550_v40 = vadd.f32 %v3549_v15, %v3242_v38 }
 0x7e0   :  { %v3768_v9 = vmul.f32 1.442695, %v3702_v16  ;;  %v3766_v61 = vmul.f32 1.442695, %v3701_v42  ;;  %v9040_v21 = vadd.f32 %v5904_v2, %v3548_v20  ;;  %v9045_v55 = vadd.f32 %v5905_v45, %v3389_v29  ;;  %v3392_v25 = vpop.f32.mrb[106].mxu0  ;;  %v5912_v29 = vld [vmem:[%s9782_s1 + $0x70] sm:$0xff] }
 0x7e1   :  { %5461 = vpow2.f32 %v3764_v48  ;;  %v3770_v3 = vmul.f32 1.442695, %v3703_v1  ;;  %v3704_v31 = vsub.f32 0.0, %v9035_v62  ;;  %v9051_v49 = vadd.f32 %v5906_v35, %v3550_v40  ;;  %v3553_v58 = vpop.f32.mrb[106].mxu1  ;;  %v3394_v37 = vpop.f32.mrb[107].mxu0 }
 0x7e2   :  { %5463 = vpow2.f32 %v3768_v9  ;;  %v3706_v56 = vsub.f32 0.0, %v9040_v21  ;;  %v3705_v12 = vsub.f32 0.0, %v9045_v55  ;;  %v3393_v5 = vadd.f32 %v3392_v25, %v3247_v47  ;;  %v3555_v52 = vpop.f32.mrb[107].mxu1  ;;  %v3257_v25 = vpop.permute.xlu0 %3256 }
 0x7e3   :  { %5465 = vpow2.f32 %v3766_v61  ;;  %v3772_v4 = vmul.f32 1.442695, %v3704_v31  ;;  %v3707_v59 = vsub.f32 0.0, %v9051_v49  ;;  %v3554_v46 = vadd.f32 %v3553_v58, %v3247_v47 }
 0x7e4   :  { %5467 = vpow2.f32 %v3770_v3  ;;  %v3776_v26 = vmul.f32 1.442695, %v3706_v56  ;;  %v3774_v44 = vmul.f32 1.442695, %v3705_v12  ;;  %v9059_v33 = vadd.f32 %v5907_v17, %v3393_v5  ;;  %v3398_v57 = vpop.f32.mrb[108].mxu0  ;;  %v5913_v12 = vld [vmem:[%s9782_s1 + $0x68] sm:$0xff] }
 0x7e5   :  { %5469 = vpow2.f32 %v3772_v4  ;;  %v3778_v53 = vmul.f32 1.442695, %v3707_v59  ;;  %v9064_v0 = vadd.f32 %v5908_v10, %v3554_v46  ;;  %v3395_v32 = vadd.f32 %v3394_v37, %v3247_v47  ;;  %v3559_v41 = vpop.f32.mrb[108].mxu1  ;;  %v3400_v23 = vpop.f32.mrb[109].mxu0 }
 0x7e6   :  { %5471 = vpow2.f32 %v3776_v26  ;;  %v3708_v24 = vsub.f32 0.0, %v9059_v33  ;;  %v3556_v51 = vadd.f32 %v3555_v52, %v3247_v47  ;;  %v3399_v18 = vadd.f32 %v3398_v57, %v3252_v30  ;;  %v3561_v7 = vpop.f32.mrb[109].mxu1 }
 0x7e7   :  { %5473 = vpow2.f32 %v3774_v44  ;;  %v3710_v38 = vsub.f32 0.0, %v9064_v0  ;;  %v9071_v14 = vadd.f32 %v5909_v8, %v3395_v32  ;;  %v3560_v34 = vadd.f32 %v3559_v41, %v3252_v30 }
 0x7e8   :  { %5475 = vpow2.f32 %v3778_v53  ;;  %v3780_v43 = vmul.f32 1.442695, %v3708_v24  ;;  %v9076_v50 = vadd.f32 %v5910_v63, %v3556_v51  ;;  %v9081_v28 = vadd.f32 %v5911_v60, %v3399_v18  ;;  %v3404_v16 = vpop.f32.mrb[110].mxu0  ;;  %v5915_v51 = vld [vmem:[%s9782_s1 + $0x80] sm:$0xff] }
 0x7e9   :  { %v3784_v42 = vmul.f32 1.442695, %v3710_v38  ;;  %v3709_v20 = vsub.f32 0.0, %v9071_v14  ;;  %v9087_v15 = vadd.f32 %v5912_v29, %v3560_v34  ;;  %v3401_v48 = vadd.f32 %v3400_v23, %v3252_v30  ;;  %v3565_v1 = vpop.f32.mrb[110].mxu1  ;;  %v3406_v22 = vpop.f32.mrb[111].mxu0  ;;  %v5914_v23 = vld [vmem:[%s9782_s1 + $0x78] sm:$0xff] }
 0x7ea   :  { %5477 = vpow2.f32 %v3780_v43  ;;  %v3711_v40 = vsub.f32 0.0, %v9076_v50  ;;  %v3567_v47 = vpop.f32.mrb[111].mxu1  ;;  %v3712_v2 = vsub.f32 0.0, %v9081_v28  ;;  %v3562_v31 = vadd.f32 %v3561_v7, %v3252_v30  ;;  %v5916_v34 = vld [vmem:[%s9782_s1 + $0x90] sm:$0xff] }
 0x7eb   :  { %v5462_v9 = vpop.eup %5461  ;;  %5479 = vpow2.f32 %v3784_v42  ;;  %v3782_v61 = vmul.f32 1.442695, %v3709_v20  ;;  %v3714_v56 = vsub.f32 0.0, %v9087_v15  ;;  %v9095_v5 = vadd.f32 %v5913_v12, %v3401_v48 }
 0x7ec   :  { %v5464_v45 = vpop.eup %5463  ;;  %v3892_v3 = vadd.f32 1.0, %v5462_v9  ;;  %v3410_v35 = vpop.f32.mrb[112].mxu0  ;;  %v3786_v30 = vmul.f32 1.442695, %v3711_v40  ;;  %v3405_v26 = vadd.f32 %v3404_v16, %v3257_v25  ;;  %v3788_v53 = vmul.f32 1.442695, %v3712_v2 }
 0x7ed   :  { %v5466_v58 = vpop.eup %5465  ;;  %v3894_v37 = vadd.f32 1.0, %v5464_v45  ;;  %5481 = vpow2.f32 %v3782_v61  ;;  %v9097_v52 = vpop.f32.mrb[112].mxu1  ;;  %v3566_v10 = vadd.f32 %v3565_v1, %v3257_v25  ;;  %v9106_v24 = vadd.f32 %v5914_v23, %v3562_v31 }
 0x7ee   :  { %v9099_v4 = vpop.f32.mrb[113].mxu0  ;;  %v5468_v59 = vpop.eup %5467  ;;  %5483 = vrcp.f32 %v3892_v3  ;;  %v3893_v46 = vadd.f32 1.0, %v5466_v58  ;;  %v9111_v18 = vadd.f32 %v5915_v51, %v3405_v26  ;;  %v3407_v63 = vadd.f32 %v3406_v22, %v3257_v25  ;;  %v5917_v22 = vld [vmem:[%s9782_s1 + $0x88] sm:$0xff] }
 0x7ef   :  { %v9101_v44 = vpop.f32.mrb[113].mxu1  ;;  %v5470_v17 = vpop.eup %5469  ;;  %5485 = vrcp.f32 %v3894_v37  ;;  %v3895_v57 = vadd.f32 1.0, %v5468_v59  ;;  %v9118_v43 = vadd.f32 %v5916_v34, %v3566_v10  ;;  %v3792_v29 = vmul.f32 1.442695, %v3714_v56 }
 0x7f0   :  { %v5472_v32 = vpop.eup %5471  ;;  %5487 = vrcp.f32 %v3893_v46  ;;  %v3896_v41 = vadd.f32 1.0, %v5470_v17  ;;  %v9113_v7 = vpop.f32.mrb[114].mxu0  ;;  %v3568_v48 = vadd.f32 %v3567_v47, %v3257_v25  ;;  %v3713_v61 = vsub.f32 0.0, %v9095_v5  ;;  %v5918_v47 = vld [vmem:[%s9782_s1 + $0x98] sm:$0xff] }
 0x7f1   :  { %v5474_v38 = vpop.eup %5473  ;;  %5489 = vrcp.f32 %v3895_v57  ;;  %v3898_v8 = vadd.f32 1.0, %v5472_v32  ;;  %v9120_v60 = vpop.f32.mrb[114].mxu1  ;;  %v9130_v2 = vadd.f32 %v5917_v22, %v3407_v63  ;;  %v3715_v3 = vsub.f32 0.0, %v9106_v24 }
 0x7f2   :  { %v9122_v16 = vpop.f32.mrb[115].mxu0  ;;  %v5476_v42 = vpop.eup %5475  ;;  %5491 = vrcp.f32 %v3896_v41  ;;  %v3897_v20 = vadd.f32 1.0, %v5474_v38  ;;  %v9136_v25 = vadd.f32 %v5918_v47, %v3568_v48  ;;  %v3716_v12 = vsub.f32 0.0, %v9111_v18 }
 0x7f3   :  { %v9124_v1 = vpop.f32.mrb[115].mxu1  ;;  %v3262_v40 = vpop.permute.xlu1 %3261  ;;  %5493 = vrcp.f32 %v3898_v8  ;;  %v3899_v9 = vadd.f32 1.0, %v5476_v42  ;;  %v3718_v59 = vsub.f32 0.0, %v9118_v43  ;;  %v3717_v57 = vsub.f32 0.0, %v9130_v2 }
 0x7f4   :  { %v5478_v45 = vpop.eup %5477  ;;  %5495 = vrcp.f32 %v3897_v20  ;;  %v3411_v31 = vadd.f32 %v3410_v35, %v3262_v40  ;;  %v9138_v58 = vpop.f32.mrb[116].mxu0  ;;  %v5919_v35 = vld [vmem:[%s9782_s1 + $0xa0] sm:$0xff]  ;;  %v3719_v23 = vsub.f32 0.0, %v9136_v25  ;;  %v3572_v51 = vadd.f32 %v9097_v52, %v3262_v40  ;;  %v5921_v52 = vld [vmem:[%s9782_s1 + $0xa8] sm:$0xff] }
 0x7f5   :  { %v5480_v37 = vpop.eup %5479  ;;  %5497 = vrcp.f32 %v3899_v9  ;;  %v3900_v56 = vadd.f32 1.0, %v5478_v45  ;;  %v9142_v46 = vpop.f32.mrb[116].mxu1  ;;  %v3413_v38 = vadd.f32 %v9099_v4, %v3262_v40  ;;  %v3790_v34 = vmul.f32 1.442695, %v3713_v61  ;;  %v5920_v9 = vld [vmem:[%s9782_s1 + $0xb0] sm:$0xff] }
 0x7f6   :  { %v9144_v26 = vpop.f32.mrb[117].mxu0  ;;  %v3902_v17 = vadd.f32 1.0, %v5480_v37  ;;  %5499 = vpow2.f32 %v3786_v30  ;;  %v9150_v10 = vadd.f32 %v5919_v35, %v3411_v31  ;;  %v9152_v32 = vpop.f32.mrb[117].mxu1  ;;  %v3794_v63 = vmul.f32 1.442695, %v3715_v3 }
 0x7f7   :  { %v5482_v41 = vpop.eup %5481  ;;  %5501 = vrcp.f32 %v3900_v56  ;;  %v3796_v48 = vmul.f32 1.442695, %v3716_v12  ;;  %v9162_v22 = vadd.f32 %v5920_v9, %v3572_v51  ;;  %v9167_v4 = vadd.f32 %v5921_v52, %v3413_v38  ;;  %v3267_v12 = vpop.permute.xlu0 %3266 }
 0x7f8   :  { %v5484_v8 = vpop.eup %5483  ;;  %5503 = vrcp.f32 %v3902_v17  ;;  %v3901_v30 = vadd.f32 1.0, %v5482_v41  ;;  %v9157_v42 = vpop.f32.mrb[118].mxu0  ;;  %v3720_v47 = vsub.f32 0.0, %v9150_v10  ;;  %v3574_v31 = vadd.f32 %v9101_v44, %v3262_v40 }
 0x7f9   :  { %v5486_v20 = vpop.eup %5485  ;;  %5505 = vpow2.f32 %v3788_v53  ;;  %10065 = vst [vmem:[#allocation24_spill] sm:$0xff] %v9167_v4  ;;  %v9169_v45 = vpop.f32.mrb[118].mxu1  ;;  %v3800_v53 = vmul.f32 1.442695, %v3718_v59  ;;  %v9178_v17 = vmul.f32 %v5484_v8, %v9011_v19  ;;  %v3798_v35 = vmul.f32 1.442695, %v3717_v57 }
 0x7fa   :  { %v9171_v61 = vpop.f32.mrb[119].mxu0  ;;  %v5488_v3 = vpop.eup %5487  ;;  %5507 = vrcp.f32 %v3901_v30  ;;  %v3802_v41 = vmul.f32 1.442695, %v3719_v23  ;;  %v3722_v38 = vsub.f32 0.0, %v9162_v22  ;;  %v5922_v59 = vld [vmem:[%s9782_s1 + $0xb8] sm:$0xff]  ;;  %v3417_v44 = vadd.f32 %v9113_v7, %v3267_v12 }
 0x7fb   :  { %v9175_v37 = vpop.f32.mrb[119].mxu1  ;;  %v5490_v56 = vpop.eup %5489  ;;  %5509 = vpow2.f32 %v3792_v29  ;;  %v9184_v30 = vadd.f32 %v5922_v59, %v3574_v31  ;;  %v9190_v19 = vmul.f32 %v5486_v20, %v9016_v13  ;;  %v3721_v57 = vsub.f32 0.0, %v9167_v4 }
 0x7fc   :  { %v5492_v51 = vpop.eup %5491  ;;  %5511 = vpow2.f32 %v3790_v34  ;;  %v9187_v40 = vpop.f32.mrb[120].mxu0  ;;  %v9201_v52 = vmul.f32 %v5488_v3, %v9021_v54  ;;  %v3804_v13 = vmul.f32 1.442695, %v3720_v47 }
 0x7fd   :  { %10066 = vst [vmem:[#allocation25_spill] sm:$0xff] %v9184_v30  ;;  %v5494_v9 = vpop.eup %5493  ;;  %v9193_v29 = vmul.f32 %v5492_v51, %v9035_v62  ;;  %5513 = vpow2.f32 %v3794_v63  ;;  %v9196_v23 = vpop.f32.mrb[120].mxu1  ;;  %v3723_v31 = vsub.f32 0.0, %v9184_v30  ;;  %v3578_v51 = vadd.f32 %v9120_v60, %v3267_v12 }
 0x7fe   :  { %v9198_v8 = vpop.f32.mrb[121].mxu0  ;;  %v5496_v34 = vpop.eup %5495  ;;  %v9204_v7 = vmul.f32 %v5494_v9, %v9040_v21  ;;  %5515 = vpow2.f32 %v3796_v48  ;;  %v3808_v21 = vmul.f32 1.442695, %v3722_v38  ;;  %v5923_v48 = vld [vmem:[%s9782_s1 + $0xc0] sm:$0xff]  ;;  %v3806_v60 = vmul.f32 1.442695, %v3721_v57 }
 0x7ff   :  { %v9206_v20 = vpop.f32.mrb[121].mxu1  ;;  %v5498_v62 = vpop.eup %5497  ;;  %5517 = vpow2.f32 %v3800_v53  ;;  %v9217_v3 = vadd.f32 %v5923_v48, %v3417_v44  ;;  %v9222_v53 = vmul.f32 %v5490_v56, %v9027_v27  ;;  %v5924_v38 = vld [vmem:[%s9782_s1 + $0xd0] sm:$0xff]  ;;  %v3419_v48 = vadd.f32 %v9122_v16, %v3267_v12 }
 0x800   :  { %v5500_v59 = vpop.eup %5499  ;;  %5519 = vpow2.f32 %v3798_v35  ;;  %v9219_v47 = vpop.f32.mrb[122].mxu0  ;;  %v9231_v44 = vadd.f32 %v5924_v38, %v3578_v51  ;;  %v3580_v27 = vadd.f32 %v9124_v1, %v3267_v12  ;;  %v9238_v57 = vmul.f32 %v5496_v34, %v9045_v55  ;;  %v5925_v1 = vld [vmem:[%s9782_s1 + $0xc8] sm:$0xff] }
 0x801   :  { %v5502_v9 = vpop.eup %5501  ;;  %v3903_v63 = vadd.f32 1.0, %v5500_v59  ;;  %5521 = vpow2.f32 %v3802_v41  ;;  %v9224_v39 = vpop.f32.mrb[122].mxu1  ;;  %v9241_v59 = vmul.f32 %v5498_v62, %v9051_v49  ;;  %v3724_v16 = vsub.f32 0.0, %v9217_v3  ;;  %v5926_v62 = vld [vmem:[%s9782_s1 + $0xd8] sm:$0xff] }
 0x802   :  { %v9226_v54 = vpop.f32.mrb[123].mxu0  ;;  %v5504_v35 = vpop.eup %5503  ;;  %5523 = vpow2.f32 %v3804_v13  ;;  %10067 = vst [vmem:[#allocation29_spill] sm:$0xff] %v9231_v44  ;;  %v3810_v13 = vmul.f32 1.442695, %v3723_v31  ;;  %v9249_v12 = vadd.f32 %v5925_v1, %v3419_v48  ;;  %v9254_v49 = vmul.f32 %v5502_v9, %v9059_v33 }
 0x803   :  { %v9235_v56 = vpop.f32.mrb[123].mxu1  ;;  %v5506_v41 = vpop.eup %5505  ;;  %5525 = vrcp.f32 %v3903_v63  ;;  %v9259_v63 = vadd.f32 %v5926_v62, %v3580_v27  ;;  %v3726_v9 = vsub.f32 0.0, %v9231_v44 }
 0x804   :  { %v9243_v36 = vpop.eup %5507  ;;  %v3272_v11 = vpop.permute.xlu1 %3271  ;;  %v3904_v51 = vadd.f32 1.0, %v5506_v41  ;;  %5527 = vpow2.f32 %v3808_v21  ;;  %10068 = vst [vmem:[#allocation6_spill] sm:$0xff] %v9249_v12  ;;  %v9267_v41 = vmul.f32 %v5504_v35, %v9064_v0  ;;  %v3725_v27 = vsub.f32 0.0, %v9249_v12 }
 0x805   :  { %v9251_v55 = vpop.f32.mrb[124].mxu0  ;;  %v5510_v34 = vpop.eup %5509  ;;  %5529 = vpow2.f32 %v3806_v60  ;;  %10069 = vst [vmem:[#allocation11_spill] sm:$0xff] %v9259_v63  ;;  %v3423_v31 = vadd.f32 %v9138_v58, %v3272_v11  ;;  %v5927_v58 = vld [vmem:[%s9782_s1 + $0xe0] sm:$0xff]  ;;  %v3812_v35 = vmul.f32 1.442695, %v3724_v16  ;;  %v3425_v16 = vadd.f32 %v9144_v26, %v3272_v11 }
 0x806   :  { %v9262_v21 = vpop.f32.mrb[124].mxu1  ;;  %v9264_v38 = vpop.f32.mrb[125].mxu0  ;;  %10070 = vst [vmem:[#allocation7_spill] sm:$0xff] %v9267_v41  ;;  %5531 = vrcp.f32 %v3904_v51  ;;  %v3906_v33 = vadd.f32 1.0, %v5510_v34  ;;  %v3584_v51 = vadd.f32 %v9142_v46, %v3272_v11  ;;  %v3586_v46 = vadd.f32 %v9152_v32, %v3272_v11  ;;  %v5929_v11 = vld [vmem:[%s9782_s1 + $0xe8] sm:$0xff] }
 0x807   :  { %v5512_v48 = vpop.eup %5511  ;;  %v9270_v60 = vpop.f32.mrb[125].mxu1  ;;  %5533 = vpow2.f32 %v3810_v13  ;;  %v9276_v62 = vadd.f32 %v5927_v58, %v3423_v31  ;;  %v3727_v13 = vsub.f32 0.0, %v9259_v63  ;;  %v9291_v63 = vmul.f32 1.442695, %v3725_v27 }
 0x808   :  { %10071 = vst [vmem:[#allocation17_spill] sm:$0xff] %v9270_v60  ;;  %v5514_v1 = vpop.eup %5513  ;;  %v3905_v6 = vadd.f32 1.0, %v5512_v48  ;;  %5535 = vrcp.f32 %v3906_v33  ;;  %v9279_v34 = vpop.f32.mrb[126].mxu0  ;;  %v9301_v26 = vadd.f32 %v5929_v11, %v3425_v16  ;;  %v9317_v16 = vmul.f32 %v9243_v36, %v9071_v14 }
 0x809   :  { %10072 = vst [vmem:[#allocation26_spill] sm:$0xff] %v9276_v62  ;;  %v5516_v30 = vpop.eup %5515  ;;  %v3907_v0 = vadd.f32 1.0, %v5514_v1  ;;  %10073 = vst [vmem:[#allocation30_spill] sm:$0xff] %v9279_v34  ;;  %v3728_v12 = vsub.f32 0.0, %v9276_v62  ;;  %v9283_v44 = vpop.f32.mrb[126].mxu1 }
 0x80a   :  { %v5518_v4 = vpop.eup %5517  ;;  %5537 = vrcp.f32 %v3905_v6  ;;  %v3908_v48 = vadd.f32 1.0, %v5516_v30  ;;  %10074 = vst [vmem:[#allocation31_spill] sm:$0xff] %v9283_v44  ;;  %v9285_v60 = vpop.f32.mrb[127].mxu0  ;;  %v3816_v30 = vmul.f32 1.442695, %v3726_v9  ;;  %v3729_v14 = vsub.f32 0.0, %v9301_v26 }
 0x80b   :  { %v5520_v31 = vpop.eup %5519  ;;  %5539 = vrcp.f32 %v3907_v0  ;;  %v3910_v33 = vadd.f32 1.0, %v5518_v4  ;;  %v9289_v1 = vpop.f32.mrb[127].mxu1  ;;  %v5928_v4 = vld [vmem:[%s9782_s1 + $0xf0] sm:$0xff] }
 0x80c   :  { %10075 = vst [vmem:[#allocation32_spill] sm:$0xff] %v9289_v1  ;;  %v5522_v58 = vpop.eup %5521  ;;  %5541 = vrcp.f32 %v3908_v48  ;;  %v3909_v6 = vadd.f32 1.0, %v5520_v31  ;;  %v3277_v62 = vpop.permute.xlu0 %3276  ;;  %v9296_v0 = vadd.f32 %v5928_v4, %v3584_v51  ;;  %v5930_v48 = vld [vmem:[%s9782_s1 + $0xf8] sm:$0xff] }
 0x80d   :  { %v5524_v34 = vpop.eup %5523  ;;  %5543 = vrcp.f32 %v3910_v33  ;;  %v3911_v44 = vadd.f32 1.0, %v5522_v58  ;;  %v9303_v32 = vpop.f32.mrb[128].mxu0  ;;  %v9308_v31 = vadd.f32 %v5930_v48, %v3586_v46  ;;  %v3429_v51 = vadd.f32 %v9157_v42, %v3277_v62  ;;  %v5931_v42 = vld [vmem:[%s9782_s1 + $0x100] sm:$0xff] }
 0x80e   :  { %10076 = vst [vmem:[#allocation19_spill] sm:$0xff] %v9303_v32  ;;  %v5526_v9 = vpop.eup %5525  ;;  %5545 = vrcp.f32 %v3909_v6  ;;  %v3912_v27 = vadd.f32 1.0, %v5524_v34  ;;  %v9311_v33 = vpop.f32.mrb[128].mxu1  ;;  %v3818_v6 = vmul.f32 1.442695, %v3727_v13  ;;  %v3730_v36 = vsub.f32 0.0, %v9296_v0 }
 0x80f   :  { %10077 = vst [vmem:[#allocation20_spill] sm:$0xff] %v9311_v33  ;;  %v9313_v58 = vpop.f32.mrb[129].mxu0  ;;  %v5528_v4 = vpop.eup %5527  ;;  %5547 = vrcp.f32 %v3911_v44  ;;  %v3820_v34 = vmul.f32 1.442695, %v3728_v12  ;;  %v9324_v48 = vadd.f32 %v5931_v42, %v3429_v51 }
 0x810   :  { %10078 = vst [vmem:[#allocation8_spill] sm:$0xff] %v9313_v58  ;;  %v9319_v11 = vpop.f32.mrb[129].mxu1  ;;  %v5530_v32 = vpop.eup %5529  ;;  %5549 = vrcp.f32 %v3912_v27  ;;  %v3914_v46 = vadd.f32 1.0, %v5528_v4  ;;  %v3590_v58 = vadd.f32 %v9169_v45, %v3277_v62  ;;  %v3731_v27 = vsub.f32 0.0, %v9308_v31  ;;  %v5932_v45 = vld [vmem:[%s9782_s1 + $0x110] sm:$0xff] }
 0x811   :  { %10079 = vst [vmem:[#allocation14_spill] sm:$0xff] %v9319_v11  ;;  %v5532_v33 = vpop.eup %5531  ;;  %v3913_v1 = vadd.f32 1.0, %v5530_v32  ;;  %5551 = vpow2.f32 %v3812_v35  ;;  %v9329_v44 = vpop.f32.mrb[130].mxu0 }
 0x812   :  { %10080 = vst [vmem:[#allocation5_spill] sm:$0xff] %v9329_v44  ;;  %v5534_v12 = vpop.eup %5533  ;;  %v9332_v13 = vmul.f32 %v5532_v33, %v9081_v28  ;;  %5553 = vrcp.f32 %v3914_v46  ;;  %v9338_v51 = vadd.f32 %v5932_v45, %v3590_v58  ;;  %v9340_v35 = vpop.f32.mrb[130].mxu1  ;;  %v3431_v44 = vadd.f32 %v9171_v61, %v3277_v62  ;;  %v5933_v61 = vld [vmem:[%s9782_s1 + $0x108] sm:$0xff] }
 0x813   :  { %10081 = vst [vmem:[#allocation15_spill] sm:$0xff] %v9340_v35  ;;  %v9342_v32 = vpop.f32.mrb[131].mxu0  ;;  %v5536_v4 = vpop.eup %5535  ;;  %5555 = vrcp.f32 %v3913_v1  ;;  %v3915_v42 = vadd.f32 1.0, %v5534_v12  ;;  %v3592_v28 = vadd.f32 %v9175_v37, %v3277_v62  ;;  %v3732_v45 = vsub.f32 0.0, %v9324_v48 }
 0x814   :  { %10082 = vst [vmem:[#allocation10_spill] sm:$0xff] %v9342_v32  ;;  %v9346_v33 = vpop.f32.mrb[131].mxu1  ;;  %v5538_v46 = vpop.eup %5537  ;;  %v9351_v58 = vmul.f32 %v5536_v4, %v9087_v15  ;;  %5557 = vpow2.f32 %v3816_v30  ;;  %v3824_v1 = vmul.f32 1.442695, %v3730_v36  ;;  %v3734_v12 = vsub.f32 0.0, %v9338_v51  ;;  %v5934_v36 = vld [vmem:[%s9782_s1 + $0x118] sm:$0xff] }
 0x815   :  { %10083 = vst [vmem:[#allocation18_spill] sm:$0xff] %v9346_v33  ;;  %v5540_v32 = vpop.eup %5539  ;;  %5559 = vrcp.f32 %v3915_v42  ;;  %v9358_v37 = vadd.f32 %v5933_v61, %v3431_v44  ;;  %v9360_v62 = vpop.f32.mrb[132].mxu0  ;;  %v3822_v30 = vmul.f32 1.442695, %v3729_v14  ;;  %v9368_v4 = vadd.f32 %v5934_v36, %v3592_v28 }
 0x816   :  { %10084 = vst [vmem:[#allocation23_spill] sm:$0xff] %v9351_v58  ;;  %10085 = vst [vmem:[#allocation9_spill] sm:$0xff] %v9360_v62  ;;  %v5542_v11 = vpop.eup %5541  ;;  %5561 = vpow2.f32 %v9291_v63  ;;  %v9370_v42 = vpop.f32.mrb[132].mxu1  ;;  %v9375_v62 = vmul.f32 %v5526_v9, %v9076_v50  ;;  %v3826_v15 = vmul.f32 1.442695, %v3731_v27 }
 0x817   :  { %10086 = vst [vmem:[#allocation16_spill] sm:$0xff] %v9370_v42  ;;  %v9372_v33 = vpop.f32.mrb[133].mxu0  ;;  %v5544_v44 = vpop.eup %5543  ;;  %5563 = vpow2.f32 %v3818_v6  ;;  %v3733_v63 = vsub.f32 0.0, %v9358_v37  ;;  %v3828_v41 = vmul.f32 1.442695, %v3732_v45  ;;  %v3735_v28 = vsub.f32 0.0, %v9368_v4 }
 0x818   :  { %10087 = vst [vmem:[#allocation21_spill] sm:$0xff] %v9372_v33  ;;  %v3282_v61 = vpop.permute.xlu1 %3281  ;;  %v9378_v14 = vpop.f32.mrb[133].mxu1  ;;  %5565 = vpow2.f32 %v3820_v34  ;;  %v9383_v33 = vmul.f32 %v5542_v11, %v9111_v18  ;;  %v3832_v50 = vmul.f32 1.442695, %v3734_v12  ;;  %v5935_v34 = vld [vmem:[%s9782_s1 + $0x120] sm:$0xff]  ;;  %v5936_v18 = vld [vmem:[%s9782_s1 + $0x130] sm:$0xff] }
 0x819   :  { %10088 = vst [vmem:[#allocation22_spill] sm:$0xff] %v9378_v14  ;;  %v5546_v35 = vpop.eup %5545  ;;  %v3435_v36 = vadd.f32 %v9187_v40, %v3282_v61  ;;  %5567 = vpow2.f32 %v3824_v1  ;;  %v3596_v9 = vadd.f32 %v9196_v23, %v3282_v61  ;;  %v3830_v27 = vmul.f32 1.442695, %v3733_v63 }
 0x81a   :  { %v5548_v42 = vpop.eup %5547  ;;  %5569 = vpow2.f32 %v3822_v30  ;;  %v3834_v58 = vmul.f32 1.442695, %v3735_v28  ;;  %v3437_v11 = vadd.f32 %v9198_v8, %v3282_v61  ;;  %v3598_v63 = vadd.f32 %v9206_v20, %v3282_v61  ;;  %v5937_v20 = vld [vmem:[%s9782_s1 + $0x128] sm:$0xff] }
 0x81b   :  { %v5550_v6 = vpop.eup %5549  ;;  %v9389_v45 = vadd.f32 %v5935_v34, %v3435_v36  ;;  %5571 = vpow2.f32 %v3826_v15  ;;  %v9397_v23 = vadd.f32 %v5936_v18, %v3596_v9  ;;  %v9428_v9 = vmul.f32 %v5546_v35, %v9130_v2  ;;  %v5938_v34 = vld [vmem:[%s9782_s1 + $0x138] sm:$0xff] }
 0x81c   :  { %v5552_v14 = vpop.eup %5551  ;;  %v9392_v40 = vmul.f32 %v5550_v6, %v9150_v10  ;;  %5573 = vpow2.f32 %v3828_v41  ;;  %v9405_v10 = vmul.f32 %v5544_v44, %v9118_v43  ;;  %v9418_v61 = vadd.f32 %v5937_v20, %v3437_v11 }
 0x81d   :  { %v5554_v1 = vpop.eup %5553  ;;  %v3916_v12 = vadd.f32 1.0, %v5552_v14  ;;  %v3736_v30 = vsub.f32 0.0, %v9389_v45  ;;  %5575 = vpow2.f32 %v3832_v50  ;;  %v9413_v14 = vmul.f32 %v5538_v46, %v9095_v5  ;;  %v3287_v46 = vpop.permute.xlu0 %3286 }
 0x81e   :  { %v9402_v28 = vpop.eup %5555  ;;  %v9410_v36 = vmul.f32 %v5554_v1, %v9162_v22  ;;  %v9423_v44 = vmul.f32 %v5540_v32, %v9106_v24  ;;  %v3738_v6 = vsub.f32 0.0, %v9397_v23  ;;  %v9434_v18 = vadd.f32 %v5938_v34, %v3598_v63 }
 0x81f   :  { %v5558_v8 = vpop.eup %5557  ;;  %5577 = vrcp.f32 %v3916_v12  ;;  %v3836_v41 = vmul.f32 1.442695, %v3736_v30  ;;  %v3441_v11 = vadd.f32 %v9219_v47, %v3287_v46  ;;  %v9439_v2 = vmul.f32 %v5548_v42, %v9136_v25  ;;  %v5940_v25 = vld [vmem:[%s9782_s1 + $0x150] sm:$0xff] }
 0x820   :  { %v9420_v43 = vpop.eup %5559  ;;  %v3918_v50 = vadd.f32 1.0, %v5558_v8  ;;  %5579 = vpow2.f32 %v3830_v27  ;;  %v3602_v27 = vadd.f32 %v9224_v39, %v3287_v46  ;;  %v3739_v63 = vsub.f32 0.0, %v9434_v18  ;;  %v5939_v8 = vld [vmem:[%s9782_s1 + $0x140] sm:$0xff] }
 0x821   :  { %v5562_v5 = vpop.eup %5561  ;;  %5581 = vpow2.f32 %v3834_v58  ;;  %v3737_v58 = vsub.f32 0.0, %v9418_v61  ;;  %v9446_v47 = vadd.f32 %v5939_v8, %v3441_v11  ;;  %v3840_v34 = vmul.f32 1.442695, %v3738_v6 }
 0x822   :  { %v5564_v24 = vpop.eup %5563  ;;  %5583 = vrcp.f32 %v3918_v50  ;;  %v3917_v32 = vadd.f32 1.0, %v5562_v5  ;;  %v9451_v42 = vadd.f32 %v5940_v25, %v3602_v27  ;;  %v3604_v27 = vadd.f32 %v9235_v56, %v3287_v46 }
 0x823   :  { %v5566_v1 = vpop.eup %5565  ;;  %v3919_v35 = vadd.f32 1.0, %v5564_v24  ;;  %5585 = vpow2.f32 %v3836_v41  ;;  %v3443_v41 = vadd.f32 %v9226_v54, %v3287_v46  ;;  %v3740_v24 = vsub.f32 0.0, %v9446_v47 }
 0x824   :  { %v5568_v12 = vpop.eup %5567  ;;  %5587 = vrcp.f32 %v3917_v32  ;;  %v3920_v30 = vadd.f32 1.0, %v5566_v1  ;;  %v5941_v1 = vld [vmem:[%s9782_s1 + $0x148] sm:$0xff]  ;;  %v3838_v8 = vmul.f32 1.442695, %v3737_v58  ;;  %v3742_v25 = vsub.f32 0.0, %v9451_v42 }
 0x825   :  { %v5570_v39 = vpop.eup %5569  ;;  %5589 = vrcp.f32 %v3919_v35  ;;  %v3922_v20 = vadd.f32 1.0, %v5568_v12  ;;  %v9458_v35 = vadd.f32 %v5941_v1, %v3443_v41  ;;  %v3844_v1 = vmul.f32 1.442695, %v3740_v24 }
 0x826   :  { %v5572_v50 = vpop.eup %5571  ;;  %5591 = vrcp.f32 %v3920_v30  ;;  %v3921_v5 = vadd.f32 1.0, %v5570_v39  ;;  %v3842_v30 = vmul.f32 1.442695, %v3739_v63  ;;  %v4624_v56 = vpack.c.bf16 %v9238_v57, %v9201_v52  ;;  %v3292_v63 = vpop.permute.xlu1 %3291 }
 0x827   :  { %v5574_v32 = vpop.eup %5573  ;;  %5593 = vrcp.f32 %v3922_v20  ;;  %v3923_v11 = vadd.f32 1.0, %v5572_v50  ;;  %v5942_v20 = vld [vmem:[%s9782_s1 + $0x158] sm:$0xff]  ;;  %v4656_v46 = vpack.c.bf16 %v9241_v59, %v9222_v53  ;;  %v3447_v24 = vadd.f32 %v9251_v55, %v3292_v63 }
 0x828   :  { %v5576_v12 = vpop.eup %5575  ;;  %5595 = vrcp.f32 %v3921_v5  ;;  %v3924_v54 = vadd.f32 1.0, %v5574_v32  ;;  %v9465_v50 = vadd.f32 %v5942_v20, %v3604_v27  ;;  %v3741_v32 = vsub.f32 0.0, %v9458_v35  ;;  %4625 = vmatprep.subr.bf16.mxu0 %v4624_v56 }
 0x829   :  { %v5578_v39 = vpop.eup %5577  ;;  %5597 = vrcp.f32 %v3923_v11  ;;  %v3926_v6 = vadd.f32 1.0, %v5576_v12  ;;  %4657 = vmatprep.subr.bf16.mxu1 %v4656_v46  ;;  %v3608_v52 = vadd.f32 %v9262_v21, %v3292_v63  ;;  %v3848_v59 = vmul.f32 1.442695, %v3742_v25  ;;  %v10091_v25 = vld [vmem:[#allocation17_spill] sm:$0xff] }
 0x82a   :  { %v5580_v41 = vpop.eup %5579  ;;  %5599 = vrcp.f32 %v3924_v54  ;;  %v3743_v11 = vsub.f32 0.0, %v9465_v50  ;;  %v9476_v53 = vmul.f32 %v5578_v39, %v9217_v3  ;;  %v10089_v54 = vpack.c.bf16 %v9193_v29, %v9178_v17  ;;  %v5943_v3 = vld [vmem:[%s9782_s1 + $0x160] sm:$0xff]  ;;  %v5944_v17 = vld [vmem:[%s9782_s1 + $0x170] sm:$0xff] }
 0x82b   :  { %v5582_v58 = vpop.eup %5581  ;;  %5601 = vrcp.f32 %v3926_v6  ;;  %v3925_v5 = vadd.f32 1.0, %v5580_v41  ;;  %v10090_v6 = vpack.c.bf16 %v9204_v7, %v9190_v19  ;;  %v9488_v21 = vadd.f32 %v5943_v3, %v3447_v24  ;;  %v5945_v7 = vld [vmem:[%s9782_s1 + $0x168] sm:$0xff]  ;;  %v10094_v3 = vld [vmem:[#allocation24_spill] sm:$0xff] }
 0x82c   :  { %v5584_v12 = vpop.eup %5583  ;;  %v3927_v27 = vadd.f32 1.0, %v5582_v58  ;;  %5603 = vpow2.f32 %v3840_v34  ;;  %4627 = vmatpush1.bf16.msra.mxu0 %v10089_v54  ;;  %v3449_v34 = vadd.f32 %v9264_v38, %v3292_v63  ;;  %v9493_v29 = vadd.f32 %v5944_v17, %v3608_v52  ;;  %v10092_v24 = vld [vmem:[#allocation26_spill] sm:$0xff]  ;;  %v10093_v54 = vld [vmem:[#allocation29_spill] sm:$0xff]  ;;  %v10099_v17 = vld [vmem:[#allocation11_spill] sm:$0xff] }
 0x82d   :  { %v5586_v57 = vpop.eup %5585  ;;  %5605 = vrcp.f32 %v3925_v5  ;;  %4659 = vmatpush1.bf16.msra.mxu1 %v10090_v6  ;;  %v3846_v19 = vmul.f32 1.442695, %v3741_v32  ;;  %v3610_v41 = vadd.f32 %v10091_v25, %v3292_v63  ;;  %v3850_v46 = vmul.f32 1.442695, %v3743_v11  ;;  %v5946_v32 = vld [vmem:[%s9782_s1 + $0x178] sm:$0xff] }
 0x82e   :  { %v5588_v20 = vpop.eup %5587  ;;  %5607 = vrcp.f32 %v3927_v27  ;;  %v3928_v55 = vadd.f32 1.0, %v5586_v57  ;;  %v9498_v38 = vadd.f32 %v5945_v7, %v3449_v34  ;;  %v3744_v58 = vsub.f32 0.0, %v9488_v21 }
 0x82f   :  { %v5590_v39 = vpop.eup %5589  ;;  %5609 = vpow2.f32 %v3838_v8  ;;  %v3746_v5 = vsub.f32 0.0, %v9493_v29  ;;  %v9510_v57 = vadd.f32 %v5946_v32, %v3610_v41  ;;  %v9513_v11 = vmul.f32 %v5584_v12, %v10093_v54  ;;  %v3297_v41 = vpop.permute.xlu0 %3296  ;;  %v10097_v32 = vld [vmem:[#allocation31_spill] sm:$0xff]  ;;  %v10098_v54 = vld [vmem:[#allocation6_spill] sm:$0xff] }
 0x830   :  { %v5592_v56 = vpop.eup %5591  ;;  %5611 = vrcp.f32 %v3928_v55  ;;  %v3745_v8 = vsub.f32 0.0, %v9498_v38  ;;  %v3852_v34 = vmul.f32 1.442695, %v3744_v58  ;;  %v10095_v58 = vld [vmem:[#allocation25_spill] sm:$0xff]  ;;  %v9538_v22 = vmul.f32 %v5590_v39, %v10099_v17  ;;  %v10100_v39 = vld [vmem:[#allocation32_spill] sm:$0xff] }
 0x831   :  { %v5594_v27 = vpop.eup %5593  ;;  %v9504_v52 = vmul.f32 %v5592_v56, %v10092_v24  ;;  %5613 = vpow2.f32 %v3842_v30  ;;  %v9520_v30 = vmul.f32 %v9402_v28, %v10094_v3  ;;  %v3856_v7 = vmul.f32 1.442695, %v3746_v5  ;;  %v10096_v28 = vld [vmem:[#allocation30_spill] sm:$0xff] }
 0x832   :  { %v5596_v63 = vpop.eup %5595  ;;  %v9516_v6 = vmul.f32 %v5594_v27, %v9296_v0  ;;  %5615 = vpow2.f32 %v3844_v1  ;;  %v3854_v0 = vmul.f32 1.442695, %v3745_v8  ;;  %v3747_v1 = vsub.f32 0.0, %v9510_v57 }
 0x833   :  { %v5598_v55 = vpop.eup %5597  ;;  %5617 = vpow2.f32 %v3848_v59  ;;  %v9529_v27 = vmul.f32 %v9420_v43, %v10095_v58  ;;  %v3453_v24 = vadd.f32 %v10096_v28, %v3297_v41  ;;  %v3614_v59 = vadd.f32 %v10097_v32, %v3297_v41  ;;  %v5947_v43 = vld [vmem:[%s9782_s1 + $0x180] sm:$0xff] }
 0x834   :  { %v5600_v25 = vpop.eup %5599  ;;  %5619 = vpow2.f32 %v3846_v19  ;;  %v9534_v3 = vmul.f32 %v5588_v20, %v10098_v54  ;;  %v3858_v12 = vmul.f32 1.442695, %v3747_v1  ;;  %v3455_v19 = vadd.f32 %v9285_v60, %v3297_v41  ;;  %v5948_v60 = vld [vmem:[%s9782_s1 + $0x190] sm:$0xff] }
 0x835   :  { %v5602_v56 = vpop.eup %5601  ;;  %5621 = vpow2.f32 %v3850_v46  ;;  %v9543_v46 = vadd.f32 %v5947_v43, %v3453_v24  ;;  %v9546_v20 = vmul.f32 %v5596_v63, %v9301_v26  ;;  %v3616_v17 = vadd.f32 %v10100_v39, %v3297_v41  ;;  %v5949_v41 = vld [vmem:[%s9782_s1 + $0x188] sm:$0xff] }
 0x836   :  { %v5604_v5 = vpop.eup %5603  ;;  %5623 = vpow2.f32 %v3852_v34  ;;  %v9551_v34 = vadd.f32 %v5948_v60, %v3614_v59  ;;  %v9555_v1 = vmul.f32 %v5598_v55, %v9308_v31  ;;  %v9558_v28 = vmul.f32 %v5600_v25, %v9324_v48  ;;  %v5950_v59 = vld [vmem:[%s9782_s1 + $0x198] sm:$0xff]  ;;  %v10102_v60 = vld [vmem:[#allocation19_spill] sm:$0xff] }
 0x837   :  { %v5606_v8 = vpop.eup %5605  ;;  %v3930_v15 = vadd.f32 1.0, %v5604_v5  ;;  %5625 = vpow2.f32 %v3856_v7  ;;  %v3748_v26 = vsub.f32 0.0, %v9543_v46  ;;  %v9567_v32 = vadd.f32 %v5949_v41, %v3455_v19 }
 0x838   :  { %v5608_v58 = vpop.eup %5607  ;;  %5627 = vpow2.f32 %v3854_v0  ;;  %v9562_v0 = vmul.f32 %v5602_v56, %v9338_v51  ;;  %v9570_v55 = vmul.f32 %v5606_v8, %v9358_v37  ;;  %v4628_v51 = vpack.c.bf16 %v9413_v14, %v9317_v16 }
 0x839   :  { %v5610_v7 = vpop.eup %5609  ;;  %5629 = vrcp.f32 %v3930_v15  ;;  %v3860_v15 = vmul.f32 1.442695, %v3748_v26  ;;  %v3750_v56 = vsub.f32 0.0, %v9551_v34  ;;  %v9584_v37 = vadd.f32 %v5950_v59, %v3616_v17  ;;  %v10103_v26 = vld [vmem:[#allocation20_spill] sm:$0xff] }
 0x83a   :  { %v5612_v63 = vpop.eup %5611  ;;  %v3929_v24 = vadd.f32 1.0, %v5610_v7  ;;  %5631 = vpow2.f32 %v3858_v12  ;;  %v9578_v12 = vmul.f32 %v5608_v58, %v9368_v4  ;;  %4629 = vmatprep.subr.bf16.mxu0 %v4628_v51  ;;  %v4660_v4 = vpack.c.bf16 %v9423_v44, %v9375_v62 }
 0x83b   :  { %v5614_v31 = vpop.eup %5613  ;;  %v9573_v48 = vmul.f32 %v5612_v63, %v9389_v45  ;;  %v3302_v45 = vpop.permute.xlu1 %3301  ;;  %v3749_v43 = vsub.f32 0.0, %v9567_v32  ;;  %v10101_v58 = vpack.c.bf16 %v9332_v13, %v9254_v49  ;;  %v3751_v44 = vsub.f32 0.0, %v9584_v37  ;;  %v5951_v49 = vld [vmem:[%s9782_s1 + $0x1a0] sm:$0xff] }
 0x83c   :  { %v5616_v25 = vpop.eup %5615  ;;  %5633 = vrcp.f32 %v3929_v24  ;;  %v3931_v19 = vadd.f32 1.0, %v5614_v31  ;;  %v3459_v39 = vadd.f32 %v10102_v60, %v3302_v45  ;;  %4661 = vmatprep.subr.bf16.mxu1 %v4660_v4  ;;  %v3620_v63 = vadd.f32 %v10103_v26, %v3302_v45  ;;  %v10104_v24 = vld [vmem:[#allocation8_spill] sm:$0xff]  ;;  %v10105_v31 = vld [vmem:[#allocation23_spill] sm:$0xff] }
 0x83d   :  { %v5618_v5 = vpop.eup %5617  ;;  %v3932_v16 = vadd.f32 1.0, %v5616_v25  ;;  %5635 = vpow2.f32 %v3860_v15  ;;  %4631 = vmatpush1.bf16.msra.mxu0 %v10101_v58  ;;  %v3461_v41 = vadd.f32 %v10104_v24, %v3302_v45  ;;  %v10106_v15 = vld [vmem:[#allocation7_spill] sm:$0xff]  ;;  %v10108_v25 = vld [vmem:[#allocation14_spill] sm:$0xff]  ;;  %v3864_v26 = vmul.f32 1.442695, %v3750_v56 }
 0x83e   :  { %v5620_v14 = vpop.eup %5619  ;;  %v3934_v8 = vadd.f32 1.0, %v5618_v5  ;;  %v10107_v51 = vpack.c.bf16 %v10105_v31, %v10106_v15  ;;  %v9604_v13 = vadd.f32 %v5951_v49, %v3459_v39  ;;  %v3622_v59 = vadd.f32 %v10108_v25, %v3302_v45  ;;  %v5952_v4 = vld [vmem:[%s9782_s1 + $0x1b0] sm:$0xff]  ;;  %v5954_v45 = vld [vmem:[%s9782_s1 + $0x1b8] sm:$0xff] }
 0x83f   :  { %v5622_v17 = vpop.eup %5621  ;;  %5637 = vrcp.f32 %v3932_v16  ;;  %v3933_v7 = vadd.f32 1.0, %v5620_v14  ;;  %v9610_v14 = vadd.f32 %v5952_v4, %v3620_v63  ;;  %v10109_v4 = vld [vmem:[#allocation5_spill] sm:$0xff] }
 0x840   :  { %v5624_v62 = vpop.eup %5623  ;;  %5639 = vrcp.f32 %v3934_v8  ;;  %4663 = vmatpush1.bf16.msra.mxu1 %v10107_v51  ;;  %v5953_v8 = vld [vmem:[%s9782_s1 + $0x1a8] sm:$0xff]  ;;  %v3752_v31 = vsub.f32 0.0, %v9604_v13  ;;  %v3307_v51 = vpop.permute.xlu0 %3306  ;;  %v3935_v49 = vadd.f32 1.0, %v5622_v17 }
 0x841   :  { %v5626_v5 = vpop.eup %5625  ;;  %5641 = vrcp.f32 %v3931_v19  ;;  %v3936_v16 = vadd.f32 1.0, %v5624_v62  ;;  %v9615_v58 = vadd.f32 %v5953_v8, %v3461_v41  ;;  %v9620_v19 = vadd.f32 %v5954_v45, %v3622_v59 }
 0x842   :  { %v5628_v60 = vpop.eup %5627  ;;  %5643 = vrcp.f32 %v3933_v7  ;;  %v3938_v39 = vadd.f32 1.0, %v5626_v5  ;;  %v3862_v62 = vmul.f32 1.442695, %v3749_v43  ;;  %v3866_v7 = vmul.f32 1.442695, %v3751_v44  ;;  %v10110_v44 = vld [vmem:[#allocation15_spill] sm:$0xff] }
 0x843   :  { %v5630_v24 = vpop.eup %5629  ;;  %5645 = vrcp.f32 %v3936_v16  ;;  %v3937_v63 = vadd.f32 1.0, %v5628_v60  ;;  %v3754_v56 = vsub.f32 0.0, %v9610_v14  ;;  %v3753_v59 = vsub.f32 0.0, %v9615_v58 }
 0x844   :  { %v5632_v15 = vpop.eup %5631  ;;  %v9624_v41 = vmul.f32 %v5630_v24, %v9397_v23  ;;  %5647 = vrcp.f32 %v3938_v39  ;;  %v3755_v16 = vsub.f32 0.0, %v9620_v19  ;;  %v3465_v23 = vadd.f32 %v10109_v4, %v3307_v51  ;;  %v10111_v39 = vld [vmem:[#allocation10_spill] sm:$0xff] }
 0x845   :  { %5649 = vrcp.f32 %v3937_v63  ;;  %v3939_v25 = vadd.f32 1.0, %v5632_v15  ;;  %v3868_v8 = vmul.f32 1.442695, %v3752_v31  ;;  %v3626_v60 = vadd.f32 %v10110_v44, %v3307_v51  ;;  %v5955_v63 = vld [vmem:[%s9782_s1 + $0x1c0] sm:$0xff]  ;;  %v5956_v31 = vld [vmem:[%s9782_s1 + $0x1d0] sm:$0xff] }
 0x846   :  { %v5634_v5 = vpop.eup %5633  ;;  %5651 = vpow2.f32 %v3864_v26  ;;  %v3467_v45 = vadd.f32 %v10111_v39, %v3307_v51  ;;  %v3872_v24 = vmul.f32 1.442695, %v3754_v56  ;;  %v9637_v15 = vadd.f32 %v5955_v63, %v3465_v23  ;;  %v10113_v26 = vld [vmem:[#allocation18_spill] sm:$0xff] }
 0x847   :  { %5653 = vrcp.f32 %v3939_v25  ;;  %v5636_v17 = vpop.eup %5635  ;;  %v3628_v43 = vadd.f32 %v10113_v26, %v3307_v51  ;;  %v3870_v4 = vmul.f32 1.442695, %v3753_v59  ;;  %v9643_v25 = vadd.f32 %v5956_v31, %v3626_v60 }
 0x848   :  { %5655 = vpow2.f32 %v3862_v62  ;;  %10112 = vst [vmem:[#allocation17_spill] sm:$0xff] %v9637_v15  ;;  %v5957_v62 = vld [vmem:[%s9782_s1 + $0x1c8] sm:$0xff]  ;;  %v3874_v23 = vmul.f32 1.442695, %v3755_v16  ;;  %v3756_v51 = vsub.f32 0.0, %v9637_v15  ;;  %v3940_v60 = vadd.f32 1.0, %v5636_v17 }
 0x849   :  { %v5638_v54 = vpop.eup %5637  ;;  %5657 = vpow2.f32 %v3866_v7  ;;  %10114 = vst [vmem:[#allocation26_spill] sm:$0xff] %v9643_v25  ;;  %v9648_v56 = vadd.f32 %v5957_v62, %v3467_v45  ;;  %v5958_v7 = vld [vmem:[%s9782_s1 + $0x1d8] sm:$0xff]  ;;  %v3758_v63 = vsub.f32 0.0, %v9643_v25 }
 0x84a   :  { %v5640_v44 = vpop.eup %5639  ;;  %5659 = vrcp.f32 %v3935_v49  ;;  %v9654_v59 = vadd.f32 %v5958_v7, %v3628_v43  ;;  %v9659_v31 = vmul.f32 %v5638_v54, %v9446_v47  ;;  %v3876_v49 = vmul.f32 1.442695, %v3756_v51  ;;  %v3312_v7 = vpop.permute.xlu1 %3311 }
 0x84b   :  { %10115 = vst [vmem:[#allocation29_spill] sm:$0xff] %v9648_v56  ;;  %v5642_v39 = vpop.eup %5641  ;;  %5661 = vpow2.f32 %v3868_v8  ;;  %v3757_v26 = vsub.f32 0.0, %v9648_v56  ;;  %v9663_v15 = vmul.f32 %v5640_v44, %v9451_v42  ;;  %v3880_v43 = vmul.f32 1.442695, %v3758_v63 }
 0x84c   :  { %v5644_v45 = vpop.eup %5643  ;;  %5663 = vpow2.f32 %v3872_v24  ;;  %v3759_v16 = vsub.f32 0.0, %v9654_v59  ;;  %v4632_v47 = vpack.c.bf16 %v9520_v30, %v9428_v9  ;;  %v4664_v42 = vpack.c.bf16 %v9529_v27, %v9439_v2  ;;  %v10117_v9 = vld [vmem:[#allocation16_spill] sm:$0xff] }
 0x84d   :  { %v5646_v62 = vpop.eup %5645  ;;  %5665 = vpow2.f32 %v3870_v4  ;;  %v3878_v17 = vmul.f32 1.442695, %v3757_v26  ;;  %v10116_v4 = vld [vmem:[#allocation9_spill] sm:$0xff]  ;;  %v9677_v63 = vmul.f32 %v5634_v5, %v9418_v61  ;;  %v3632_v30 = vadd.f32 %v10117_v9, %v3312_v7 }
 0x84e   :  { %v5648_v8 = vpop.eup %5647  ;;  %v9666_v25 = vmul.f32 %v5646_v62, %v9488_v21  ;;  %5667 = vpow2.f32 %v3874_v23  ;;  %v3882_v56 = vmul.f32 1.442695, %v3759_v16  ;;  %v3471_v44 = vadd.f32 %v10116_v4, %v3312_v7  ;;  %4633 = vmatprep.subr.bf16.mxu0 %v4632_v47  ;;  %4665 = vmatprep.subr.bf16.mxu1 %v4664_v42  ;;  %v5959_v61 = vld [vmem:[%s9782_s1 + $0x1e0] sm:$0xff]  ;;  %v10121_v47 = vld [vmem:[#allocation22_spill] sm:$0xff] }
 0x84f   :  { %v5650_v54 = vpop.eup %5649  ;;  %v9671_v24 = vmul.f32 %v5648_v8, %v9493_v29  ;;  %5669 = vpow2.f32 %v3876_v49  ;;  %v10118_v2 = vpack.c.bf16 %v9392_v40, %v9383_v33  ;;  %v4061_v49 = vmul.f32 %v5644_v45, %v9458_v35  ;;  %v10120_v62 = vld [vmem:[#allocation21_spill] sm:$0xff]  ;;  %v5961_v45 = vld [vmem:[%s9782_s1 + $0x1e8] sm:$0xff] }
 0x850   :  { %v5652_v51 = vpop.eup %5651  ;;  %v4646_v21 = vpack.c.bf16 %v9666_v25, %v9659_v31  ;;  %5671 = vrcp.f32 %v3940_v60  ;;  %v9690_v27 = vadd.f32 %v5959_v61, %v3471_v44  ;;  %v4059_v60 = vmul.f32 %v5642_v39, %v9434_v18  ;;  %v5960_v18 = vld [vmem:[%s9782_s1 + $0x1f0] sm:$0xff] }
 0x851   :  { %v5654_v23 = vpop.eup %5653  ;;  %v4678_v29 = vpack.c.bf16 %v9671_v24, %v9663_v15  ;;  %v3942_v26 = vadd.f32 1.0, %v5652_v51  ;;  %5673 = vpow2.f32 %v3880_v43  ;;  %4635 = vmatpush1.bf16.msra.mxu0 %v10118_v2  ;;  %v10119_v16 = vpack.c.bf16 %v9410_v36, %v9405_v10 }
 0x852   :  { %v5656_v5 = vpop.eup %5655  ;;  %5675 = vpow2.f32 %v3878_v17  ;;  %v3473_v43 = vadd.f32 %v10120_v62, %v3312_v7  ;;  %v3760_v8 = vsub.f32 0.0, %v9690_v27  ;;  %v3634_v42 = vadd.f32 %v10121_v47, %v3312_v7 }
 0x853   :  { %4667 = vmatpush1.bf16.msra.mxu1 %v10119_v16  ;;  %v5658_v33 = vpop.eup %5657  ;;  %v3941_v40 = vadd.f32 1.0, %v5656_v5  ;;  %5677 = vpow2.f32 %v3882_v56  ;;  %v9703_v35 = vadd.f32 %v5960_v18, %v3632_v30  ;;  %v4636_v10 = vpack.c.bf16 %v9546_v20, %v9534_v3  ;;  %v5962_v3 = vld [vmem:[%s9782_s1 + $0x1f8] sm:$0xff] }
 0x854   :  { %v5660_v4 = vpop.eup %5659  ;;  %5679 = vrcp.f32 %v3942_v26  ;;  %v3943_v44 = vadd.f32 1.0, %v5658_v33  ;;  %v4065_v39 = vmul.f32 %v5650_v54, %v9498_v38  ;;  %v3884_v56 = vmul.f32 1.442695, %v3760_v8 }
 0x855   :  { %v5662_v36 = vpop.eup %5661  ;;  %5681 = vrcp.f32 %v3941_v40  ;;  %v9711_v17 = vadd.f32 %v5961_v45, %v3473_v43  ;;  %v4067_v51 = vmul.f32 %v5654_v23, %v9510_v57  ;;  %v9717_v20 = vadd.f32 %v5962_v3, %v3634_v42  ;;  %4637 = vmatprep.subr.bf16.mxu0 %v4636_v10 }
 0x856   :  { %v5664_v7 = vpop.eup %5663  ;;  %5683 = vrcp.f32 %v3943_v44  ;;  %v3944_v9 = vadd.f32 1.0, %v5662_v36  ;;  %v4063_v54 = vmul.f32 %v5660_v4, %v9465_v50  ;;  %v4668_v26 = vpack.c.bf16 %v9555_v1, %v9538_v22 }
 0x857   :  { %v5666_v38 = vpop.eup %5665  ;;  %v3946_v30 = vadd.f32 1.0, %v5664_v7  ;;  %5685 = vpow2.f32 %v3884_v56  ;;  %v10122_v57 = vpack.c.bf16 %v9504_v52, %v9476_v53  ;;  %v3762_v61 = vsub.f32 0.0, %v9703_v35 }
 0x858   :  { %v5668_v23 = vpop.eup %5667  ;;  %5687 = vrcp.f32 %v3944_v9  ;;  %v3945_v2 = vadd.f32 1.0, %v5666_v38  ;;  %v4640_v5 = vpack.c.bf16 %v9677_v63, %v9570_v55  ;;  %v3761_v62 = vsub.f32 0.0, %v9711_v17  ;;  %4669 = vmatprep.subr.bf16.mxu1 %v4668_v26  ;;  %v10126_v38 = vld [vmem:[#allocation17_spill] sm:$0xff] }
 0x859   :  { %4639 = vmatpush1.bf16.msra.mxu0 %v10122_v57  ;;  %v5670_v16 = vpop.eup %5669  ;;  %5689 = vrcp.f32 %v3946_v30  ;;  %v3947_v50 = vadd.f32 1.0, %v5668_v23  ;;  %v4672_v22 = vpack.c.bf16 %v4059_v60, %v9578_v12  ;;  %v3763_v53 = vsub.f32 0.0, %v9717_v20 }
 0x85a   :  { %v5672_v1 = vpop.eup %5671  ;;  %5691 = vrcp.f32 %v3945_v2  ;;  %v10123_v52 = vpack.c.bf16 %v9516_v6, %v9513_v11  ;;  %4641 = vmatprep.subr.bf16.mxu0 %v4640_v5  ;;  %v4644_v43 = vpack.c.bf16 %v4065_v39, %v4061_v49  ;;  %v4676_v33 = vpack.c.bf16 %v4067_v51, %v4063_v54 }
 0x85b   :  { %v5674_v55 = vpop.eup %5673  ;;  %5693 = vrcp.f32 %v3947_v50  ;;  %v3948_v63 = vadd.f32 1.0, %v5670_v16  ;;  %v10124_v40 = vpack.c.bf16 %v9573_v48, %v9558_v28  ;;  %v3888_v60 = vmul.f32 1.442695, %v3762_v61  ;;  %v10127_v16 = vld [vmem:[#allocation26_spill] sm:$0xff] }
 0x85c   :  { %4671 = vmatpush1.bf16.msra.mxu1 %v10123_v52  ;;  %v5676_v12 = vpop.eup %5675  ;;  %v3886_v47 = vmul.f32 1.442695, %v3761_v62  ;;  %v3890_v4 = vmul.f32 1.442695, %v3763_v53  ;;  %v10125_v11 = vpack.c.bf16 %v9624_v41, %v9562_v0  ;;  %v4068_v41 = vmul.f32 %v5672_v1, %v9543_v46  ;;  %v10128_v1 = vld [vmem:[#allocation29_spill] sm:$0xff] }
 0x85d   :  { %4673 = vmatprep.subr.bf16.mxu1 %v4672_v22  ;;  %4643 = vmatpush1.bf16.msra.mxu0 %v10124_v40  ;;  %v5678_v8 = vpop.eup %5677  ;;  %5695 = vrcp.f32 %v3948_v63  ;;  %v3950_v46 = vadd.f32 1.0, %v5674_v55  ;;  %v3949_v45 = vadd.f32 1.0, %v5676_v12  ;;  %v10129_v12 = vld [vmem:[#allocation12_spill] sm:$0xff] }
 0x85e   :  { %4645 = vmatprep.subr.bf16.mxu0 %v4644_v43  ;;  %v5680_v42 = vpop.eup %5679  ;;  %5697 = vpow2.f32 %v3888_v60  ;;  %v3951_v7 = vadd.f32 1.0, %v5678_v8  ;;  %v10130_v60 = vld [vmem:[#allocation13_spill] sm:$0xff] }
 0x85f   :  { %v5682_v6 = vpop.eup %5681  ;;  %5699 = vpow2.f32 %v3886_v47  ;;  %v4070_v25 = vmul.f32 %v5680_v42, %v9551_v34  ;;  %v10131_v42 = vld [vmem:[#allocation27_spill] sm:$0xff] }
 0x860   :  { %4675 = vmatpush1.bf16.msra.mxu1 %v10125_v11  ;;  %v5684_v28 = vpop.eup %5683  ;;  %5701 = vpow2.f32 %v3890_v4  ;;  %v4069_v36 = vmul.f32 %v5682_v6, %v9567_v32  ;;  %v4227_v4 = vmul.f32 1.0004252, %v10131_v42 }
 0x861   :  { %4677 = vmatprep.subr.bf16.mxu1 %v4676_v33  ;;  %4647 = vmatpush1.bf16.msra.mxu0 %v4646_v21  ;;  %v5686_v48 = vpop.eup %5685  ;;  %v4071_v15 = vmul.f32 %v5684_v28, %v9584_v37 }
 0x862   :  { %v5688_v49 = vpop.eup %5687  ;;  %v3952_v44 = vadd.f32 1.0, %v5686_v48 }
 0x863   :  { %v5690_v0 = vpop.eup %5689  ;;  %v4072_v18 = vmul.f32 %v5688_v49, %v9604_v13  ;;  %v10132_v49 = vld [vmem:[#allocation28_spill] sm:$0xff] }
 0x864   :  { %4679 = vmatpush1.bf16.msra.mxu1 %v4678_v29  ;;  %v5692_v10 = vpop.eup %5691  ;;  %v4074_v31 = vmul.f32 %v5690_v0, %v9610_v14  ;;  %5703 = vrcp.f32 %v3952_v44  ;;  %v4229_v44 = vmul.f32 1.0004252, %v10132_v49 }
 0x865   :  { %v5694_v21 = vpop.eup %5693  ;;  %v4650_v39 = vpack.c.bf16 %v4072_v18, %v4068_v41  ;;  %v4073_v56 = vmul.f32 %v5692_v10, %v9615_v58  ;;  %5705 = vrcp.f32 %v3950_v46 }
 0x866   :  { %v4682_v24 = vpack.c.bf16 %v4074_v31, %v4070_v25  ;;  %v4075_v29 = vmul.f32 %v5694_v21, %v9620_v19  ;;  %5707 = vrcp.f32 %v3949_v45 }
 0x867   :  { %v4648_v13 = vpack.c.bf16 %v4073_v56, %v4069_v36  ;;  %v5696_v34 = vpop.eup %5695  ;;  %5709 = vrcp.f32 %v3951_v7 }
 0x868   :  { %v4680_v51 = vpack.c.bf16 %v4075_v29, %v4071_v15  ;;  %v5698_v14 = vpop.eup %5697  ;;  %v4076_v54 = vmul.f32 %v5696_v34, %v10126_v38 }
 0x869   :  { %4649 = vmatprep.subr.bf16.mxu0 %v4648_v13  ;;  %v5700_v32 = vpop.eup %5699  ;;  %v3954_v9 = vadd.f32 1.0, %v5698_v14 }
 0x86a   :  { %4681 = vmatprep.subr.bf16.mxu1 %v4680_v51  ;;  %4651 = vmatpush1.bf16.msra.mxu0 %v4650_v39  ;;  %v5702_v58 = vpop.eup %5701  ;;  %v3953_v37 = vadd.f32 1.0, %v5700_v32 }
 0x86b   :  { %4683 = vmatpush1.bf16.msra.mxu1 %v4682_v24  ;;  %5711 = vrcp.f32 %v3954_v9  ;;  %v3955_v19 = vadd.f32 1.0, %v5702_v58 }
 0x86c   :  { %5713 = vrcp.f32 %v3953_v37 }
 0x86d   :  { %5715 = vrcp.f32 %v3955_v19 }
 0x86e   :  { %v5704_v3 = vpop.eup %5703 }
 0x86f   :  { %v4080_v30 = vmul.f32 %v5704_v3, %v9690_v27  ;;  %v5706_v57 = vpop.eup %5705 }
 0x870   :  { %v5708_v23 = vpop.eup %5707  ;;  %v4078_v50 = vmul.f32 %v5706_v57, %v10127_v16 }
 0x871   :  { %v4654_v26 = vpack.c.bf16 %v4080_v30, %v4076_v54  ;;  %v5710_v2 = vpop.eup %5709  ;;  %v4077_v53 = vmul.f32 %v5708_v23, %v10128_v1 }
 0x872   :  { %v4079_v43 = vmul.f32 %v5710_v2, %v9654_v59  ;;  %v4228_v59 = vmul.f32 1.0004252, %v10130_v60 }
 0x875   :  { %v5712_v61 = vpop.eup %5711 }
 0x876   :  { %v5714_v5 = vpop.eup %5713  ;;  %v4082_v62 = vmul.f32 %v5712_v61, %v9703_v35  ;;  %v5963_v35 = vld [vmem:[%s9785_s4] sm:$0xff]  ;;  %s5964_s4 = scalar_lea.vmem %s4249_s14, 512 }
 0x877   :  { %v5716_v22 = vpop.eup %5715  ;;  %v4081_v52 = vmul.f32 %v5714_v5, %v9711_v17  ;;  %v4226_v17 = vmul.f32 1.0004252, %v10129_v12  ;;  %p5965_p0 = scmp.ne.s32.totalorder %s4249_s14, %s5964_s4  ;;  %p5970_p2 = scmp.lt.s32.totalorder %s5964_s4, %s5964_s4 }
 0x878   :  { %v4686_v33 = vpack.c.bf16 %v4082_v62, %v4078_v50  ;;  %v4083_v27 = vmul.f32 %v5716_v22, %v9717_v20 }
 0x879   :  { %v4652_v55 = vpack.c.bf16 %v4081_v52, %v4077_v53  ;;  %p5971_p3 = por %p5970_p2, %p5969_p1 }
 0x87a   :  { %v4684_v63 = vpack.c.bf16 %v4083_v27, %v4079_v43 }
 0x87b   :  { %4653 = vmatprep.subr.bf16.mxu0 %v4652_v55  ;;  %p5972_p4 = pnand %p5971_p3, %p5965_p0 }
 0x87c   :  { %4685 = vmatprep.subr.bf16.mxu1 %v4684_v63  ;;  %4655 = vmatpush1.bf16.msra.mxu0 %v4654_v26 }
 0x87d   :  { %4687 = vmatpush1.bf16.msra.mxu1 %v4686_v33 }
 0x87f   :  { %4149 = vmatmul.mubr.f32.vlgmr.msra.gmra.mrb[134].mxu0 %v5963_v35 }
 0x880   :  { %4220 = vmatmul.mubr.f32.vlgmr.msra.gmra.mrb[134].mxu1 %v5963_v35 }
 0x952   :  { %v4150_v40 = vpop.f32.mrb[134].mxu0 }
 0x953   :  { %v4230_v8 = vmul.f32 -0.029167159, %v4150_v40  ;;  %v4221_v47 = vpop.f32.mrb[134].mxu1  ;;  %v4152_v20 = vpop.f32.mrb[135].mxu0 }
 0x954   :  { %v4232_v11 = vmul.f32 -0.029167159, %v4221_v47  ;;  %v4231_v6 = vmul.f32 -0.029167159, %v4152_v20  ;;  %v4223_v28 = vpop.f32.mrb[135].mxu1 }
 0x955   :  { %v4234_v48 = vadd.f32 %v4230_v8, %v4226_v17  ;;  %v4233_v0 = vmul.f32 -0.029167159, %v4223_v28 }
 0x956   :  { %v4236_v41 = vadd.f32 %v4232_v11, %v4228_v59  ;;  %v4235_v18 = vadd.f32 %v4231_v6, %v4227_v4 }
 0x957   :  { %4238 = vst [vmem:[#allocation2] sm:$0xff] %v4234_v48  ;;  %v4237_v10 = vadd.f32 %v4233_v0, %v4229_v44 }
 0x958   :  { %4240 = vst [vmem:[#allocation2 + $0x10] sm:$0xff] %v4236_v41  ;;  %4239 = vst [vmem:[#allocation2 + $0x8] sm:$0xff] %v4235_v18 }
 0x959   :  { %4241 = vst [vmem:[#allocation2 + $0x18] sm:$0xff] %v4237_v10 }
 0x95a   :  { %5975 = shalt.err (!%p5972_p4)
}
 0x95b   :  { %s5976_s2 = scalar_lea.hbm %s9786_s5, 512 }
 0x95c   :  { %p5977_p5 = scmp.ne.s32.totalorder %s9786_s5, %s5976_s2  ;;  %p5980_p6 = scmp.lt.u32.totalorder %s5976_s2, %s9786_s5 }
 0x95e   :  { %p5982_p7 = pnand %p5980_p6, %p5977_p5 }
 0x960   :  { %5985 = shalt.err (!%p5982_p7)
}
 0x961   :  { %4251 = dma.vmem_to_hbm [thread:$0]  %s4249_s14, 512, %s9786_s5, [#allocation3]  }
 0x962   :  { %5986 = dma.done.wait [#allocation3], 512  }
 0x963   :  { %5987 = vsyncadd [#allocation3], 4294966784 }
 0x964   :  { %4255 = vsyncpa [#allocation3], 1 }

</bundles_post_ra>
